<compile_context>
chip_gen: v7x
topology: tpu7x:2x2x1
jax: 0.10.0
libtpu: 0.0.40
codegen_flags: <defaults>
</compile_context>

<pallas_src>
import jax
import jax.numpy as jnp
from jax.experimental import pallas as pl
from jax.experimental.pallas import tpu as pltpu

EPS = 1e-5      # nn.BatchNorm2d default eps
LANES = 128     # TPU vreg lane width


def _round_up(x, m):
    return (x + m - 1) // m * m


# ---------------------------------------------------------------------------
# Kernels
# ---------------------------------------------------------------------------

def _im2col_conv(xp, w_ref, b_ref, y_ref, stats_ref):
    """Shared conv tail for one image.

    xp:        (H+2, W+2, Cin) f32, spatially zero-padded, channel-padded.
    w_ref:     (9*Cin, Cout)   bf16 folded HWIO weights.
    b_ref:     (1, Cout)       f32 conv bias.
    y_ref:     (1, H, W, Cout) f32 pre-BN conv output block.
    stats_ref: (1, 2, Cout)    f32 per-image partial BN stats [sum; sum_sq].
    """
    Hp, Wp, Cin = xp.shape
    H, W = Hp - 2, Wp - 2
    Cout = w_ref.shape[1]

    # im2col: 9 shifted views concatenated ONCE along the contraction axis
    # (each piece is a lane-aligned multiple of 128), then a single MXU matmul
    # with K = 9*Cin, bf16 operands, f32 accumulation.
    cols = [
        xp[kh:kh + H, kw:kw + W, :].reshape(H * W, Cin).astype(jnp.bfloat16)
        for kh in range(3) for kw in range(3)
    ]
    patches = jnp.concatenate(cols, axis=1)                      # (H*W, 9*Cin)
    acc = jnp.dot(patches, w_ref[...],
                  preferred_element_type=jnp.float32)            # (H*W, Cout)
    acc = acc + b_ref[...]                                       # conv bias

    y_ref[0] = acc.reshape(H, W, Cout).astype(y_ref.dtype)

    # Per-image partial BatchNorm statistics (reduced across images in JAX).
    s1 = jnp.sum(acc, axis=0, keepdims=True)                     # (1, Cout)
    s2 = jnp.sum(acc * acc, axis=0, keepdims=True)               # (1, Cout)
    stats_ref[0] = jnp.concatenate([s1, s2], axis=0)             # (2, Cout)


def conv_stats_kernel(x_ref, w_ref, b_ref, y_ref, stats_ref):
    # x_ref: (1, H+2, W+2, Cin) bf16, already spatially zero-padded.
    _im2col_conv(x_ref[0].astype(jnp.float32), w_ref, b_ref, y_ref, stats_ref)


def bn_relu_conv_stats_kernel(x_ref, scale_ref, shift_ref, w_ref, b_ref,
                              y_ref, stats_ref):
    # Fused: BatchNorm(prev conv) + ReLU + conv + bias + partial stats.
    # x_ref: (1, H+2, W+2, C) f32, spatially zero-padded PRE-BN conv1 output.
    a = jnp.maximum(x_ref[0] * scale_ref[...] + shift_ref[...], 0.0)  # BN+ReLU
    # Re-zero the 1-pixel halo: BN's shift makes the zero padding non-zero.
    Hp, Wp, _ = a.shape
    row = jax.lax.broadcasted_iota(jnp.int32, (Hp, Wp, 1), 0)
    col = jax.lax.broadcasted_iota(jnp.int32, (Hp, Wp, 1), 1)
    interior = (row >= 1) & (row <= Hp - 2) & (col >= 1) & (col <= Wp - 2)
    a = jnp.where(interior, a, 0.0)
    _im2col_conv(a, w_ref, b_ref, y_ref, stats_ref)


def bn_relu_kernel(x_ref, scale_ref, shift_ref, o_ref):
    # Final BatchNorm + ReLU epilogue (lane-dense 128-channel store).
    y = x_ref[0] * scale_ref[...] + shift_ref[...]
    o_ref[0] = jnp.maximum(y, 0.0).astype(o_ref.dtype)


# ---------------------------------------------------------------------------
# Wrappers
# ---------------------------------------------------------------------------

def _conv_call(kernel_fn, arrays, in_specs, N, H, W, K9, Cout):
    """One grid step per batch image; outputs conv result + per-image stats."""
    out_shape = (
        jax.ShapeDtypeStruct((N, H, W, Cout), jnp.float32),
        jax.ShapeDtypeStruct((N, 2, Cout), jnp.float32),
    )
    out_specs = (
        pl.BlockSpec((1, H, W, Cout), lambda n: (n, 0, 0, 0)),
        pl.BlockSpec((1, 2, Cout), lambda n: (n, 0, 0)),
    )
    bytes_accessed = int(
        sum(a.size * a.dtype.itemsize for a in arrays)
        + N * H * W * Cout * 4 + N * 2 * Cout * 4)
    cost = pl.CostEstimate(
        flops=int(2 * N * H * W * K9 * Cout),
        transcendentals=0,
        bytes_accessed=bytes_accessed)
    return pl.pallas_call(
        kernel_fn,
        grid=(N,),
        in_specs=in_specs,
        out_specs=out_specs,
        out_shape=out_shape,
        compiler_params=pltpu.CompilerParams(
            dimension_semantics=("parallel",),      # megacore-shard over batch
            vmem_limit_bytes=32 * 1024 * 1024),
        cost_estimate=cost,
    )(*arrays)


def _bn_scale_shift(stats, gamma, beta, count):
    """Fold batch statistics into per-channel scale/shift (PyTorch train-mode
    forward: biased variance over (N, H, W))."""
    tot = jnp.sum(stats, axis=0)                                  # (2, C)
    mean = tot[0] / count
    var = jnp.maximum(tot[1] / count - mean * mean, 0.0)          # biased
    scale = gamma * jax.lax.rsqrt(var + EPS)                      # (1, C)
    shift = beta - mean * scale                                   # (1, C)
    return scale.astype(jnp.float32), shift.astype(jnp.float32)


def _prep_block_params(w_hwio, b, g, beta, cin_pad, cout_pad):
    kh, kw, cin, cout = w_hwio.shape
    w = jnp.pad(w_hwio, ((0, 0), (0, 0), (0, cin_pad - cin), (0, cout_pad - cout)))
    w = w.reshape(kh * kw * cin_pad, cout_pad).astype(jnp.bfloat16)
    b = jnp.pad(b, (0, cout_pad - cout)).reshape(1, cout_pad).astype(jnp.float32)
    g = jnp.pad(g, (0, cout_pad - cout)).reshape(1, cout_pad).astype(jnp.float32)
    beta = jnp.pad(beta, (0, cout_pad - cout)).reshape(1, cout_pad).astype(jnp.float32)
    return w, b, g, beta


def double_conv2d_forward(x_nchw, params):
    """Pallas implementation of double_conv2d.forward (NCHW in / NCHW out)."""
    N, Cin, H, W = x_nchw.shape
    Cout = params["w1"].shape[-1]
    CPI = _round_up(Cin, LANES)      # lane-dense padded input channels
    CP = _round_up(Cout, LANES)      # lane-dense padded output channels

    # Layout prep (plain JAX, fused by XLA): NCHW -> NHWC, channel pad to 128
    # lanes, 1-pixel spatial zero pad, bf16 for the MXU path.
    x = jnp.transpose(x_nchw, (0, 2, 3, 1))
    x = jnp.pad(x, ((0, 0), (1, 1), (1, 1), (0, CPI - Cin))).astype(jnp.bfloat16)

    w1f, b1p, g1p, be1p = _prep_block_params(
        params["w1"], params["b1"], params["g1"], params["beta1"], CPI, CP)
    w2f, b2p, g2p, be2p = _prep_block_params(
        params["w2"], params["b2"], params["g2"], params["beta2"], CP, CP)

    img_spec = lambda c: pl.BlockSpec((1, H + 2, W + 2, c), lambda n: (n, 0, 0, 0))
    vec_spec = pl.BlockSpec((1, CP), lambda n: (0, 0))

    # Pass 1: conv1 + bias (+ per-image BN1 partial stats).
    y1, st1 = _conv_call(
        conv_stats_kernel, (x, w1f, b1p),
        [img_spec(CPI), pl.BlockSpec(w1f.shape, lambda n: (0, 0)), vec_spec],
        N, H, W, w1f.shape[0], CP)
    scale1, shift1 = _bn_scale_shift(st1, g1p, be1p, N * H * W)

    # Pass 2: BN1 + ReLU + conv2 + bias (+ BN2 partial stats), fused in-kernel.
    y1p = jnp.pad(y1, ((0, 0), (1, 1), (1, 1), (0, 0)))
    y2, st2 = _conv_call(
        bn_relu_conv_stats_kernel, (y1p, scale1, shift1, w2f, b2p),
        [img_spec(CP), vec_spec, vec_spec,
         pl.BlockSpec(w2f.shape, lambda n: (0, 0)), vec_spec],
        N, H, W, w2f.shape[0], CP)
    scale2, shift2 = _bn_scale_shift(st2, g2p, be2p, N * H * W)

    # Pass 3: BN2 + ReLU epilogue (lane-dense 128-channel store).
    out = pl.pallas_call(
        bn_relu_kernel,
        grid=(N,),
        in_specs=[pl.BlockSpec((1, H, W, CP), lambda n: (n, 0, 0, 0)),
                  vec_spec, vec_spec],
        out_specs=pl.BlockSpec((1, H, W, CP), lambda n: (n, 0, 0, 0)),
        out_shape=jax.ShapeDtypeStruct((N, H, W, CP), x_nchw.dtype),
        compiler_params=pltpu.CompilerParams(
            dimension_semantics=("parallel",),
            vmem_limit_bytes=32 * 1024 * 1024),
    )(y2, scale2, shift2)

    # Drop the channel padding, back to NCHW (wrapper-side layout plumbing).
    return jnp.transpose(out[..., :Cout], (0, 3, 1, 2))


# ---------------------------------------------------------------------------
# Init + reference
# ---------------------------------------------------------------------------

def init_params(key, cin, cout, kernel=3):
    """Deterministic init mimicking nn.Conv2d / nn.BatchNorm2d defaults."""
    k1, k2, k3, k4 = jax.random.split(key, 4)

    def conv_init(kw_key, kb_key, in_c, out_c):
        fan_in = in_c * kernel * kernel
        bound = 1.0 / jnp.sqrt(jnp.float32(fan_in))
        w = jax.random.uniform(kw_key, (kernel, kernel, in_c, out_c),
                               jnp.float32, -bound, bound)   # HWIO
        b = jax.random.uniform(kb_key, (out_c,), jnp.float32, -bound, bound)
        return w, b

    w1, b1 = conv_init(k1, k2, cin, cout)
    w2, b2 = conv_init(k3, k4, cout, cout)
    return {
        "w1": w1, "b1": b1, "g1": jnp.ones((cout,), jnp.float32),
        "beta1": jnp.zeros((cout,), jnp.float32),
        "w2": w2, "b2": b2, "g2": jnp.ones((cout,), jnp.float32),
        "beta2": jnp.zeros((cout,), jnp.float32),
    }


def reference_forward(x_nchw, params, matmul_dtype=None):
    """Pure-JAX reference.  matmul_dtype=jnp.bfloat16 reproduces the kernel's
    mixed-precision policy (bf16 MXU operands, f32 accumulation / f32 BN math);
    matmul_dtype=None is the exact f32 PyTorch-semantics reference."""

    def block(x, w_hwio, b, g, beta):
        if matmul_dtype is not None:
            x = x.astype(matmul_dtype).astype(jnp.float32)
            w_hwio = w_hwio.astype(matmul_dtype).astype(jnp.float32)
        w_oihw = jnp.transpose(w_hwio, (3, 2, 0, 1))
        y = jax.lax.conv_general_dilated(
            x, w_oihw, window_strides=(1, 1), padding=((1, 1), (1, 1)),
            dimension_numbers=("NCHW", "OIHW", "NCHW"),
            precision=jax.lax.Precision.HIGHEST)
        y = y + b[None, :, None, None]
        mean = jnp.mean(y, axis=(0, 2, 3), keepdims=True)
        var = jnp.mean((y - mean) ** 2, axis=(0, 2, 3), keepdims=True)
        y = (y - mean) * jax.lax.rsqrt(var + EPS)
        y = y * g[None, :, None, None] + beta[None, :, None, None]
        return jnp.maximum(y, 0.0)

    x = block(x_nchw, params["w1"], params["b1"], params["g1"], params["beta1"])
    x = block(x, params["w2"], params["b2"], params["g2"], params["beta2"])
    return x


if __name__ == "__main__":
    key = jax.random.PRNGKey(0)
    kx, kp = jax.random.split(key)

    N, CIN, COUT, H, W = 2, 4, 8, 16, 16
    x = jax.random.normal(kx, (N, CIN, H, W), jnp.float32)
    params = init_params(kp, CIN, COUT, kernel=3)

    out = jax.jit(double_conv2d_forward)(x, params)
    out = jax.block_until_ready(out)
    assert out.shape == (N, COUT, H, W), out.shape

    # Tight check: reference with the same mixed-precision policy as the kernel
    # (bf16 MXU operands, f32 accumulation + f32 BatchNorm).
    ref_bf16 = reference_forward(x, params, matmul_dtype=jnp.bfloat16)
    err_q = float(jnp.max(jnp.abs(out - ref_bf16)))
    assert jnp.allclose(out, ref_bf16, atol=5e-3, rtol=5e-3), err_q

    # Sanity check against the pure-f32 PyTorch-semantics reference (looser
    # tolerance only because of the intentional bf16 MXU inputs).
    ref_f32 = reference_forward(x, params, matmul_dtype=None)
    err_f = float(jnp.max(jnp.abs(out - ref_f32)))
    assert jnp.allclose(out, ref_f32, atol=5e-2, rtol=5e-2), err_f

    print("KERNEL_OK")
</pallas_src>

<mosaic_0001>
module attributes {stable_mosaic.version = 11 : i64} {
  func.func @conv_stats_kernel(%arg0: i32, %arg1: memref<1x18x18x128xbf16, #tpu.memory_space<vmem>>, %arg2: memref<1152x128xbf16, #tpu.memory_space<vmem>>, %arg3: memref<1x128xf32, #tpu.memory_space<vmem>>, %arg4: memref<1x16x16x128xf32, #tpu.memory_space<vmem>>, %arg5: memref<1x2x128xf32, #tpu.memory_space<vmem>>) attributes {dimension_semantics = [#tpu.dimension_semantics<parallel>], iteration_bounds = array<i64: 2>, scalar_prefetch = 0 : i64, scratch_operands = 0 : i64, tpu.core_type = #tpu.core_type<tc>, window_params = [{transform_indices = @transform_0, window_bounds = array<i64: 1, 18, 18, 128>}, {pipeline_mode = #tpu.pipeline_mode<synchronous>, transform_indices = @transform_1, window_bounds = array<i64: 1152, 128>}, {pipeline_mode = #tpu.pipeline_mode<synchronous>, transform_indices = @transform_2, window_bounds = array<i64: 1, 128>}, {transform_indices = @transform_3, window_bounds = array<i64: 1, 16, 16, 128>}, {transform_indices = @transform_4, window_bounds = array<i64: 1, 2, 128>}]} {
    %c0 = arith.constant 0 : index
    %c0_0 = arith.constant 0 : index
    %c0_1 = arith.constant 0 : index
    %c0_2 = arith.constant 0 : index
    %0 = vector.load %arg1[%c0, %c0_0, %c0_1, %c0_2] : memref<1x18x18x128xbf16, #tpu.memory_space<vmem>>, vector<1x18x18x128xbf16>
    %1 = vector.shape_cast %0 : vector<1x18x18x128xbf16> to vector<18x18x128xbf16>
    %2 = arith.extf %1 : vector<18x18x128xbf16> to vector<18x18x128xf32>
    %3 = vector.extract_strided_slice %2 {offsets = [0, 0, 0], sizes = [16, 16, 128], strides = [1, 1, 1]} : vector<18x18x128xf32> to vector<16x16x128xf32>
    %4 = vector.shape_cast %3 : vector<16x16x128xf32> to vector<256x128xf32>
    %5 = arith.truncf %4 : vector<256x128xf32> to vector<256x128xbf16>
    %6 = vector.extract_strided_slice %2 {offsets = [0, 1, 0], sizes = [16, 16, 128], strides = [1, 1, 1]} : vector<18x18x128xf32> to vector<16x16x128xf32>
    %7 = vector.shape_cast %6 : vector<16x16x128xf32> to vector<256x128xf32>
    %8 = arith.truncf %7 : vector<256x128xf32> to vector<256x128xbf16>
    %9 = vector.extract_strided_slice %2 {offsets = [0, 2, 0], sizes = [16, 16, 128], strides = [1, 1, 1]} : vector<18x18x128xf32> to vector<16x16x128xf32>
    %10 = vector.shape_cast %9 : vector<16x16x128xf32> to vector<256x128xf32>
    %11 = arith.truncf %10 : vector<256x128xf32> to vector<256x128xbf16>
    %12 = vector.extract_strided_slice %2 {offsets = [1, 0, 0], sizes = [16, 16, 128], strides = [1, 1, 1]} : vector<18x18x128xf32> to vector<16x16x128xf32>
    %13 = vector.shape_cast %12 : vector<16x16x128xf32> to vector<256x128xf32>
    %14 = arith.truncf %13 : vector<256x128xf32> to vector<256x128xbf16>
    %15 = vector.extract_strided_slice %2 {offsets = [1, 1, 0], sizes = [16, 16, 128], strides = [1, 1, 1]} : vector<18x18x128xf32> to vector<16x16x128xf32>
    %16 = vector.shape_cast %15 : vector<16x16x128xf32> to vector<256x128xf32>
    %17 = arith.truncf %16 : vector<256x128xf32> to vector<256x128xbf16>
    %18 = vector.extract_strided_slice %2 {offsets = [1, 2, 0], sizes = [16, 16, 128], strides = [1, 1, 1]} : vector<18x18x128xf32> to vector<16x16x128xf32>
    %19 = vector.shape_cast %18 : vector<16x16x128xf32> to vector<256x128xf32>
    %20 = arith.truncf %19 : vector<256x128xf32> to vector<256x128xbf16>
    %21 = vector.extract_strided_slice %2 {offsets = [2, 0, 0], sizes = [16, 16, 128], strides = [1, 1, 1]} : vector<18x18x128xf32> to vector<16x16x128xf32>
    %22 = vector.shape_cast %21 : vector<16x16x128xf32> to vector<256x128xf32>
    %23 = arith.truncf %22 : vector<256x128xf32> to vector<256x128xbf16>
    %24 = vector.extract_strided_slice %2 {offsets = [2, 1, 0], sizes = [16, 16, 128], strides = [1, 1, 1]} : vector<18x18x128xf32> to vector<16x16x128xf32>
    %25 = vector.shape_cast %24 : vector<16x16x128xf32> to vector<256x128xf32>
    %26 = arith.truncf %25 : vector<256x128xf32> to vector<256x128xbf16>
    %27 = vector.extract_strided_slice %2 {offsets = [2, 2, 0], sizes = [16, 16, 128], strides = [1, 1, 1]} : vector<18x18x128xf32> to vector<16x16x128xf32>
    %28 = vector.shape_cast %27 : vector<16x16x128xf32> to vector<256x128xf32>
    %29 = arith.truncf %28 : vector<256x128xf32> to vector<256x128xbf16>
    %30 = tpu.concatenate %5, %8, %11, %14, %17, %20, %23, %26, %29 in 1 : vector<256x128xbf16>, vector<256x128xbf16>, vector<256x128xbf16>, vector<256x128xbf16>, vector<256x128xbf16>, vector<256x128xbf16>, vector<256x128xbf16>, vector<256x128xbf16>, vector<256x128xbf16> -> vector<256x1152xbf16>
    %c0_3 = arith.constant 0 : index
    %c0_4 = arith.constant 0 : index
    %31 = vector.load %arg2[%c0_3, %c0_4] : memref<1152x128xbf16, #tpu.memory_space<vmem>>, vector<1152x128xbf16>
    %cst = arith.constant dense<0.000000e+00> : vector<256x128xf32>
    %32 = tpu.matmul %30, %31, %cst {dimension_numbers = #tpu.dot_dimension_numbers<[1], [0], [0], [1], [0, 0, 1, 1], [], []>} : vector<256x1152xbf16>, vector<1152x128xbf16>, vector<256x128xf32> -> vector<256x128xf32>
    %c0_5 = arith.constant 0 : index
    %c0_6 = arith.constant 0 : index
    %33 = vector.load %arg3[%c0_5, %c0_6] : memref<1x128xf32, #tpu.memory_space<vmem>>, vector<1x128xf32>
    %34 = vector.broadcast %33 : vector<1x128xf32> to vector<256x128xf32>
    %35 = arith.addf %32, %34 : vector<256x128xf32>
    %36 = vector.shape_cast %35 : vector<256x128xf32> to vector<16x16x128xf32>
    %c0_7 = arith.constant 0 : index
    %c0_8 = arith.constant 0 : index
    %c0_9 = arith.constant 0 : index
    %c0_10 = arith.constant 0 : index
    %37 = vector.load %arg4[%c0_7, %c0_8, %c0_9, %c0_10] : memref<1x16x16x128xf32, #tpu.memory_space<vmem>>, vector<1x16x16x128xf32>
    %38 = vector.shape_cast %37 : vector<1x16x16x128xf32> to vector<16x16x128xf32>
    %39 = vector.shape_cast %36 : vector<16x16x128xf32> to vector<1x16x16x128xf32>
    tpu.vector_store %arg4[%c0_7, %c0_8, %c0_9, %c0_10], %39 {strides = array<i32>} : memref<1x16x16x128xf32, #tpu.memory_space<vmem>>, vector<1x16x16x128xf32>,
    %cst_11 = arith.constant dense<0.000000e+00> : vector<128xf32>
    %40 = vector.multi_reduction <add>, %35, %cst_11 [0] : vector<256x128xf32> to vector<128xf32>
    %41 = vector.shape_cast %40 : vector<128xf32> to vector<1x128xf32>
    %42 = arith.mulf %35, %35 : vector<256x128xf32>
    %cst_12 = arith.constant dense<0.000000e+00> : vector<128xf32>
    %43 = vector.multi_reduction <add>, %42, %cst_12 [0] : vector<256x128xf32> to vector<128xf32>
    %44 = vector.shape_cast %43 : vector<128xf32> to vector<1x128xf32>
    %45 = tpu.concatenate %41, %44 in 0 : vector<1x128xf32>, vector<1x128xf32> -> vector<2x128xf32>
    %c0_13 = arith.constant 0 : index
    %c0_14 = arith.constant 0 : index
    %c0_15 = arith.constant 0 : index
    %46 = vector.load %arg5[%c0_13, %c0_14, %c0_15] : memref<1x2x128xf32, #tpu.memory_space<vmem>>, vector<1x2x128xf32>
    %47 = vector.shape_cast %46 : vector<1x2x128xf32> to vector<2x128xf32>
    %48 = vector.shape_cast %45 : vector<2x128xf32> to vector<1x2x128xf32>
    tpu.vector_store %arg5[%c0_13, %c0_14, %c0_15], %48 {strides = array<i32>} : memref<1x2x128xf32, #tpu.memory_space<vmem>>, vector<1x2x128xf32>,
    return
  }
  func.func @transform_0(%arg0: i32) -> (i32, i32, i32, i32) {
    %c0_i32 = arith.constant 0 : i32
    %c0_i32_0 = arith.constant 0 : i32
    %c0_i32_1 = arith.constant 0 : i32
    %c0_i32_2 = arith.constant 0 : i32
    return %arg0, %c0_i32, %c0_i32_0, %c0_i32_1 : i32, i32, i32, i32
  }
  func.func @transform_1(%arg0: i32) -> (i32, i32) {
    %c0_i32 = arith.constant 0 : i32
    %c0_i32_0 = arith.constant 0 : i32
    %c0_i32_1 = arith.constant 0 : i32
    return %c0_i32, %c0_i32_0 : i32, i32
  }
  func.func @transform_2(%arg0: i32) -> (i32, i32) {
    %c0_i32 = arith.constant 0 : i32
    %c0_i32_0 = arith.constant 0 : i32
    %c0_i32_1 = arith.constant 0 : i32
    return %c0_i32, %c0_i32_0 : i32, i32
  }
  func.func @transform_3(%arg0: i32) -> (i32, i32, i32, i32) {
    %c0_i32 = arith.constant 0 : i32
    %c0_i32_0 = arith.constant 0 : i32
    %c0_i32_1 = arith.constant 0 : i32
    %c0_i32_2 = arith.constant 0 : i32
    return %arg0, %c0_i32, %c0_i32_0, %c0_i32_1 : i32, i32, i32, i32
  }
  func.func @transform_4(%arg0: i32) -> (i32, i32, i32) {
    %c0_i32 = arith.constant 0 : i32
    %c0_i32_0 = arith.constant 0 : i32
    %c0_i32_1 = arith.constant 0 : i32
    return %arg0, %c0_i32, %c0_i32_0 : i32, i32, i32
  }
}

module attributes {stable_mosaic.version = 11 : i64} {
  func.func @bn_relu_kernel(%arg0: i32, %arg1: memref<1x16x16x128xf32, #tpu.memory_space<vmem>>, %arg2: memref<1x128xf32, #tpu.memory_space<vmem>>, %arg3: memref<1x128xf32, #tpu.memory_space<vmem>>, %arg4: memref<1x16x16x128xf32, #tpu.memory_space<vmem>>) attributes {dimension_semantics = [#tpu.dimension_semantics<parallel>], iteration_bounds = array<i64: 2>, scalar_prefetch = 0 : i64, scratch_operands = 0 : i64, tpu.core_type = #tpu.core_type<tc>, window_params = [{transform_indices = @transform_0, window_bounds = array<i64: 1, 16, 16, 128>}, {pipeline_mode = #tpu.pipeline_mode<synchronous>, transform_indices = @transform_1, window_bounds = array<i64: 1, 128>}, {pipeline_mode = #tpu.pipeline_mode<synchronous>, transform_indices = @transform_2, window_bounds = array<i64: 1, 128>}, {transform_indices = @transform_3, window_bounds = array<i64: 1, 16, 16, 128>}]} {
    %c0 = arith.constant 0 : index
    %c0_0 = arith.constant 0 : index
    %c0_1 = arith.constant 0 : index
    %c0_2 = arith.constant 0 : index
    %0 = vector.load %arg1[%c0, %c0_0, %c0_1, %c0_2] : memref<1x16x16x128xf32, #tpu.memory_space<vmem>>, vector<1x16x16x128xf32>
    %1 = vector.shape_cast %0 : vector<1x16x16x128xf32> to vector<16x16x128xf32>
    %c0_3 = arith.constant 0 : index
    %c0_4 = arith.constant 0 : index
    %2 = vector.load %arg2[%c0_3, %c0_4] : memref<1x128xf32, #tpu.memory_space<vmem>>, vector<1x128xf32>
    %3 = vector.shape_cast %2 : vector<1x128xf32> to vector<1x1x128xf32>
    %4 = vector.broadcast %3 : vector<1x1x128xf32> to vector<16x16x128xf32>
    %5 = arith.mulf %1, %4 : vector<16x16x128xf32>
    %c0_5 = arith.constant 0 : index
    %c0_6 = arith.constant 0 : index
    %6 = vector.load %arg3[%c0_5, %c0_6] : memref<1x128xf32, #tpu.memory_space<vmem>>, vector<1x128xf32>
    %7 = vector.shape_cast %6 : vector<1x128xf32> to vector<1x1x128xf32>
    %8 = vector.broadcast %7 : vector<1x1x128xf32> to vector<16x16x128xf32>
    %9 = arith.addf %5, %8 : vector<16x16x128xf32>
    %cst = arith.constant 0.000000e+00 : f32
    %10 = vector.broadcast %cst : f32 to vector<16x16x128xf32>
    %11 = arith.maximumf %9, %10 : vector<16x16x128xf32>
    %c0_7 = arith.constant 0 : index
    %c0_8 = arith.constant 0 : index
    %c0_9 = arith.constant 0 : index
    %c0_10 = arith.constant 0 : index
    %12 = vector.load %arg4[%c0_7, %c0_8, %c0_9, %c0_10] : memref<1x16x16x128xf32, #tpu.memory_space<vmem>>, vector<1x16x16x128xf32>
    %13 = vector.shape_cast %12 : vector<1x16x16x128xf32> to vector<16x16x128xf32>
    %14 = vector.shape_cast %11 : vector<16x16x128xf32> to vector<1x16x16x128xf32>
    tpu.vector_store %arg4[%c0_7, %c0_8, %c0_9, %c0_10], %14 {strides = array<i32>} : memref<1x16x16x128xf32, #tpu.memory_space<vmem>>, vector<1x16x16x128xf32>,
    return
  }
  func.func @transform_0(%arg0: i32) -> (i32, i32, i32, i32) {
    %c0_i32 = arith.constant 0 : i32
    %c0_i32_0 = arith.constant 0 : i32
    %c0_i32_1 = arith.constant 0 : i32
    %c0_i32_2 = arith.constant 0 : i32
    return %arg0, %c0_i32, %c0_i32_0, %c0_i32_1 : i32, i32, i32, i32
  }
  func.func @transform_1(%arg0: i32) -> (i32, i32) {
    %c0_i32 = arith.constant 0 : i32
    %c0_i32_0 = arith.constant 0 : i32
    %c0_i32_1 = arith.constant 0 : i32
    return %c0_i32, %c0_i32_0 : i32, i32
  }
  func.func @transform_2(%arg0: i32) -> (i32, i32) {
    %c0_i32 = arith.constant 0 : i32
    %c0_i32_0 = arith.constant 0 : i32
    %c0_i32_1 = arith.constant 0 : i32
    return %c0_i32, %c0_i32_0 : i32, i32
  }
  func.func @transform_3(%arg0: i32) -> (i32, i32, i32, i32) {
    %c0_i32 = arith.constant 0 : i32
    %c0_i32_0 = arith.constant 0 : i32
    %c0_i32_1 = arith.constant 0 : i32
    %c0_i32_2 = arith.constant 0 : i32
    return %arg0, %c0_i32, %c0_i32_0, %c0_i32_1 : i32, i32, i32, i32
  }
}

module attributes {stable_mosaic.version = 11 : i64} {
  func.func @bn_relu_conv_stats_kernel(%arg0: i32, %arg1: memref<1x18x18x128xf32, #tpu.memory_space<vmem>>, %arg2: memref<1x128xf32, #tpu.memory_space<vmem>>, %arg3: memref<1x128xf32, #tpu.memory_space<vmem>>, %arg4: memref<1152x128xbf16, #tpu.memory_space<vmem>>, %arg5: memref<1x128xf32, #tpu.memory_space<vmem>>, %arg6: memref<1x16x16x128xf32, #tpu.memory_space<vmem>>, %arg7: memref<1x2x128xf32, #tpu.memory_space<vmem>>) attributes {dimension_semantics = [#tpu.dimension_semantics<parallel>], iteration_bounds = array<i64: 2>, scalar_prefetch = 0 : i64, scratch_operands = 0 : i64, tpu.core_type = #tpu.core_type<tc>, window_params = [{transform_indices = @transform_0, window_bounds = array<i64: 1, 18, 18, 128>}, {pipeline_mode = #tpu.pipeline_mode<synchronous>, transform_indices = @transform_1, window_bounds = array<i64: 1, 128>}, {pipeline_mode = #tpu.pipeline_mode<synchronous>, transform_indices = @transform_2, window_bounds = array<i64: 1, 128>}, {pipeline_mode = #tpu.pipeline_mode<synchronous>, transform_indices = @transform_3, window_bounds = array<i64: 1152, 128>}, {pipeline_mode = #tpu.pipeline_mode<synchronous>, transform_indices = @transform_4, window_bounds = array<i64: 1, 128>}, {transform_indices = @transform_5, window_bounds = array<i64: 1, 16, 16, 128>}, {transform_indices = @transform_6, window_bounds = array<i64: 1, 2, 128>}]} {
    %c0 = arith.constant 0 : index
    %c0_0 = arith.constant 0 : index
    %c0_1 = arith.constant 0 : index
    %c0_2 = arith.constant 0 : index
    %0 = vector.load %arg1[%c0, %c0_0, %c0_1, %c0_2] : memref<1x18x18x128xf32, #tpu.memory_space<vmem>>, vector<1x18x18x128xf32>
    %1 = vector.shape_cast %0 : vector<1x18x18x128xf32> to vector<18x18x128xf32>
    %c0_3 = arith.constant 0 : index
    %c0_4 = arith.constant 0 : index
    %2 = vector.load %arg2[%c0_3, %c0_4] : memref<1x128xf32, #tpu.memory_space<vmem>>, vector<1x128xf32>
    %3 = vector.shape_cast %2 : vector<1x128xf32> to vector<1x1x128xf32>
    %4 = vector.broadcast %3 : vector<1x1x128xf32> to vector<18x18x128xf32>
    %5 = arith.mulf %1, %4 : vector<18x18x128xf32>
    %c0_5 = arith.constant 0 : index
    %c0_6 = arith.constant 0 : index
    %6 = vector.load %arg3[%c0_5, %c0_6] : memref<1x128xf32, #tpu.memory_space<vmem>>, vector<1x128xf32>
    %7 = vector.shape_cast %6 : vector<1x128xf32> to vector<1x1x128xf32>
    %8 = vector.broadcast %7 : vector<1x1x128xf32> to vector<18x18x128xf32>
    %9 = arith.addf %5, %8 : vector<18x18x128xf32>
    %cst = arith.constant 0.000000e+00 : f32
    %10 = vector.broadcast %cst : f32 to vector<18x18x128xf32>
    %11 = arith.maximumf %9, %10 : vector<18x18x128xf32>
    %12 = tpu.iota {dimensions = array<i32: 0>} : vector<18x18x1xi32>
    %13 = tpu.iota {dimensions = array<i32: 1>} : vector<18x18x1xi32>
    %c1_i32 = arith.constant 1 : i32
    %14 = vector.broadcast %c1_i32 : i32 to vector<18x18x1xi32>
    %15 = arith.cmpi sge, %12, %14 : vector<18x18x1xi32>
    %c16_i32 = arith.constant 16 : i32
    %16 = vector.broadcast %c16_i32 : i32 to vector<18x18x1xi32>
    %17 = arith.cmpi sle, %12, %16 : vector<18x18x1xi32>
    %18 = arith.andi %15, %17 : vector<18x18x1xi1>
    %c1_i32_7 = arith.constant 1 : i32
    %19 = vector.broadcast %c1_i32_7 : i32 to vector<18x18x1xi32>
    %20 = arith.cmpi sge, %13, %19 : vector<18x18x1xi32>
    %21 = arith.andi %18, %20 : vector<18x18x1xi1>
    %c16_i32_8 = arith.constant 16 : i32
    %22 = vector.broadcast %c16_i32_8 : i32 to vector<18x18x1xi32>
    %23 = arith.cmpi sle, %13, %22 : vector<18x18x1xi32>
    %24 = arith.andi %21, %23 : vector<18x18x1xi1>
    %cst_9 = arith.constant 0.000000e+00 : f32
    %25 = vector.shape_cast %24 : vector<18x18x1xi1> to vector<18x18x1xi1>
    %26 = vector.broadcast %25 : vector<18x18x1xi1> to vector<18x18x128xi1>
    %27 = vector.broadcast %cst_9 : f32 to vector<18x18x128xf32>
    %28 = arith.select %26, %11, %27 : vector<18x18x128xi1>, vector<18x18x128xf32>
    %29 = vector.extract_strided_slice %28 {offsets = [0, 0, 0], sizes = [16, 16, 128], strides = [1, 1, 1]} : vector<18x18x128xf32> to vector<16x16x128xf32>
    %30 = vector.shape_cast %29 : vector<16x16x128xf32> to vector<256x128xf32>
    %31 = arith.truncf %30 : vector<256x128xf32> to vector<256x128xbf16>
    %32 = vector.extract_strided_slice %28 {offsets = [0, 1, 0], sizes = [16, 16, 128], strides = [1, 1, 1]} : vector<18x18x128xf32> to vector<16x16x128xf32>
    %33 = vector.shape_cast %32 : vector<16x16x128xf32> to vector<256x128xf32>
    %34 = arith.truncf %33 : vector<256x128xf32> to vector<256x128xbf16>
    %35 = vector.extract_strided_slice %28 {offsets = [0, 2, 0], sizes = [16, 16, 128], strides = [1, 1, 1]} : vector<18x18x128xf32> to vector<16x16x128xf32>
    %36 = vector.shape_cast %35 : vector<16x16x128xf32> to vector<256x128xf32>
    %37 = arith.truncf %36 : vector<256x128xf32> to vector<256x128xbf16>
    %38 = vector.extract_strided_slice %28 {offsets = [1, 0, 0], sizes = [16, 16, 128], strides = [1, 1, 1]} : vector<18x18x128xf32> to vector<16x16x128xf32>
    %39 = vector.shape_cast %38 : vector<16x16x128xf32> to vector<256x128xf32>
    %40 = arith.truncf %39 : vector<256x128xf32> to vector<256x128xbf16>
    %41 = vector.extract_strided_slice %28 {offsets = [1, 1, 0], sizes = [16, 16, 128], strides = [1, 1, 1]} : vector<18x18x128xf32> to vector<16x16x128xf32>
    %42 = vector.shape_cast %41 : vector<16x16x128xf32> to vector<256x128xf32>
    %43 = arith.truncf %42 : vector<256x128xf32> to vector<256x128xbf16>
    %44 = vector.extract_strided_slice %28 {offsets = [1, 2, 0], sizes = [16, 16, 128], strides = [1, 1, 1]} : vector<18x18x128xf32> to vector<16x16x128xf32>
    %45 = vector.shape_cast %44 : vector<16x16x128xf32> to vector<256x128xf32>
    %46 = arith.truncf %45 : vector<256x128xf32> to vector<256x128xbf16>
    %47 = vector.extract_strided_slice %28 {offsets = [2, 0, 0], sizes = [16, 16, 128], strides = [1, 1, 1]} : vector<18x18x128xf32> to vector<16x16x128xf32>
    %48 = vector.shape_cast %47 : vector<16x16x128xf32> to vector<256x128xf32>
    %49 = arith.truncf %48 : vector<256x128xf32> to vector<256x128xbf16>
    %50 = vector.extract_strided_slice %28 {offsets = [2, 1, 0], sizes = [16, 16, 128], strides = [1, 1, 1]} : vector<18x18x128xf32> to vector<16x16x128xf32>
    %51 = vector.shape_cast %50 : vector<16x16x128xf32> to vector<256x128xf32>
    %52 = arith.truncf %51 : vector<256x128xf32> to vector<256x128xbf16>
    %53 = vector.extract_strided_slice %28 {offsets = [2, 2, 0], sizes = [16, 16, 128], strides = [1, 1, 1]} : vector<18x18x128xf32> to vector<16x16x128xf32>
    %54 = vector.shape_cast %53 : vector<16x16x128xf32> to vector<256x128xf32>
    %55 = arith.truncf %54 : vector<256x128xf32> to vector<256x128xbf16>
    %56 = tpu.concatenate %31, %34, %37, %40, %43, %46, %49, %52, %55 in 1 : vector<256x128xbf16>, vector<256x128xbf16>, vector<256x128xbf16>, vector<256x128xbf16>, vector<256x128xbf16>, vector<256x128xbf16>, vector<256x128xbf16>, vector<256x128xbf16>, vector<256x128xbf16> -> vector<256x1152xbf16>
    %c0_10 = arith.constant 0 : index
    %c0_11 = arith.constant 0 : index
    %57 = vector.load %arg4[%c0_10, %c0_11] : memref<1152x128xbf16, #tpu.memory_space<vmem>>, vector<1152x128xbf16>
    %cst_12 = arith.constant dense<0.000000e+00> : vector<256x128xf32>
    %58 = tpu.matmul %56, %57, %cst_12 {dimension_numbers = #tpu.dot_dimension_numbers<[1], [0], [0], [1], [0, 0, 1, 1], [], []>} : vector<256x1152xbf16>, vector<1152x128xbf16>, vector<256x128xf32> -> vector<256x128xf32>
    %c0_13 = arith.constant 0 : index
    %c0_14 = arith.constant 0 : index
    %59 = vector.load %arg5[%c0_13, %c0_14] : memref<1x128xf32, #tpu.memory_space<vmem>>, vector<1x128xf32>
    %60 = vector.broadcast %59 : vector<1x128xf32> to vector<256x128xf32>
    %61 = arith.addf %58, %60 : vector<256x128xf32>
    %62 = vector.shape_cast %61 : vector<256x128xf32> to vector<16x16x128xf32>
    %c0_15 = arith.constant 0 : index
    %c0_16 = arith.constant 0 : index
    %c0_17 = arith.constant 0 : index
    %c0_18 = arith.constant 0 : index
    %63 = vector.load %arg6[%c0_15, %c0_16, %c0_17, %c0_18] : memref<1x16x16x128xf32, #tpu.memory_space<vmem>>, vector<1x16x16x128xf32>
    %64 = vector.shape_cast %63 : vector<1x16x16x128xf32> to vector<16x16x128xf32>
    %65 = vector.shape_cast %62 : vector<16x16x128xf32> to vector<1x16x16x128xf32>
    tpu.vector_store %arg6[%c0_15, %c0_16, %c0_17, %c0_18], %65 {strides = array<i32>} : memref<1x16x16x128xf32, #tpu.memory_space<vmem>>, vector<1x16x16x128xf32>,
    %cst_19 = arith.constant dense<0.000000e+00> : vector<128xf32>
    %66 = vector.multi_reduction <add>, %61, %cst_19 [0] : vector<256x128xf32> to vector<128xf32>
    %67 = vector.shape_cast %66 : vector<128xf32> to vector<1x128xf32>
    %68 = arith.mulf %61, %61 : vector<256x128xf32>
    %cst_20 = arith.constant dense<0.000000e+00> : vector<128xf32>
    %69 = vector.multi_reduction <add>, %68, %cst_20 [0] : vector<256x128xf32> to vector<128xf32>
    %70 = vector.shape_cast %69 : vector<128xf32> to vector<1x128xf32>
    %71 = tpu.concatenate %67, %70 in 0 : vector<1x128xf32>, vector<1x128xf32> -> vector<2x128xf32>
    %c0_21 = arith.constant 0 : index
    %c0_22 = arith.constant 0 : index
    %c0_23 = arith.constant 0 : index
    %72 = vector.load %arg7[%c0_21, %c0_22, %c0_23] : memref<1x2x128xf32, #tpu.memory_space<vmem>>, vector<1x2x128xf32>
    %73 = vector.shape_cast %72 : vector<1x2x128xf32> to vector<2x128xf32>
    %74 = vector.shape_cast %71 : vector<2x128xf32> to vector<1x2x128xf32>
    tpu.vector_store %arg7[%c0_21, %c0_22, %c0_23], %74 {strides = array<i32>} : memref<1x2x128xf32, #tpu.memory_space<vmem>>, vector<1x2x128xf32>,
    return
  }
  func.func @transform_0(%arg0: i32) -> (i32, i32, i32, i32) {
    %c0_i32 = arith.constant 0 : i32
    %c0_i32_0 = arith.constant 0 : i32
    %c0_i32_1 = arith.constant 0 : i32
    %c0_i32_2 = arith.constant 0 : i32
    return %arg0, %c0_i32, %c0_i32_0, %c0_i32_1 : i32, i32, i32, i32
  }
  func.func @transform_1(%arg0: i32) -> (i32, i32) {
    %c0_i32 = arith.constant 0 : i32
    %c0_i32_0 = arith.constant 0 : i32
    %c0_i32_1 = arith.constant 0 : i32
    return %c0_i32, %c0_i32_0 : i32, i32
  }
  func.func @transform_2(%arg0: i32) -> (i32, i32) {
    %c0_i32 = arith.constant 0 : i32
    %c0_i32_0 = arith.constant 0 : i32
    %c0_i32_1 = arith.constant 0 : i32
    return %c0_i32, %c0_i32_0 : i32, i32
  }
  func.func @transform_3(%arg0: i32) -> (i32, i32) {
    %c0_i32 = arith.constant 0 : i32
    %c0_i32_0 = arith.constant 0 : i32
    %c0_i32_1 = arith.constant 0 : i32
    return %c0_i32, %c0_i32_0 : i32, i32
  }
  func.func @transform_4(%arg0: i32) -> (i32, i32) {
    %c0_i32 = arith.constant 0 : i32
    %c0_i32_0 = arith.constant 0 : i32
    %c0_i32_1 = arith.constant 0 : i32
    return %c0_i32, %c0_i32_0 : i32, i32
  }
  func.func @transform_5(%arg0: i32) -> (i32, i32, i32, i32) {
    %c0_i32 = arith.constant 0 : i32
    %c0_i32_0 = arith.constant 0 : i32
    %c0_i32_1 = arith.constant 0 : i32
    %c0_i32_2 = arith.constant 0 : i32
    return %arg0, %c0_i32, %c0_i32_0, %c0_i32_1 : i32, i32, i32, i32
  }
  func.func @transform_6(%arg0: i32) -> (i32, i32, i32) {
    %c0_i32 = arith.constant 0 : i32
    %c0_i32_0 = arith.constant 0 : i32
    %c0_i32_1 = arith.constant 0 : i32
    return %arg0, %c0_i32, %c0_i32_0 : i32, i32, i32
  }
}

</mosaic_0001>

<bundles_post_ra>
// kernel: double_conv2d_forward.5
= control target key start
LH: loop header
LB: loop body
LE: loop exit
PB: predicated region body
PF: predicated region fallthrough
CT: control target
= control target key end

     0   :  { %s451_s12 = smov 0   ;;  %s610_s0 = inlined_call_operand.vmem [shape: f32[2,16,16,128], index: 0, kind: input, shape index: {}]   ;;  %s611_s1 = inlined_call_operand.vmem [shape: f32[1,128], index: 1, kind: input, shape index: {}]   ;;  %s612_s2 = inlined_call_operand.vmem [shape: f32[1,128], index: 2, kind: input, shape index: {}]   ;;  %s613_s3 = inlined_call_operand.vmem [shape: f32[2,16,16,128], index: 3, kind: output, shape index: {}]  }
   0x1 LB: > { %s400_s13 = sadd.s32 4294967295, %s429_s12   ;;  %p404_p0 = scmp.ge.s32.totalorder %s429_s12, 1  ;;  %s429_s12 = sphi %s451_s12, %s13_s12  }
   0x2   : > { %p137_p1 = scmp.lt.s32.totalorder %s429_s12, 3 }
   0x4   : > { %p138_p2 = pnand %p404_p0, %p137_p1 }
   0x5   : > { %p161_p3 = scmp.lt.s32.totalorder (!%p138_p2), %s400_s13, 1  ;;  %v462_v0 = vld [vmem:[%s611_s1] ss:$0 sm:$0xff] (!%p138_p2) }
   0x6   : > { %141 = sbr.rel (%p138_p2) target bundleno = 46 (0x2e), region = 32  ;;  %v472_v1 = vld [vmem:[%s612_s2] ss:$0 sm:$0xff] (!%p138_p2) }
   0xd   : > { %s615_s13 = smov (!%p161_p3, %s400_s13), 1 }
   0xe   : > { %s413_s14 = sshll.u32 %s615_s13, 8 }
   0xf   : > { %s467_s19 = scalar_lea.vmem %s610_s0, %s413_s14  ;;  %s495_s24 = scalar_lea.vmem %s613_s3, %s413_s14 }
  0x10   : > { %v171_v2 = vld [vmem:[%s467_s19] sm:$0xff]  ;;  %v172_v3 = vld [vmem:[%s467_s19 + $0x8] sm:$0xff]  ;;  %v173_v4 = vld [vmem:[%s467_s19 + $0x10] sm:$0xff] }
  0x11   : > { %v210_v5 = vmul.f32 %v462_v0, %v171_v2  ;;  %v211_v6 = vmul.f32 %v462_v0, %v172_v3  ;;  %v212_v7 = vmul.f32 %v462_v0, %v173_v4  ;;  %v174_v8 = vld [vmem:[%s467_s19 + $0x18] sm:$0xff]  ;;  %v175_v9 = vld [vmem:[%s467_s19 + $0x20] sm:$0xff]  ;;  %v176_v10 = vld [vmem:[%s467_s19 + $0x28] sm:$0xff] }
  0x12   : > { %v213_v11 = vmul.f32 %v462_v0, %v174_v8  ;;  %v214_v12 = vmul.f32 %v462_v0, %v175_v9  ;;  %v215_v13 = vmul.f32 %v462_v0, %v176_v10  ;;  %v177_v14 = vld [vmem:[%s467_s19 + $0x30] sm:$0xff]  ;;  %v178_v15 = vld [vmem:[%s467_s19 + $0x38] sm:$0xff]  ;;  %v179_v24 = vld [vmem:[%s467_s19 + $0x40] sm:$0xff] }
  0x13   : > { %v249_v16 = vadd.f32 %v472_v1, %v210_v5  ;;  %v250_v17 = vadd.f32 %v472_v1, %v211_v6  ;;  %v251_v18 = vadd.f32 %v472_v1, %v212_v7  ;;  %v216_v19 = vmul.f32 %v462_v0, %v177_v14  ;;  %v180_v25 = vld [vmem:[%s467_s19 + $0x48] sm:$0xff]  ;;  %v181_v26 = vld [vmem:[%s467_s19 + $0x50] sm:$0xff]  ;;  %v182_v31 = vld [vmem:[%s467_s19 + $0x58] sm:$0xff] }
  0x14   : > { %v252_v20 = vadd.f32 %v472_v1, %v213_v11  ;;  %v253_v21 = vadd.f32 %v472_v1, %v214_v12  ;;  %v254_v22 = vadd.f32 %v472_v1, %v215_v13  ;;  %v217_v23 = vmul.f32 %v462_v0, %v178_v15  ;;  %v183_v32 = vld [vmem:[%s467_s19 + $0x60] sm:$0xff]  ;;  %v184_v33 = vld [vmem:[%s467_s19 + $0x68] sm:$0xff]  ;;  %v185_v38 = vld [vmem:[%s467_s19 + $0x70] sm:$0xff] }
  0x15   : > { %v281_v27 = vmax.f32 %v249_v16, 0.0  ;;  %v282_v28 = vmax.f32 %v250_v17, 0.0  ;;  %v283_v29 = vmax.f32 %v251_v18, 0.0  ;;  %v255_v30 = vadd.f32 %v472_v1, %v216_v19  ;;  %v186_v43 = vld [vmem:[%s467_s19 + $0x78] sm:$0xff]  ;;  %v187_v56 = vld [vmem:[%s467_s19 + $0x80] sm:$0xff]  ;;  %v188_v57 = vld [vmem:[%s467_s19 + $0x88] sm:$0xff] }
  0x16   : > { %v284_v34 = vmax.f32 %v252_v20, 0.0  ;;  %v285_v35 = vmax.f32 %v253_v21, 0.0  ;;  %v286_v36 = vmax.f32 %v254_v22, 0.0  ;;  %v256_v37 = vadd.f32 %v472_v1, %v217_v23  ;;  %v189_v58 = vld [vmem:[%s467_s19 + $0x90] sm:$0xff]  ;;  %v190_v63 = vld [vmem:[%s467_s19 + $0x98] sm:$0xff]  ;;  %v191_v2 = vld [vmem:[%s467_s19 + $0xa0] sm:$0xff] }
  0x17   : > { %313 = vst [vmem:[%s495_s24] sm:$0xff] %v281_v27  ;;  %314 = vst [vmem:[%s495_s24 + $0x8] sm:$0xff] %v282_v28  ;;  %v287_v39 = vmax.f32 %v255_v30, 0.0  ;;  %v218_v40 = vmul.f32 %v462_v0, %v179_v24  ;;  %v219_v41 = vmul.f32 %v462_v0, %v180_v25  ;;  %v220_v42 = vmul.f32 %v462_v0, %v181_v26  ;;  %v192_v3 = vld [vmem:[%s467_s19 + $0xa8] sm:$0xff]  ;;  %v193_v8 = vld [vmem:[%s467_s19 + $0xb0] sm:$0xff] }
  0x18   : > { %315 = vst [vmem:[%s495_s24 + $0x10] sm:$0xff] %v283_v29  ;;  %316 = vst [vmem:[%s495_s24 + $0x18] sm:$0xff] %v284_v34  ;;  %v288_v44 = vmax.f32 %v256_v37, 0.0  ;;  %v221_v45 = vmul.f32 %v462_v0, %v182_v31  ;;  %v222_v46 = vmul.f32 %v462_v0, %v183_v32  ;;  %v223_v47 = vmul.f32 %v462_v0, %v184_v33  ;;  %v194_v13 = vld [vmem:[%s467_s19 + $0xb8] sm:$0xff]  ;;  %v195_v26 = vld [vmem:[%s467_s19 + $0xc0] sm:$0xff] }
  0x19   : > { %317 = vst [vmem:[%s495_s24 + $0x20] sm:$0xff] %v285_v35  ;;  %318 = vst [vmem:[%s495_s24 + $0x28] sm:$0xff] %v286_v36  ;;  %v257_v48 = vadd.f32 %v472_v1, %v218_v40  ;;  %v258_v49 = vadd.f32 %v472_v1, %v219_v41  ;;  %v259_v50 = vadd.f32 %v472_v1, %v220_v42  ;;  %v196_v27 = vld [vmem:[%s467_s19 + $0xc8] sm:$0xff]  ;;  %v197_v28 = vld [vmem:[%s467_s19 + $0xd0] sm:$0xff] }
  0x1a   : > { %319 = vst [vmem:[%s495_s24 + $0x30] sm:$0xff] %v287_v39  ;;  %v224_v51 = vmul.f32 %v462_v0, %v185_v38  ;;  %320 = vst [vmem:[%s495_s24 + $0x38] sm:$0xff] %v288_v44  ;;  %v260_v52 = vadd.f32 %v472_v1, %v221_v45  ;;  %v261_v53 = vadd.f32 %v472_v1, %v222_v46  ;;  %v198_v33 = vld [vmem:[%s467_s19 + $0xd8] sm:$0xff]  ;;  %v199_v34 = vld [vmem:[%s467_s19 + $0xe0] sm:$0xff] }
  0x1b   : > { %v262_v54 = vadd.f32 %v472_v1, %v223_v47  ;;  %v225_v55 = vmul.f32 %v462_v0, %v186_v43  ;;  %v289_v59 = vmax.f32 %v257_v48, 0.0  ;;  %v290_v60 = vmax.f32 %v258_v49, 0.0  ;;  %v200_v35 = vld [vmem:[%s467_s19 + $0xe8] sm:$0xff]  ;;  %v201_v40 = vld [vmem:[%s467_s19 + $0xf0] sm:$0xff]  ;;  %v202_v45 = vld [vmem:[%s467_s19 + $0xf8] sm:$0xff] }
  0x1c   : > { %v291_v61 = vmax.f32 %v259_v50, 0.0  ;;  %v263_v62 = vadd.f32 %v472_v1, %v224_v51  ;;  %v292_v4 = vmax.f32 %v260_v52, 0.0  ;;  %v293_v5 = vmax.f32 %v261_v53, 0.0 }
  0x1d   : > { %v294_v6 = vmax.f32 %v262_v54, 0.0  ;;  %v264_v7 = vadd.f32 %v472_v1, %v225_v55  ;;  %321 = vst [vmem:[%s495_s24 + $0x40] sm:$0xff] %v289_v59  ;;  %322 = vst [vmem:[%s495_s24 + $0x48] sm:$0xff] %v290_v60  ;;  %v226_v10 = vmul.f32 %v462_v0, %v187_v56  ;;  %v227_v11 = vmul.f32 %v462_v0, %v188_v57 }
  0x1e   : > { %323 = vst [vmem:[%s495_s24 + $0x50] sm:$0xff] %v291_v61  ;;  %v295_v9 = vmax.f32 %v263_v62, 0.0  ;;  %v228_v12 = vmul.f32 %v462_v0, %v189_v58  ;;  %324 = vst [vmem:[%s495_s24 + $0x58] sm:$0xff] %v292_v4  ;;  %v229_v15 = vmul.f32 %v462_v0, %v190_v63  ;;  %v230_v16 = vmul.f32 %v462_v0, %v191_v2 }
  0x1f   : > { %325 = vst [vmem:[%s495_s24 + $0x60] sm:$0xff] %v293_v5  ;;  %326 = vst [vmem:[%s495_s24 + $0x68] sm:$0xff] %v294_v6  ;;  %v296_v14 = vmax.f32 %v264_v7, 0.0  ;;  %v231_v17 = vmul.f32 %v462_v0, %v192_v3  ;;  %v265_v18 = vadd.f32 %v472_v1, %v226_v10  ;;  %v266_v19 = vadd.f32 %v472_v1, %v227_v11 }
  0x20   : > { %327 = vst [vmem:[%s495_s24 + $0x70] sm:$0xff] %v295_v9  ;;  %v267_v20 = vadd.f32 %v472_v1, %v228_v12  ;;  %v232_v21 = vmul.f32 %v462_v0, %v193_v8  ;;  %v268_v22 = vadd.f32 %v472_v1, %v229_v15  ;;  %v269_v23 = vadd.f32 %v472_v1, %v230_v16 }
  0x21   : > { %328 = vst [vmem:[%s495_s24 + $0x78] sm:$0xff] %v296_v14  ;;  %v270_v24 = vadd.f32 %v472_v1, %v231_v17  ;;  %v233_v25 = vmul.f32 %v462_v0, %v194_v13  ;;  %v297_v29 = vmax.f32 %v265_v18, 0.0  ;;  %v298_v30 = vmax.f32 %v266_v19, 0.0 }
  0x22   : > { %v299_v31 = vmax.f32 %v267_v20, 0.0  ;;  %v271_v32 = vadd.f32 %v472_v1, %v232_v21  ;;  %v300_v36 = vmax.f32 %v268_v22, 0.0  ;;  %v301_v37 = vmax.f32 %v269_v23, 0.0 }
  0x23   : > { %v302_v38 = vmax.f32 %v270_v24, 0.0  ;;  %v272_v39 = vadd.f32 %v472_v1, %v233_v25  ;;  %329 = vst [vmem:[%s495_s24 + $0x80] sm:$0xff] %v297_v29  ;;  %330 = vst [vmem:[%s495_s24 + $0x88] sm:$0xff] %v298_v30  ;;  %v234_v42 = vmul.f32 %v462_v0, %v195_v26  ;;  %v235_v43 = vmul.f32 %v462_v0, %v196_v27 }
  0x24   : > { %331 = vst [vmem:[%s495_s24 + $0x90] sm:$0xff] %v299_v31  ;;  %v303_v41 = vmax.f32 %v271_v32, 0.0  ;;  %v236_v44 = vmul.f32 %v462_v0, %v197_v28  ;;  %332 = vst [vmem:[%s495_s24 + $0x98] sm:$0xff] %v300_v36  ;;  %v237_v47 = vmul.f32 %v462_v0, %v198_v33  ;;  %v238_v48 = vmul.f32 %v462_v0, %v199_v34 }
  0x25   : > { %333 = vst [vmem:[%s495_s24 + $0xa0] sm:$0xff] %v301_v37  ;;  %334 = vst [vmem:[%s495_s24 + $0xa8] sm:$0xff] %v302_v38  ;;  %v304_v46 = vmax.f32 %v272_v39, 0.0  ;;  %v239_v49 = vmul.f32 %v462_v0, %v200_v35  ;;  %v273_v50 = vadd.f32 %v472_v1, %v234_v42  ;;  %v274_v51 = vadd.f32 %v472_v1, %v235_v43 }
  0x26   : > { %335 = vst [vmem:[%s495_s24 + $0xb0] sm:$0xff] %v303_v41  ;;  %v275_v52 = vadd.f32 %v472_v1, %v236_v44  ;;  %v240_v53 = vmul.f32 %v462_v0, %v201_v40  ;;  %v276_v54 = vadd.f32 %v472_v1, %v237_v47  ;;  %v277_v55 = vadd.f32 %v472_v1, %v238_v48 }
  0x27   : > { %336 = vst [vmem:[%s495_s24 + $0xb8] sm:$0xff] %v304_v46  ;;  %v278_v56 = vadd.f32 %v472_v1, %v239_v49  ;;  %v241_v57 = vmul.f32 %v462_v0, %v202_v45  ;;  %v305_v58 = vmax.f32 %v273_v50, 0.0  ;;  %v306_v59 = vmax.f32 %v274_v51, 0.0 }
  0x28   : > { %v307_v60 = vmax.f32 %v275_v52, 0.0  ;;  %v279_v61 = vadd.f32 %v472_v1, %v240_v53  ;;  %v308_v62 = vmax.f32 %v276_v54, 0.0  ;;  %v309_v63 = vmax.f32 %v277_v55, 0.0 }
  0x29   : > { %v310_v2 = vmax.f32 %v278_v56, 0.0  ;;  %v280_v3 = vadd.f32 %v472_v1, %v241_v57  ;;  %337 = vst [vmem:[%s495_s24 + $0xc0] sm:$0xff] %v305_v58  ;;  %338 = vst [vmem:[%s495_s24 + $0xc8] sm:$0xff] %v306_v59 }
  0x2a   : > { %339 = vst [vmem:[%s495_s24 + $0xd0] sm:$0xff] %v307_v60  ;;  %v311_v4 = vmax.f32 %v279_v61, 0.0  ;;  %340 = vst [vmem:[%s495_s24 + $0xd8] sm:$0xff] %v308_v62 }
  0x2b   : > { %341 = vst [vmem:[%s495_s24 + $0xe0] sm:$0xff] %v309_v63  ;;  %342 = vst [vmem:[%s495_s24 + $0xe8] sm:$0xff] %v310_v2  ;;  %v312_v0 = vmax.f32 %v280_v3, 0.0 }
  0x2c   : > { %343 = vst [vmem:[%s495_s24 + $0xf0] sm:$0xff] %v311_v4 }
  0x2d   : > { %344 = vst [vmem:[%s495_s24 + $0xf8] sm:$0xff] %v312_v0 }
  0x2e PF: > { %s13_s12 = sadd.s32 1, %s429_s12  }
  0x2f   : > { %p10_p4 = scmp.ge.s32.totalorder %s13_s12, 4  }
  0x31   :  { %12 = sbr.rel (!%p10_p4) target bundleno = 1 (0x1), region = 62 }

// kernel: double_conv2d_forward.3
= control target key start
LH: loop header
LB: loop body
LE: loop exit
PB: predicated region body
PF: predicated region fallthrough
CT: control target
= control target key end

     0   :  { %s3084_s15 = smov 0   ;;  %s4374_s0 = inlined_call_operand.vmem [shape: bf16[2,18,18,128], index: 0, kind: input, shape index: {}]   ;;  %s4375_s1 = inlined_call_operand.vmem [shape: bf16[1152,128], index: 1, kind: input, shape index: {}]   ;;  %s4376_s2 = inlined_call_operand.vmem [shape: f32[1,128], index: 2, kind: input, shape index: {}]   ;;  %s4377_s3 = inlined_call_operand.vmem [shape: f32[2,16,16,128], index: 3, kind: output, shape index: {0}]   ;;  %s4378_s4 = inlined_call_operand.vmem [shape: f32[2,2,128], index: 4, kind: output, shape index: {1}]  }
   0x1 LB: > { %s2295_s16 = sadd.s32 4294967295, %s3057_s15   ;;  %p2299_p0 = scmp.ge.s32.totalorder %s3057_s15, 1  ;;  %s3057_s15 = sphi %s3084_s15, %s15_s15  }
   0x2   : > { %p165_p1 = scmp.lt.s32.totalorder %s3057_s15, 3 }
   0x4   : > { %p166_p2 = pnand %p2299_p0, %p165_p1 }
   0x5   : > { %v2943_v0 = vld [vmem:[%s4375_s1 + $0x40] sm:$0xff] (!%p166_p2)   ;;  %p195_p3 = scmp.lt.s32.totalorder (!%p166_p2), %s2295_s16, 1  ;;  %v2945_v2 = vld [vmem:[%s4375_s1 + $0x48] sm:$0xff] (!%p166_p2)   ;;  %v2947_v4 = vld [vmem:[%s4375_s1 + $0x50] sm:$0xff] (!%p166_p2)   ;;  %vm382_vm0 = vcmask (!%p166_p2), 1046528   ;;  %vm511_vm1 = vcmask (!%p166_p2), 1045504  }
   0x6   : > { %169 = sbr.rel (%p166_p2) target bundleno = 558 (0x22e), region = 32  ;;  %v2944_v1 = vld [vmem:[%s4375_s1] sm:$0xff] (!%p166_p2)   ;;  %2398 = vmatprep.subr.bf16.mxu0 (!%p166_p2), %v2943_v0  ;;  %2918 = vmatprep.subr.bf16.mxu1 (!%p166_p2), %v2943_v0  ;;  %v2946_v3 = vld [vmem:[%s4375_s1 + $0x8] sm:$0xff] (!%p166_p2)   ;;  %v2948_v5 = vld [vmem:[%s4375_s1 + $0x10] sm:$0xff] (!%p166_p2)   ;;  %vm2206_vm2 = vcmask (!%p166_p2), 1040384  }
   0x7   : > { %2399 = vmatpush3.bf16.msra.mxu0 (!%p166_p2), %v2944_v1  ;;  %2926 = vmatpush3.bf16.msra.mxu1 (!%p166_p2), %v2944_v1  ;;  %v2949_v6 = vld [vmem:[%s4375_s1 + $0x58] sm:$0xff] (!%p166_p2)   ;;  %v2951_v8 = vld [vmem:[%s4375_s1 + $0x60] sm:$0xff] (!%p166_p2)   ;;  %v2953_v10 = vld [vmem:[%s4375_s1 + $0x68] sm:$0xff] (!%p166_p2)  }
   0x8   : > { %2400 = vmatprep.subr.bf16.mxu0 (!%p166_p2), %v2945_v2  ;;  %2919 = vmatprep.subr.bf16.mxu1 (!%p166_p2), %v2945_v2  ;;  %v2950_v7 = vld [vmem:[%s4375_s1 + $0x18] sm:$0xff] (!%p166_p2)   ;;  %v2952_v9 = vld [vmem:[%s4375_s1 + $0x20] sm:$0xff] (!%p166_p2)   ;;  %v2954_v21 = vld [vmem:[%s4375_s1 + $0x28] sm:$0xff] (!%p166_p2)  }
   0x9   : > { %v2955_v25 = vld [vmem:[%s4375_s1 + $0x70] sm:$0xff] (!%p166_p2)   ;;  %v2957_v35 = vld [vmem:[%s4375_s1 + $0x78] sm:$0xff] (!%p166_p2)   ;;  %v2961_v48 = vld [vmem:[%s4375_s1 + $0xc0] sm:$0xff] (!%p166_p2)  }
   0xa   : > { %v2956_v33 = vld [vmem:[%s4375_s1 + $0x30] sm:$0xff] (!%p166_p2)   ;;  %v2958_v44 = vld [vmem:[%s4375_s1 + $0x38] sm:$0xff] (!%p166_p2)   ;;  %v2962_v52 = vld [vmem:[%s4375_s1 + $0x140] sm:$0xff] (!%p166_p2)  }
   0xb   : > { %2401 = vmatpush3.bf16.msra.mxu0 (!%p166_p2), %v2946_v3  ;;  %2927 = vmatpush3.bf16.msra.mxu1 (!%p166_p2), %v2946_v3  ;;  %v2963_v56 = vld [vmem:[%s4375_s1 + $0x80] sm:$0xff] (!%p166_p2)   ;;  %v2965_v62 = vld [vmem:[%s4375_s1 + $0xc8] sm:$0xff] (!%p166_p2)  }
   0xc   : > { %2402 = vmatprep.subr.bf16.mxu0 (!%p166_p2), %v2947_v4  ;;  %2920 = vmatprep.subr.bf16.mxu1 (!%p166_p2), %v2947_v4  ;;  %v2964_v59 = vld [vmem:[%s4375_s1 + $0x100] sm:$0xff] (!%p166_p2)   ;;  %v2972_v0 = vld [vmem:[%s4375_s1 + $0x148] sm:$0xff] (!%p166_p2)  }
   0xd   : > { %s4428_s16 = smov (!%p195_p3, %s2295_s16), 1 }
   0xe   : > { %s2934_s5 = smul.u32 216, %s4428_s16 }
   0xf   : > { %2403 = vmatpush3.bf16.msra.mxu0 %v2948_v5  ;;  %2928 = vmatpush3.bf16.msra.mxu1 %v2948_v5 }
  0x10   : > { %2404 = vmatprep.subr.bf16.mxu0 %v2949_v6  ;;  %2921 = vmatprep.subr.bf16.mxu1 %v2949_v6  ;;  %s3125_s12 = scalar_lea.vmem %s4374_s0, %s2934_s5  ;;  %s2303_s5 = sshll.u32 %s4428_s16, 1 }
  0x11   : > { %v3134_v11 = vld [vmem:[%s3125_s12] sm:$0xff]   ;;  %v3137_v12 = vld [vmem:[%s3125_s12 + $0x8] sm:$0x1]  ;;  %v3140_v13 = vld [vmem:[%s3125_s12 + $0x90] sm:$0xff]   ;;  %s208_s8 = scalar_lea.vmem %s4378_s4, %s2303_s5 }
  0x12   : > { %v264_v14 = vunpack.c.l.bf16 %v3134_v11  ;;  %v265_v15 = vunpack.c.h.bf16 %v3134_v11  ;;  %v266_v16 = vunpack.c.l.bf16 %v3137_v12  ;;  %v3146_v17 = vld [vmem:[%s3125_s12 + $0x98] sm:$0x1]  ;;  %v300_v18 = vunpack.c.l.bf16 %v3140_v13  ;;  %v3182_v37 = vld [vmem:[%s3125_s12 + $0xc] sm:$0xff]   ;;  %v3185_v38 = vld [vmem:[%s3125_s12 + $0x14] sm:$0x1] }
  0x13   : > { %2405 = vmatpush3.bf16.msra.mxu0 %v2950_v7  ;;  %2929 = vmatpush3.bf16.msra.mxu1 %v2950_v7  ;;  %v301_v19 = vunpack.c.h.bf16 %v3140_v13  ;;  %v302_v20 = vunpack.c.l.bf16 %v3146_v17  ;;  %v267_v39 = vunpack.c.l.bf16 %v3182_v37  ;;  %v268_v40 = vunpack.c.h.bf16 %v3182_v37  ;;  %v3191_v42 = vld [vmem:[%s3125_s12 + $0x9c] sm:$0xff]   ;;  %v3194_v43 = vld [vmem:[%s3125_s12 + $0xa4] sm:$0x1]  ;;  %v3251_v7 = vld [vmem:[%s3125_s12 + $0xa8] sm:$0xff]  }
  0x14   : > { %2406 = vmatprep.subr.bf16.mxu0 %v2951_v8  ;;  %2922 = vmatprep.subr.bf16.mxu1 %v2951_v8  ;;  %v383_v22 = vrot.slane %v264_v14, 1  ;;  %v384_v23 = vrot.slane %v265_v15, 1  ;;  %v386_v24 = vrot.slane %v266_v16, 1  ;;  %v443_v26 = vrot.slane %v300_v18, 1  ;;  %v3240_v1 = vld [vmem:[%s3125_s12 + $0x18] sm:$0xff]   ;;  %v3020_v17 = vld [vmem:[%s4375_s1 + $0x1a8] sm:$0xff]  }
  0x15   : > { %v444_v27 = vrot.slane %v301_v19, 1  ;;  %v446_v30 = vrot.slane %v302_v20, 1  ;;  %v269_v41 = vunpack.c.l.bf16 %v3185_v38  ;;  %v303_v45 = vunpack.c.l.bf16 %v3191_v42  ;;  %v3243_v2 = vld [vmem:[%s3125_s12 + $0x20] sm:$0x1]  ;;  %v3254_v8 = vld [vmem:[%s3125_s12 + $0xb0] sm:$0x1] }
  0x16   : > { %v385_v28 = vsel %vm382_vm0, %v383_v22, %v384_v23  ;;  %v387_v29 = vsel %vm382_vm0, %v384_v23, %v386_v24  ;;  %v304_v46 = vunpack.c.h.bf16 %v3191_v42  ;;  %v4388_v47 = vunpack.c.l.bf16 %v3194_v43  ;;  %v2974_v23 = vld [vmem:[%s4375_s1 + $0x108] sm:$0xff]  }
  0x17   : > { %2407 = vmatpush3.bf16.msra.mxu0 %v2952_v9  ;;  %2930 = vmatpush3.bf16.msra.mxu1 %v2952_v9  ;;  %v495_v31 = vpack.c.bf16 %v387_v29, %v385_v28  ;;  %v445_v32 = vsel %vm382_vm0, %v443_v26, %v444_v27  ;;  %v447_v34 = vsel %vm382_vm0, %v444_v27, %v446_v30  ;;  %v388_v49 = vrot.slane %v267_v39, 1  ;;  %v2966_v9 = vld [vmem:[%s4375_s1 + $0x88] sm:$0xff]   ;;  %v2969_v27 = vld [vmem:[%s4375_s1 + $0xd0] sm:$0xff]  }
  0x18   : > { %2408 = vmatprep.subr.bf16.mxu0 %v2953_v10  ;;  %2923 = vmatprep.subr.bf16.mxu1 %v2953_v10  ;;  %v3179_v36 = vpack.c.bf16 %v447_v34, %v445_v32  ;;  %v389_v50 = vrot.slane %v268_v40, 1  ;;  %v391_v51 = vrot.slane %v269_v41, 1  ;;  %v448_v53 = vrot.slane %v303_v45, 1  ;;  %v2997_v38 = vld [vmem:[%s4375_s1 + $0x1c8] sm:$0xff]  }
  0x19   : > { %1295 = vmatprep.mubr.bf16.mxu0 %v495_v31  ;;  %v449_v54 = vrot.slane %v304_v46, 1  ;;  %v451_v55 = vrot.slane %v4388_v47, 1  ;;  %v270_v4 = vunpack.c.l.bf16 %v3240_v1  ;;  %v271_v5 = vunpack.c.h.bf16 %v3240_v1 }
  0x1a   : > { %1391 = vmatprep.mubr.bf16.mxu1 %v3179_v36  ;;  %v390_v57 = vsel %vm382_vm0, %v388_v49, %v389_v50  ;;  %v392_v58 = vsel %vm382_vm0, %v389_v50, %v391_v51  ;;  %v272_v6 = vunpack.c.l.bf16 %v3243_v2  ;;  %v4387_v10 = vunpack.c.l.bf16 %v3251_v7  ;;  %v3005_v2 = vld [vmem:[%s4375_s1 + $0x190] sm:$0xff]  }
  0x1b   : > { %2409 = vmatpush3.bf16.msra.mxu0 %v2954_v21  ;;  %2931 = vmatpush3.bf16.msra.mxu1 %v2954_v21  ;;  %v450_v60 = vsel %vm382_vm0, %v448_v53, %v449_v54  ;;  %v452_v61 = vsel %vm382_vm0, %v449_v54, %v451_v55  ;;  %v3234_v63 = vpack.c.bf16 %v392_v58, %v390_v57  ;;  %v4383_v21 = vunpack.c.h.bf16 %v3251_v7  ;;  %v3303_v53 = vld [vmem:[%s3125_s12 + $0xb4] sm:$0xff]   ;;  %v3306_v54 = vld [vmem:[%s3125_s12 + $0xbc] sm:$0x1] }
  0x1c   : > { %2410 = vmatprep.subr.bf16.mxu0 %v2955_v25  ;;  %2924 = vmatprep.subr.bf16.mxu1 %v2955_v25  ;;  %v3245_v3 = vpack.c.bf16 %v452_v61, %v450_v60  ;;  %v4382_v22 = vunpack.c.l.bf16 %v3254_v8  ;;  %v393_v24 = vrot.slane %v270_v4, 1  ;;  %v394_v25 = vrot.slane %v271_v5, 1  ;;  %v2971_v55 = vld [vmem:[%s4375_s1 + $0xd8] sm:$0xff]  }
  0x1d   : > { %v396_v26 = vrot.slane %v272_v6, 1  ;;  %v453_v28 = vrot.slane %v4387_v10, 1  ;;  %v454_v29 = vrot.slane %v4383_v21, 1  ;;  %v4381_v57 = vunpack.c.l.bf16 %v3303_v53  ;;  %v2973_v60 = vld [vmem:[%s4375_s1 + $0x98] sm:$0xff]   ;;  %v3416_v21 = vld [vmem:[%s3125_s12 + $0x50] sm:$0x1] }
  0x1e   : > { %v456_v30 = vrot.slane %v4382_v22, 1  ;;  %v395_v31 = vsel %vm382_vm0, %v393_v24, %v394_v25  ;;  %v4380_v58 = vunpack.c.h.bf16 %v3303_v53  ;;  %v2996_v22 = vld [vmem:[%s4375_s1 + $0x160] sm:$0xff]   ;;  %v518_v10 = vrot.slane %v268_v40, 2  ;;  %v3476_v40 = vld [vmem:[%s3125_s12 + $0x54] sm:$0xff]  }
  0x1f   : > { %2411 = vmatpush3.bf16.msra.mxu0 %v2956_v33  ;;  %2932 = vmatpush3.bf16.msra.mxu1 %v2956_v33  ;;  %v397_v32 = vsel %vm382_vm0, %v394_v25, %v396_v26  ;;  %v2970_v33 = vld [vmem:[%s4375_s1 + $0x90] sm:$0xff]   ;;  %v455_v34 = vsel %vm382_vm0, %v453_v28, %v454_v29  ;;  %v458_v24 = vrot.slane %v4381_v57, 1  ;;  %v513_v57 = vrot.slane %v265_v15, 2 }
  0x20   : > { %2412 = vmatprep.subr.bf16.mxu0 %v2957_v35  ;;  %2925 = vmatprep.subr.bf16.mxu1 %v2957_v35  ;;  %v457_v35 = vsel %vm382_vm0, %v454_v29, %v456_v30  ;;  %v3297_v49 = vpack.c.bf16 %v397_v32, %v395_v31  ;;  %v459_v25 = vrot.slane %v4380_v58, 1  ;;  %v2986_v29 = vld [vmem:[%s4375_s1 + $0x110] sm:$0xff]   ;;  %v520_v47 = vrot.slane %v269_v41, 2  ;;  %v3479_v41 = vld [vmem:[%s3125_s12 + $0x5c] sm:$0x1] }
  0x21   : > { %v3349_v32 = vld [vmem:[%s3125_s12 + $0x30] sm:$0xff]  }
  0x22   : > { %v460_v30 = vsel %vm382_vm0, %v458_v24, %v459_v25 }
  0x23   : > { %2413 = vmatpush3.bf16.msra.mxu0 %v2958_v44  ;;  %2933 = vmatpush3.bf16.msra.mxu1 %v2958_v44  ;;  %v3292_v44 = vld [vmem:[%s3125_s12 + $0x24] sm:$0xff]  }
  0x24   : > { %2510 = vmatprep.subr.bf16.mxu1 %v2961_v48  ;;  %2622 = vmatprep.subr.bf16.mxu0 %v2962_v52  ;;  %v3295_v48 = vld [vmem:[%s3125_s12 + $0x2c] sm:$0x1]  ;;  %v273_v50 = vunpack.c.l.bf16 %v3292_v44  ;;  %v274_v51 = vunpack.c.h.bf16 %v3292_v44 }
  0x25   : > { %v275_v52 = vunpack.c.l.bf16 %v3295_v48 }
  0x26   : > { %1296 = vmatmul.mubr.bf16.vlgmr.msra.gmra.mrb[0].mxu0 %v3134_v11  ;;  %1392 = vmatmul.mubr.bf16.vlgmr.msra.gmra.mrb[0].mxu1 %v3140_v13  ;;  %v398_v61 = vrot.slane %v273_v50, 1 }
  0x27   : > { %2511 = vmatpush3.bf16.msra.mxu1 %v2963_v56  ;;  %2623 = vmatpush3.bf16.msra.mxu0 %v2964_v59  ;;  %v3311_v56 = vpack.c.bf16 %v457_v35, %v455_v34  ;;  %v4379_v59 = vunpack.c.l.bf16 %v3306_v54  ;;  %v2978_v34 = vld [vmem:[%s4375_s1 + $0xa0] sm:$0xff]  }
  0x28   : > { %2512 = vmatprep.subr.bf16.mxu1 %v2965_v62  ;;  %1303 = vmatprep.mubr.bf16.mxu0 %v3234_v63  ;;  %v399_v62 = vrot.slane %v274_v51, 1 }
  0x29   : > { %1399 = vmatprep.mubr.bf16.mxu1 %v3245_v3  ;;  %2624 = vmatprep.subr.bf16.mxu0 %v2972_v0  ;;  %v401_v0 = vrot.slane %v275_v52, 1  ;;  %v461_v26 = vrot.slane %v4379_v59, 1 }
  0x2b   : > { %2513 = vmatpush3.bf16.msra.mxu1 %v2966_v9  ;;  %2625 = vmatpush3.bf16.msra.mxu0 %v2974_v23  ;;  %v2984_v9 = vld [vmem:[%s4375_s1 + $0x150] sm:$0xff]   ;;  %v2977_v23 = vld [vmem:[%s4375_s1 + $0xe0] sm:$0xff]   ;;  %v402_v28 = vsel %vm382_vm0, %v399_v62, %v401_v0  ;;  %v462_v31 = vsel %vm382_vm0, %v459_v25, %v461_v26  ;;  %v2979_v0 = vld [vmem:[%s4375_s1 + $0xe8] sm:$0xff]  }
  0x2c   : > { %2514 = vmatprep.subr.bf16.mxu1 %v2969_v27  ;;  %v400_v27 = vsel %vm382_vm0, %v398_v61, %v399_v62  ;;  %2626 = vmatprep.subr.bf16.mxu0 %v2984_v9  ;;  %v277_v61 = vunpack.c.h.bf16 %v3349_v32  ;;  %v2980_v9 = vld [vmem:[%s4375_s1 + $0xa8] sm:$0xff]   ;;  %v2992_v26 = vld [vmem:[%s4375_s1 + $0x158] sm:$0xff]  }
  0x2d   : > { %v3357_v35 = vpack.c.bf16 %v402_v28, %v400_v27  ;;  %v512_v27 = vrot.slane %v264_v14, 2  ;;  %v2983_v14 = vld [vmem:[%s4375_s1 + $0xf0] sm:$0xff]  }
  0x2e   : > { %1304 = vmatmul.mubr.bf16.gmra.mrb[4].mxu0 %v3182_v37  ;;  %1400 = vmatmul.mubr.bf16.gmra.mrb[4].mxu1 %v3191_v42  ;;  %v404_v25 = vrot.slane %v277_v61, 1 }
  0x2f   : > { %2515 = vmatpush3.bf16.msra.mxu1 %v2970_v33  ;;  %1311 = vmatprep.mubr.bf16.mxu0 %v3297_v49  ;;  %v3352_v33 = vld [vmem:[%s3125_s12 + $0x38] sm:$0x1] }
  0x30   : > { %2516 = vmatprep.subr.bf16.mxu1 %v2971_v55  ;;  %1407 = vmatprep.mubr.bf16.mxu1 %v3311_v56  ;;  %v276_v55 = vunpack.c.l.bf16 %v3349_v32  ;;  %v278_v62 = vunpack.c.l.bf16 %v3352_v33 }
  0x31   : > { %2627 = vmatpush3.bf16.msra.mxu0 %v2986_v29  ;;  %v2993_v29 = vld [vmem:[%s4375_s1 + $0x118] sm:$0xff]  }
  0x32   : > { %v403_v24 = vrot.slane %v276_v55, 1  ;;  %2628 = vmatprep.subr.bf16.mxu0 %v2992_v26 }
  0x33   : > { %2517 = vmatpush3.bf16.msra.mxu1 %v2973_v60  ;;  %v3365_v60 = vpack.c.bf16 %v462_v31, %v460_v30  ;;  %v3389_v30 = vld [vmem:[%s3125_s12 + $0x3c] sm:$0xff]   ;;  %v3392_v31 = vld [vmem:[%s3125_s12 + $0x44] sm:$0x1] }
  0x34   : > { %2518 = vmatprep.subr.bf16.mxu1 %v2977_v23  ;;  %v406_v23 = vrot.slane %v278_v62, 1  ;;  %v405_v28 = vsel %vm382_vm0, %v403_v24, %v404_v25  ;;  %v4386_v24 = vunpack.c.l.bf16 %v3389_v30  ;;  %v4385_v59 = vunpack.c.h.bf16 %v3389_v30 }
  0x35   : > { %v4384_v58 = vunpack.c.l.bf16 %v3392_v31  ;;  %2629 = vmatpush3.bf16.msra.mxu0 %v2993_v29  ;;  %v2998_v29 = vld [vmem:[%s4375_s1 + $0x120] sm:$0xff]  }
  0x36   : > { %1312 = vmatmul.mubr.bf16.gmra.mrb[8].mxu0 %v3240_v1  ;;  %1408 = vmatmul.mubr.bf16.gmra.mrb[8].mxu1 %v3251_v7  ;;  %v408_v15 = vrot.slane %v4386_v24, 1  ;;  %v409_v26 = vrot.slane %v4385_v59, 1  ;;  %v4389_v59 = vunpack.c.l.bf16 %v3416_v21 }
  0x37   : > { %2519 = vmatpush3.bf16.msra.mxu1 %v2978_v34  ;;  %1319 = vmatprep.mubr.bf16.mxu0 %v3357_v35  ;;  %v407_v34 = vsel %vm382_vm0, %v404_v25, %v406_v23  ;;  %v515_v25 = vrot.slane %v266_v16, 2  ;;  %v2987_v23 = vld [vmem:[%s4375_s1 + $0xf8] sm:$0xff]   ;;  %v411_v12 = vrot.slane %v4384_v58, 1  ;;  %v3427_v16 = vld [vmem:[%s3125_s12 + $0x48] sm:$0xff]  }
  0x38   : > { %2520 = vmatprep.subr.bf16.mxu1 %v2979_v0  ;;  %1415 = vmatprep.mubr.bf16.mxu1 %v3365_v60  ;;  %v2985_v0 = vld [vmem:[%s4375_s1 + $0xb0] sm:$0xff]   ;;  %v3418_v11 = vpack.c.bf16 %v407_v34, %v405_v28  ;;  %v3001_v28 = vld [vmem:[%s4375_s1 + $0x168] sm:$0xff]   ;;  %v282_v34 = vunpack.c.l.bf16 %v3427_v16  ;;  %v4393_v58 = vunpack.c.h.bf16 %v3427_v16 }
  0x39   : > { %2630 = vmatprep.subr.bf16.mxu0 %v2996_v22  ;;  %v2988_v22 = vld [vmem:[%s4375_s1 + $0xb8] sm:$0xff]   ;;  %v412_v24 = vsel %vm382_vm0, %v409_v26, %v411_v12 }
  0x3a   : > { %2631 = vmatpush3.bf16.msra.mxu0 %v2998_v29  ;;  %v414_v12 = vrot.slane %v4393_v58, 1  ;;  %v3566_v58 = vld [vmem:[%s3125_s12 + $0x6c] sm:$0xff]  }
  0x3b   : > { %2521 = vmatpush3.bf16.msra.mxu1 %v2980_v9  ;;  %v514_v9 = vsel %vm511_vm1, %v512_v27, %v513_v57  ;;  %v2990_v27 = vld [vmem:[%s4375_s1 + $0x1c0] sm:$0xff]   ;;  %2632 = vmatprep.subr.bf16.mxu0 %v3001_v28  ;;  %v2999_v28 = vld [vmem:[%s4375_s1 + $0x188] sm:$0xff]  }
  0x3c   : > { %2522 = vmatprep.subr.bf16.mxu1 %v2983_v14  ;;  %v516_v14 = vsel %vm511_vm1, %v513_v57, %v515_v25  ;;  %v517_v57 = vrot.slane %v267_v39, 2  ;;  %v3002_v25 = vld [vmem:[%s4375_s1 + $0x128] sm:$0xff]  }
  0x3e   : > { %1320 = vmatmul.mubr.bf16.gmra.mrb[12].mxu0 %v3292_v44  ;;  %1416 = vmatmul.mubr.bf16.gmra.mrb[12].mxu1 %v3303_v53  ;;  %v519_v29 = vsel %vm511_vm1, %v517_v57, %v518_v10  ;;  %v4390_v57 = vunpack.c.l.bf16 %v3479_v41 }
  0x3f   : > { %2523 = vmatpush3.bf16.msra.mxu1 %v2985_v0  ;;  %1327 = vmatprep.mubr.bf16.mxu0 %v3418_v11  ;;  %v410_v0 = vsel %vm382_vm0, %v408_v15, %v409_v26  ;;  %v2991_v15 = vld [vmem:[%s4375_s1 + $0x180] sm:$0xff]   ;;  %v413_v26 = vrot.slane %v282_v34, 1 }
  0x40   : > { %2524 = vmatprep.subr.bf16.mxu1 %v2987_v23  ;;  %1456 = vmatprep.mubr.bf16.mxu1 %v3182_v37  ;;  %v624_v23 = vpack.c.bf16 %v516_v14, %v514_v9  ;;  %v3464_v39 = vpack.c.bf16 %v412_v24, %v410_v0  ;;  %v416_v37 = vrot.slane %v4389_v59, 1  ;;  %v3007_v24 = vld [vmem:[%s4375_s1 + $0x170] sm:$0xff]   ;;  %v521_v9 = vsel %vm511_vm1, %v518_v10, %v520_v47  ;;  %v3497_v0 = vld [vmem:[%s3125_s12 + $0x60] sm:$0xff]  }
  0x41   : > { %2633 = vmatpush3.bf16.msra.mxu0 %v3002_v25  ;;  %v4392_v14 = vunpack.c.l.bf16 %v3476_v40  ;;  %v415_v47 = vsel %vm382_vm0, %v413_v26, %v414_v12  ;;  %v3004_v25 = vld [vmem:[%s4375_s1 + $0x1d0] sm:$0xff]   ;;  %v522_v59 = vrot.slane %v270_v4, 2  ;;  %v523_v26 = vrot.slane %v271_v5, 2 }
  0x42   : > { %v417_v10 = vsel %vm382_vm0, %v414_v12, %v416_v37  ;;  %2634 = vmatprep.subr.bf16.mxu0 %v3007_v24  ;;  %v525_v12 = vrot.slane %v272_v6, 2  ;;  %v3012_v37 = vld [vmem:[%s4375_s1 + $0x178] sm:$0xff]   ;;  %v421_v5 = vrot.slane %v4390_v57, 1  ;;  %v289_v6 = vunpack.c.h.bf16 %v3497_v0 }
  0x43   : > { %2525 = vmatpush3.bf16.msra.mxu1 %v2988_v22  ;;  %v3008_v22 = vld [vmem:[%s4375_s1 + $0x130] sm:$0xff]   ;;  %v418_v24 = vrot.slane %v4392_v14, 1  ;;  %v524_v57 = vsel %vm511_vm1, %v522_v59, %v523_v26  ;;  %v3011_v59 = vld [vmem:[%s4375_s1 + $0x198] sm:$0xff]  }
  0x44   : > { %2734 = vmatprep.subr.bf16.mxu1 %v2990_v27  ;;  %v4391_v27 = vunpack.c.h.bf16 %v3476_v40 }
  0x45   : > { %2635 = vmatpush3.bf16.msra.mxu0 %v3008_v22  ;;  %v3010_v22 = vld [vmem:[%s4375_s1 + $0x1d8] sm:$0xff]  }
  0x46   : > { %1328 = vmatmul.mubr.bf16.gmra.mrb[16].mxu0 %v3349_v32  ;;  %1457 = vmatmul.mubr.bf16.vlgmr.msra.gmra.mrb[16].mxu1 %v624_v23  ;;  %v3506_v23 = vpack.c.bf16 %v521_v9, %v519_v29  ;;  %v419_v4 = vrot.slane %v4391_v27, 1  ;;  %v288_v29 = vunpack.c.l.bf16 %v3497_v0  ;;  %v526_v27 = vsel %vm511_vm1, %v523_v26, %v525_v12  ;;  %v3015_v26 = vld [vmem:[%s4375_s1 + $0x1e0] sm:$0xff]  }
  0x47   : > { %2735 = vmatpush3.bf16.msra.mxu1 %v2991_v15  ;;  %1335 = vmatprep.mubr.bf16.mxu0 %v3464_v39  ;;  %v3509_v15 = vld [vmem:[%s3125_s12 + $0x68] sm:$0x1]  ;;  %v3575_v12 = vpack.c.bf16 %v526_v27, %v524_v57  ;;  %v533_v27 = vrot.slane %v277_v61, 2  ;;  %v3590_v57 = vld [vmem:[%s3125_s12 + $0x74] sm:$0x1]  ;;  %v535_v61 = vrot.slane %v278_v62, 2 }
  0x48   : > { %1464 = vmatprep.mubr.bf16.mxu1 %v3240_v1  ;;  %2736 = vmatprep.subr.bf16.mxu1 %v2997_v38  ;;  %v3520_v38 = vpack.c.bf16 %v417_v10, %v415_v47  ;;  %v4394_v9 = vunpack.c.l.bf16 %v3509_v15  ;;  %v527_v47 = vrot.slane %v273_v50, 2  ;;  %v528_v10 = vrot.slane %v274_v51, 2 }
  0x49   : > { %2636 = vmatprep.subr.bf16.mxu0 %v3012_v37  ;;  %v3551_v37 = vld [vmem:[%s4375_s1 + $0x200] sm:$0xff]   ;;  %v423_v50 = vrot.slane %v288_v29, 1  ;;  %v420_v51 = vsel %vm382_vm0, %v418_v24, %v419_v4  ;;  %v422_v48 = vsel %vm382_vm0, %v419_v4, %v421_v5  ;;  %v532_v5 = vrot.slane %v276_v55, 2 }
  0x4a   : > { %v426_v14 = vrot.slane %v4394_v9, 1  ;;  %v529_v24 = vsel %vm511_vm1, %v527_v47, %v528_v10  ;;  %v291_v47 = vunpack.c.l.bf16 %v3566_v58  ;;  %v578_v62 = vrot.slane %v304_v46, 2 }
  0x4b   : > { %2737 = vmatpush3.bf16.msra.mxu1 %v2999_v28  ;;  %v3013_v28 = vld [vmem:[%s4375_s1 + $0x138] sm:$0xff]  }
  0x4c   : > { %2738 = vmatprep.subr.bf16.mxu1 %v3004_v25  ;;  %v530_v25 = vrot.slane %v275_v52, 2  ;;  %v424_v52 = vrot.slane %v289_v6, 1  ;;  %2637 = vmatpush3.bf16.msra.mxu0 %v3013_v28  ;;  %v572_v28 = vrot.slane %v300_v18, 2  ;;  %v3018_v18 = vld [vmem:[%s4375_s1 + $0x1e8] sm:$0xff]   ;;  %v428_v33 = vrot.slane %v291_v47, 1 }
  0x4d   : > { %2870 = vmatprep.subr.bf16.mxu0 %v3551_v37 }
  0x4e   : > { %1336 = vmatmul.mubr.bf16.gmra.mrb[20].mxu0 %v3389_v30  ;;  %1465 = vmatmul.mubr.bf16.gmra.mrb[20].mxu1 %v3506_v23  ;;  %v531_v4 = vsel %vm511_vm1, %v528_v10, %v530_v25  ;;  %v427_v9 = vsel %vm382_vm0, %v424_v52, %v426_v14  ;;  %v3017_v10 = vld [vmem:[%s4375_s1 + $0x1a0] sm:$0xff]   ;;  %v573_v14 = vrot.slane %v301_v19, 2  ;;  %v4402_v25 = vunpack.c.h.bf16 %v3566_v58 }
  0x4f   : > { %1343 = vmatprep.mubr.bf16.mxu0 %v3520_v38  ;;  %1472 = vmatprep.mubr.bf16.mxu1 %v3292_v44  ;;  %v3596_v55 = vpack.c.bf16 %v531_v4, %v529_v24  ;;  %v4395_v19 = vunpack.c.l.bf16 %v3590_v57  ;;  %v4404_v24 = vunpack.c.l.bf16 %v3251_v7 }
  0x50   : > { %2739 = vmatpush3.bf16.msra.mxu1 %v3005_v2  ;;  %v3579_v2 = vpack.c.bf16 %v422_v48, %v420_v51  ;;  %v574_v48 = vsel %vm511_vm1, %v572_v28, %v573_v14  ;;  %v4405_v28 = vunpack.c.h.bf16 %v3251_v7 }
  0x51   : > { %2740 = vmatprep.subr.bf16.mxu1 %v3010_v22  ;;  %v425_v22 = vsel %vm382_vm0, %v423_v50, %v424_v52  ;;  %v575_v50 = vrot.slane %v302_v20, 2  ;;  %v577_v52 = vrot.slane %v303_v45, 2  ;;  %v3021_v45 = vld [vmem:[%s4375_s1 + $0x1f0] sm:$0xff]   ;;  %v582_v4 = vrot.slane %v4404_v24, 2 }
  0x52   : > { %v3612_v51 = vpack.c.bf16 %v427_v9, %v425_v22  ;;  %v4403_v9 = vunpack.c.l.bf16 %v3194_v43  ;;  %v583_v22 = vrot.slane %v4405_v28, 2  ;;  %v429_v43 = vrot.slane %v4402_v25, 1 }
  0x53   : > { %v576_v20 = vsel %vm511_vm1, %v573_v14, %v575_v50  ;;  %v4407_v50 = vunpack.c.l.bf16 %v3303_v53 }
  0x54   : > { %2741 = vmatpush3.bf16.msra.mxu1 %v3011_v59  ;;  %v580_v59 = vrot.slane %v4403_v9, 2  ;;  %v3648_v9 = vld [vmem:[%s3125_s12 + $0x78] sm:$0xff]  }
  0x55   : > { %2742 = vmatprep.subr.bf16.mxu1 %v3015_v26  ;;  %v3628_v26 = vpack.c.bf16 %v576_v20, %v574_v48  ;;  %v587_v48 = vrot.slane %v4407_v50, 2  ;;  %v431_v20 = vrot.slane %v4395_v19, 1  ;;  %v3662_v50 = vld [vmem:[%s3125_s12 + $0x80] sm:$0x1] }
  0x56   : > { %1344 = vmatmul.mubr.bf16.gmra.mrb[24].mxu0 %v3427_v16  ;;  %1473 = vmatmul.mubr.bf16.gmra.mrb[24].mxu1 %v3575_v12  ;;  %v581_v14 = vsel %vm511_vm1, %v578_v62, %v580_v59  ;;  %v4408_v59 = vunpack.c.h.bf16 %v3303_v53 }
  0x57   : > { %1351 = vmatprep.mubr.bf16.mxu0 %v3579_v2  ;;  %1480 = vmatprep.mubr.bf16.mxu1 %v3349_v32 }
  0x58   : > { %2743 = vmatpush3.bf16.msra.mxu1 %v3017_v10  ;;  %v4406_v10 = vunpack.c.l.bf16 %v3254_v8  ;;  %v584_v8 = vsel %vm511_vm1, %v582_v4, %v583_v22  ;;  %v4409_v4 = vunpack.c.l.bf16 %v3306_v54 }
  0x59   : > { %2744 = vmatprep.subr.bf16.mxu1 %v3018_v18  ;;  %v579_v18 = vsel %vm511_vm1, %v577_v52, %v578_v62  ;;  %v3023_v52 = vld [vmem:[%s4375_s1 + $0x1b0] sm:$0xff]  }
  0x5a   : > { %v585_v46 = vrot.slane %v4406_v10, 2  ;;  %v3650_v24 = vpack.c.bf16 %v581_v14, %v579_v18  ;;  %v588_v10 = vrot.slane %v4408_v59, 2  ;;  %v3024_v18 = vld [vmem:[%s4375_s1 + $0x1f8] sm:$0xff]   ;;  %v4401_v14 = vunpack.c.l.bf16 %v3648_v9 }
  0x5b   : > { %v432_v59 = vsel %vm382_vm0, %v429_v43, %v431_v20  ;;  %v4412_v20 = vunpack.c.l.bf16 %v3392_v31 }
  0x5c   : > { %v586_v28 = vsel %vm511_vm1, %v583_v22, %v585_v46  ;;  %2745 = vmatpush3.bf16.msra.mxu1 %v3020_v17  ;;  %v590_v22 = vrot.slane %v4409_v4, 2  ;;  %v534_v17 = vsel %vm511_vm1, %v532_v5, %v533_v27  ;;  %v589_v46 = vsel %vm511_vm1, %v587_v48, %v588_v10  ;;  %v3026_v48 = vld [vmem:[%s4375_s1 + $0x1b8] sm:$0xff]  }
  0x5d   : > { %v3657_v62 = vpack.c.bf16 %v586_v28, %v584_v8  ;;  %2746 = vmatprep.subr.bf16.mxu1 %v3021_v45  ;;  %v536_v45 = vsel %vm511_vm1, %v533_v27, %v535_v61  ;;  %v4397_v8 = vunpack.c.h.bf16 %v3648_v9  ;;  %v430_v28 = vsel %vm382_vm0, %v428_v33, %v429_v43 }
  0x5e   : > { %1352 = vmatmul.mubr.bf16.gmra.mrb[28].mxu0 %v3476_v40  ;;  %1481 = vmatmul.mubr.bf16.gmra.mrb[28].mxu1 %v3596_v55  ;;  %v591_v54 = vsel %vm511_vm1, %v588_v10, %v590_v22  ;;  %v4396_v5 = vunpack.c.l.bf16 %v3662_v50  ;;  %v3687_v61 = vpack.c.bf16 %v536_v45, %v534_v17  ;;  %v4410_v10 = vunpack.c.l.bf16 %v3389_v30  ;;  %v3704_v17 = vld [vmem:[%s3125_s12 + $0x84] sm:$0xff]   ;;  %v3707_v45 = vld [vmem:[%s3125_s12 + $0x8c] sm:$0x1] }
  0x5f   : > { %1359 = vmatprep.mubr.bf16.mxu0 %v3612_v51  ;;  %1488 = vmatprep.mubr.bf16.mxu1 %v3389_v30  ;;  %v3685_v27 = vpack.c.bf16 %v591_v54, %v589_v46  ;;  %v4411_v33 = vunpack.c.h.bf16 %v3389_v30  ;;  %v3693_v43 = vpack.c.bf16 %v432_v59, %v430_v28  ;;  %v433_v19 = vrot.slane %v4401_v14, 1 }
  0x60   : > { %2747 = vmatpush3.bf16.msra.mxu1 %v3023_v52  ;;  %v537_v4 = vrot.slane %v4410_v10, 2  ;;  %v540_v52 = vrot.slane %v4412_v20, 2  ;;  %v434_v46 = vrot.slane %v4397_v8, 1  ;;  %v4399_v10 = vunpack.c.h.bf16 %v3704_v17 }
  0x61   : > { %2748 = vmatprep.subr.bf16.mxu1 %v3024_v18  ;;  %v538_v22 = vrot.slane %v4411_v33, 2  ;;  %v436_v18 = vrot.slane %v4396_v5, 1  ;;  %v4398_v33 = vunpack.c.l.bf16 %v3707_v45  ;;  %v542_v8 = vrot.slane %v282_v34, 2 }
  0x62   : > { %v435_v28 = vsel %vm382_vm0, %v433_v19, %v434_v46  ;;  %v4414_v19 = vunpack.c.l.bf16 %v3416_v21  ;;  %v4417_v14 = vunpack.c.l.bf16 %v3479_v41  ;;  %v553_v41 = vrot.slane %v289_v6, 2 }
  0x63   : > { %v539_v31 = vsel %vm511_vm1, %v537_v4, %v538_v22  ;;  %v541_v54 = vsel %vm511_vm1, %v538_v22, %v540_v52  ;;  %v437_v59 = vsel %vm382_vm0, %v434_v46, %v436_v18  ;;  %v4413_v4 = vunpack.c.h.bf16 %v3427_v16 }
  0x64   : > { %2749 = vmatpush3.bf16.msra.mxu1 %v3026_v48  ;;  %v4400_v48 = vunpack.c.l.bf16 %v3704_v17  ;;  %v3720_v20 = vpack.c.bf16 %v541_v54, %v539_v31  ;;  %v3722_v5 = vpack.c.bf16 %v437_v59, %v435_v28  ;;  %v545_v52 = vrot.slane %v4414_v19, 2 }
  0x65   : > { %v543_v22 = vrot.slane %v4413_v4, 2  ;;  %v439_v18 = vrot.slane %v4399_v10, 1  ;;  %v441_v31 = vrot.slane %v4398_v33, 1  ;;  %v4415_v19 = vunpack.c.l.bf16 %v3476_v40 }
  0x66   : > { %1360 = vmatmul.mubr.bf16.gmra.mrb[32].mxu0 %v3497_v0  ;;  %1489 = vmatmul.mubr.bf16.gmra.mrb[32].mxu1 %v3687_v61  ;;  %v438_v46 = vrot.slane %v4400_v48, 1  ;;  %v4416_v10 = vunpack.c.h.bf16 %v3476_v40  ;;  %v550_v25 = vrot.slane %v4417_v14, 2  ;;  %v4418_v14 = vunpack.c.l.bf16 %v3509_v15 }
  0x67   : > { %1367 = vmatprep.mubr.bf16.mxu0 %v3693_v43  ;;  %1496 = vmatprep.mubr.bf16.mxu1 %v3427_v16  ;;  %v544_v21 = vsel %vm511_vm1, %v542_v8, %v543_v22  ;;  %v546_v34 = vsel %vm511_vm1, %v543_v22, %v545_v52  ;;  %v442_v28 = vsel %vm382_vm0, %v439_v18, %v441_v31  ;;  %v547_v33 = vrot.slane %v4415_v19, 2 }
  0x68   : > { %v440_v54 = vsel %vm382_vm0, %v438_v46, %v439_v18  ;;  %v3744_v59 = vpack.c.bf16 %v546_v34, %v544_v21  ;;  %v548_v48 = vrot.slane %v4416_v10, 2  ;;  %v552_v10 = vrot.slane %v288_v29, 2  ;;  %v3019_v21 = vld [vmem:[%s4375_s1 + $0x208] sm:$0xff]  }
  0x69   : > { %v3746_v4 = vpack.c.bf16 %v442_v28, %v440_v54  ;;  %v555_v46 = vrot.slane %v4418_v14, 2  ;;  %v557_v29 = vrot.slane %v291_v47, 2  ;;  %v4419_v15 = vunpack.c.h.bf16 %v3566_v58 }
  0x6a   : > { %v549_v8 = vsel %vm511_vm1, %v547_v33, %v548_v48  ;;  %v551_v22 = vsel %vm511_vm1, %v548_v48, %v550_v25  ;;  %v554_v25 = vsel %vm511_vm1, %v552_v10, %v553_v41  ;;  %v4420_v18 = vunpack.c.l.bf16 %v3590_v57  ;;  %v3022_v57 = vld [vmem:[%s4375_s1 + $0x210] sm:$0xff]  }
  0x6b   : > { %v3760_v52 = vpack.c.bf16 %v551_v22, %v549_v8  ;;  %v556_v48 = vsel %vm511_vm1, %v553_v41, %v555_v46  ;;  %v558_v6 = vrot.slane %v4419_v15, 2  ;;  %v4421_v54 = vunpack.c.l.bf16 %v3648_v9  ;;  %v3025_v22 = vld [vmem:[%s4375_s1 + $0x218] sm:$0xff]  }
  0x6c   : > { %v3774_v33 = vpack.c.bf16 %v556_v48, %v554_v25  ;;  %v560_v31 = vrot.slane %v4420_v18, 2  ;;  %v4423_v19 = vunpack.c.l.bf16 %v3662_v50  ;;  %v3028_v50 = vld [vmem:[%s4375_s1 + $0x220] sm:$0xff]   ;;  %v4424_v46 = vunpack.c.l.bf16 %v3704_v17  ;;  %v3029_v18 = vld [vmem:[%s4375_s1 + $0x228] sm:$0xff]  }
  0x6d   : > { %v4425_v48 = vunpack.c.h.bf16 %v3704_v17  ;;  %v4426_v15 = vunpack.c.l.bf16 %v3707_v45  ;;  %v3030_v45 = vld [vmem:[%s4375_s1 + $0x230] sm:$0xff]  }
  0x6e   : > { %1368 = vmatmul.mubr.bf16.gmra.mrb[36].mxu0 %v3566_v58  ;;  %1497 = vmatmul.mubr.bf16.gmra.mrb[36].mxu1 %v3720_v20  ;;  %v561_v47 = vsel %vm511_vm1, %v558_v6, %v560_v31  ;;  %v565_v8 = vrot.slane %v4423_v19, 2  ;;  %v567_v25 = vrot.slane %v4424_v46, 2 }
  0x6f   : > { %1375 = vmatprep.mubr.bf16.mxu0 %v3722_v5  ;;  %1504 = vmatprep.mubr.bf16.mxu1 %v3476_v40 }
  0x76   : > { %1376 = vmatmul.mubr.bf16.gmra.mrb[40].mxu0 %v3648_v9  ;;  %1505 = vmatmul.mubr.bf16.gmra.mrb[40].mxu1 %v3744_v59 }
  0x77   : > { %1383 = vmatprep.mubr.bf16.mxu0 %v3746_v4  ;;  %1512 = vmatprep.mubr.bf16.mxu1 %v3497_v0 }
  0x7e   : > { %1384 = vmatmul.mubr.bf16.gmra.mrb[44].mxu0 %v3704_v17  ;;  %1513 = vmatmul.mubr.bf16.gmra.mrb[44].mxu1 %v3760_v52 }
  0x7f   : > { %1520 = vmatprep.mubr.bf16.mxu1 %v3566_v58  ;;  %1617 = vmatprep.mubr.bf16.mxu0 %v3506_v23  ;;  %v559_v23 = vsel %vm511_vm1, %v557_v29, %v558_v6  ;;  %v568_v29 = vrot.slane %v4425_v48, 2  ;;  %v570_v6 = vrot.slane %v4426_v15, 2 }
  0x80   : > { %v3795_v34 = vpack.c.bf16 %v561_v47, %v559_v23  ;;  %v3031_v47 = vld [vmem:[%s4375_s1 + $0x238] sm:$0xff]  }
  0x81   : > { %v569_v31 = vsel %vm511_vm1, %v567_v25, %v568_v29 }
  0x86   : > { %1521 = vmatmul.mubr.bf16.gmra.mrb[48].mxu1 %v3774_v33  ;;  %1618 = vmatmul.mubr.bf16.vlgmr.msra.gmra.mrb[48].mxu0 %v3234_v63  ;;  %v562_v63 = vrot.slane %v4421_v54, 2 }
  0x87   : > { %2871 = vmatpush3.bf16.msra.mxu0 %v3551_v37  ;;  %1528 = vmatprep.mubr.bf16.mxu1 %v3648_v9  ;;  %v4422_v37 = vunpack.c.h.bf16 %v3648_v9 }
  0x88   : > { %1625 = vmatprep.mubr.bf16.mxu0 %v3575_v12  ;;  %2872 = vmatprep.subr.bf16.mxu0 %v3019_v21 }
  0x89   : > { %v563_v28 = vrot.slane %v4422_v37, 2 }
  0x8b   : > { %2873 = vmatpush3.bf16.msra.mxu0 %v3019_v21  ;;  %v564_v10 = vsel %vm511_vm1, %v562_v63, %v563_v28  ;;  %v566_v41 = vsel %vm511_vm1, %v563_v28, %v565_v8  ;;  %v571_v21 = vsel %vm511_vm1, %v568_v29, %v570_v6 }
  0x8c   : > { %2874 = vmatprep.subr.bf16.mxu0 %v3022_v57  ;;  %v3815_v14 = vpack.c.bf16 %v566_v41, %v564_v10  ;;  %v3835_v23 = vpack.c.bf16 %v571_v21, %v569_v31 }
  0x8e   : > { %1529 = vmatmul.mubr.bf16.gmra.mrb[52].mxu1 %v3795_v34  ;;  %1626 = vmatmul.mubr.bf16.gmra.mrb[52].mxu0 %v3297_v49 }
  0x8f   : > { %1536 = vmatprep.mubr.bf16.mxu1 %v3704_v17  ;;  %1633 = vmatprep.mubr.bf16.mxu0 %v3596_v55 }
  0x90   : > { %2875 = vmatpush3.bf16.msra.mxu0 %v3022_v57  ;;  %v3853_v57 = vld [vmem:[%s3125_s12 + $0xc0] sm:$0xff]  }
  0x91   : > { %2876 = vmatprep.subr.bf16.mxu0 %v3025_v22 }
  0x94   : > { %2877 = vmatpush3.bf16.msra.mxu0 %v3025_v22 }
  0x95   : > { %2878 = vmatprep.subr.bf16.mxu0 %v3028_v50 }
  0x96   : > { %1537 = vmatmul.mubr.bf16.gmra.mrb[56].mxu1 %v3815_v14  ;;  %1634 = vmatmul.mubr.bf16.gmra.mrb[56].mxu0 %v3357_v35 }
  0x97   : > { %1544 = vmatprep.mubr.bf16.mxu1 %v3140_v13  ;;  %1641 = vmatprep.mubr.bf16.mxu0 %v3687_v61 }
  0x98   : > { %2879 = vmatpush3.bf16.msra.mxu0 %v3028_v50 }
  0x99   : > { %2880 = vmatprep.subr.bf16.mxu0 %v3029_v18 }
  0x9c   : > { %2881 = vmatpush3.bf16.msra.mxu0 %v3029_v18 }
  0x9d   : > { %2882 = vmatprep.subr.bf16.mxu0 %v3030_v45 }
  0x9e   : > { %1545 = vmatmul.mubr.bf16.gmra.mrb[60].mxu1 %v3835_v23  ;;  %1642 = vmatmul.mubr.bf16.gmra.mrb[60].mxu0 %v3418_v11 }
  0x9f   : > { %1552 = vmatprep.mubr.bf16.mxu1 %v3191_v42  ;;  %1649 = vmatprep.mubr.bf16.mxu0 %v3720_v20 }
  0xa0   : > { %2883 = vmatpush3.bf16.msra.mxu0 %v3030_v45 }
  0xa1   : > { %2884 = vmatprep.subr.bf16.mxu0 %v3031_v47 }
  0xa4   : > { %2885 = vmatpush3.bf16.msra.mxu0 %v3031_v47 }
  0xa6   : > { %1553 = vmatmul.mubr.bf16.gmra.mrb[64].mxu1 %v3628_v26  ;;  %1650 = vmatmul.mubr.bf16.gmra.mrb[64].mxu0 %v3464_v39 }
  0xa7   : > { %1560 = vmatprep.mubr.bf16.mxu1 %v3251_v7  ;;  %1657 = vmatprep.mubr.bf16.mxu0 %v3744_v59 }
  0xae   : > { %1561 = vmatmul.mubr.bf16.gmra.mrb[68].mxu1 %v3650_v24  ;;  %1658 = vmatmul.mubr.bf16.gmra.mrb[68].mxu0 %v3520_v38 }
  0xaf   : > { %1568 = vmatprep.mubr.bf16.mxu1 %v3303_v53  ;;  %1665 = vmatprep.mubr.bf16.mxu0 %v3760_v52 }
  0xb6   : > { %1569 = vmatmul.mubr.bf16.gmra.mrb[72].mxu1 %v3657_v62  ;;  %1666 = vmatmul.mubr.bf16.gmra.mrb[72].mxu0 %v3579_v2 }
  0xb7   : > { %1576 = vmatprep.mubr.bf16.mxu1 %v3853_v57  ;;  %1673 = vmatprep.mubr.bf16.mxu0 %v3774_v33 }
  0xbe   : > { %1577 = vmatmul.mubr.bf16.gmra.mrb[76].mxu1 %v3685_v27  ;;  %1674 = vmatmul.mubr.bf16.gmra.mrb[76].mxu0 %v3612_v51 }
  0xbf   : > { %1681 = vmatprep.mubr.bf16.mxu0 %v3795_v34  ;;  %1778 = vmatprep.mubr.bf16.mxu1 %v3297_v49  ;;  %v313_v49 = vunpack.c.h.bf16 %v3853_v57 }
  0xc6   : > { %1682 = vmatmul.mubr.bf16.gmra.mrb[80].mxu0 %v3693_v43  ;;  %1779 = vmatmul.mubr.bf16.vlgmr.msra.gmra.mrb[80].mxu1 %v3240_v1  ;;  %v260_v1 = vld [vmem:[%s3125_s12 + $0xc8] sm:$0x1] }
  0xc7   : > { %1689 = vmatprep.mubr.bf16.mxu0 %v3815_v14  ;;  %1786 = vmatprep.mubr.bf16.mxu1 %v3357_v35 }
  0xce   : > { %1690 = vmatmul.mubr.bf16.gmra.mrb[84].mxu0 %v3722_v5  ;;  %1787 = vmatmul.mubr.bf16.gmra.mrb[84].mxu1 %v3292_v44  ;;  %v312_v44 = vunpack.c.l.bf16 %v3853_v57 }
  0xcf   : > { %1697 = vmatprep.mubr.bf16.mxu0 %v3835_v23  ;;  %1794 = vmatprep.mubr.bf16.mxu1 %v3418_v11 }
  0xd0   : > { %v652_v35 = vrot.slane %v312_v44, 2 }
  0xd6   : > { %1698 = vmatmul.mubr.bf16.gmra.mrb[88].mxu0 %v3746_v4  ;;  %1795 = vmatmul.mubr.bf16.gmra.mrb[88].mxu1 %v3349_v32  ;;  %v314_v32 = vunpack.c.l.bf16 %v260_v1 }
  0xd7   : > { %1705 = vmatprep.mubr.bf16.mxu0 %v3628_v26  ;;  %1802 = vmatprep.mubr.bf16.mxu1 %v3464_v39 }
  0xd8   : > { %v655_v11 = vrot.slane %v314_v32, 2  ;;  %v647_v63 = vrot.slane %v314_v32, 1 }
  0xde   : > { %1706 = vmatmul.mubr.bf16.gmra.mrb[92].mxu0 %v3179_v36  ;;  %1803 = vmatmul.mubr.bf16.gmra.mrb[92].mxu1 %v3389_v30  ;;  %v653_v30 = vrot.slane %v313_v49, 2 }
  0xdf   : > { %1713 = vmatprep.mubr.bf16.mxu0 %v3650_v24  ;;  %1810 = vmatprep.mubr.bf16.mxu1 %v3520_v38  ;;  %v644_v38 = vrot.slane %v312_v44, 1 }
  0xe0   : > { %v656_v39 = vsel %vm511_vm1, %v653_v30, %v655_v11 }
  0xe6   : > { %1714 = vmatmul.mubr.bf16.gmra.mrb[96].mxu0 %v3245_v3  ;;  %1811 = vmatmul.mubr.bf16.gmra.mrb[96].mxu1 %v3427_v16  ;;  %v654_v16 = vsel %vm511_vm1, %v652_v35, %v653_v30 }
  0xe7   : > { %1721 = vmatprep.mubr.bf16.mxu0 %v3657_v62  ;;  %1818 = vmatprep.mubr.bf16.mxu1 %v3579_v2  ;;  %v645_v2 = vrot.slane %v313_v49, 1  ;;  %v3892_v54 = vpack.c.bf16 %v656_v39, %v654_v16 }
  0xee   : > { %1722 = vmatmul.mubr.bf16.gmra.mrb[100].mxu0 %v3311_v56  ;;  %1819 = vmatmul.mubr.bf16.gmra.mrb[100].mxu1 %v3476_v40  ;;  %v646_v40 = vsel %vm382_vm0, %v644_v38, %v645_v2 }
  0xef   : > { %1729 = vmatprep.mubr.bf16.mxu0 %v3685_v27  ;;  %1826 = vmatprep.mubr.bf16.mxu1 %v3612_v51  ;;  %v648_v51 = vsel %vm382_vm0, %v645_v2, %v647_v63 }
  0xf0   : > { %v3900_v22 = vpack.c.bf16 %v648_v51, %v646_v40 }
  0xf6   : > { %1730 = vmatmul.mubr.bf16.gmra.mrb[104].mxu0 %v3365_v60  ;;  %1827 = vmatmul.mubr.bf16.gmra.mrb[104].mxu1 %v3497_v0 }
  0xf7   : > { %1737 = vmatprep.mubr.bf16.mxu0 %v3892_v54  ;;  %1834 = vmatprep.mubr.bf16.mxu1 %v3693_v43 }
  0xf9   : > { %v2414_v37 = vpop.f32.mrb[0].mxu0  ;;  %v2486_v28 = vpop.f32.mrb[0].mxu1 }
  0xfa   : > { %v2415_v19 = vpop.f32.mrb[1].mxu0  ;;  %v2487_v8 = vpop.f32.mrb[1].mxu1 }
  0xfb   : > { %v3902_v10 = vadd.f32 %v2415_v19, %v2414_v37  ;;  %v3904_v41 = vadd.f32 %v2487_v8, %v2486_v28  ;;  %v2417_v50 = vpop.f32.mrb[2].mxu0  ;;  %v2489_v0 = vpop.f32.mrb[2].mxu1 }
  0xfc   : > { %v2418_v46 = vpop.f32.mrb[3].mxu0  ;;  %v2490_v25 = vpop.f32.mrb[3].mxu1 }
  0xfd   : > { %v3906_v48 = vadd.f32 %v2418_v46, %v2417_v50  ;;  %v3908_v43 = vadd.f32 %v2490_v25, %v2489_v0 }
  0xfe   : > { %1738 = vmatmul.mubr.bf16.gmra.mrb[108].mxu0 %v3900_v22  ;;  %1835 = vmatmul.mubr.bf16.gmra.mrb[108].mxu1 %v3566_v58 }
  0xff   : > { %1842 = vmatprep.mubr.bf16.mxu1 %v3722_v5  ;;  %2886 = vmatprep.mubr.bf16.mxu0 %v3575_v12 }
 0x101   : > { %v2420_v29 = vpop.f32.mrb[4].mxu0  ;;  %v2492_v15 = vpop.f32.mrb[4].mxu1 }
 0x102   : > { %v2421_v6 = vpop.f32.mrb[5].mxu0  ;;  %v2493_v18 = vpop.f32.mrb[5].mxu1 }
 0x103   : > { %v3914_v31 = vadd.f32 %v2421_v6, %v2420_v29  ;;  %v3916_v21 = vadd.f32 %v2493_v18, %v2492_v15  ;;  %v2423_v45 = vpop.f32.mrb[6].mxu0  ;;  %v2495_v47 = vpop.f32.mrb[6].mxu1 }
 0x104   : > { %v2424_v1 = vpop.f32.mrb[7].mxu0  ;;  %v2496_v44 = vpop.f32.mrb[7].mxu1 }
 0x105   : > { %v3918_v49 = vadd.f32 %v2424_v1, %v2423_v45  ;;  %v3920_v32 = vadd.f32 %v2496_v44, %v2495_v47 }
 0x106   : > { %1843 = vmatmul.mubr.bf16.gmra.mrb[112].mxu1 %v3648_v9  ;;  %2887 = vmatmul.mubr.bf16.vlgmr.msra.gmra.mrb[112].mxu0 %v3596_v55 }
 0x107   : > { %1850 = vmatprep.mubr.bf16.mxu1 %v3746_v4  ;;  %2890 = vmatprep.mubr.bf16.mxu0 %v3687_v61 }
 0x109   : > { %v2426_v58 = vpop.f32.mrb[8].mxu0  ;;  %v2498_v12 = vpop.f32.mrb[8].mxu1 }
 0x10a   : > { %v2427_v5 = vpop.f32.mrb[9].mxu0  ;;  %v2499_v35 = vpop.f32.mrb[9].mxu1 }
 0x10b   : > { %v3926_v30 = vadd.f32 %v2427_v5, %v2426_v58  ;;  %v3928_v11 = vadd.f32 %v2499_v35, %v2498_v12  ;;  %v2429_v16 = vpop.f32.mrb[10].mxu0  ;;  %v2501_v39 = vpop.f32.mrb[10].mxu1 }
 0x10c   : > { %v2430_v38 = vpop.f32.mrb[11].mxu0  ;;  %v2502_v2 = vpop.f32.mrb[11].mxu1 }
 0x10d   : > { %v3930_v63 = vadd.f32 %v2430_v38, %v2429_v16  ;;  %v3932_v9 = vadd.f32 %v2502_v2, %v2501_v39 }
 0x10e   : > { %1851 = vmatmul.mubr.bf16.gmra.mrb[116].mxu1 %v3704_v17  ;;  %2891 = vmatmul.mubr.bf16.gmra.mrb[116].mxu0 %v3720_v20 }
 0x10f   : > { %1858 = vmatprep.mubr.bf16.mxu1 %v3179_v36  ;;  %2894 = vmatprep.mubr.bf16.mxu0 %v3744_v59  ;;  %v3953_v36 = vld [vmem:[%s4376_s2] ss:$0 sm:$0xff] }
 0x110   : > { %v1298_v29 = vadd.f32 %v3902_v10, %v3953_v36  ;;  %v1306_v5 = vadd.f32 %v3914_v31, %v3953_v36 }
 0x111   : > { %v2432_v55 = vpop.f32.mrb[12].mxu0  ;;  %v2504_v61 = vpop.f32.mrb[12].mxu1 }
 0x112   : > { %v2433_v4 = vpop.f32.mrb[13].mxu0  ;;  %v2505_v40 = vpop.f32.mrb[13].mxu1 }
 0x113   : > { %v3938_v51 = vadd.f32 %v2433_v4, %v2432_v55  ;;  %v3940_v37 = vadd.f32 %v2505_v40, %v2504_v61  ;;  %v2435_v28 = vpop.f32.mrb[14].mxu0  ;;  %v2507_v19 = vpop.f32.mrb[14].mxu1  ;;  %v3982_v61 = vld [vmem:[%s3125_s12 + $0xcc] sm:$0xff]   ;;  %v263_v4 = vld [vmem:[%s3125_s12 + $0xd4] sm:$0x1]  ;;  %s2397_s12 = sshll.u32 %s4428_s16, 8 }
 0x114   : > { %v2436_v8 = vpop.f32.mrb[15].mxu0  ;;  %v2508_v50 = vpop.f32.mrb[15].mxu1  ;;  %v316_v40 = vunpack.c.h.bf16 %v3982_v61  ;;  %s4283_s30 = scalar_lea.vmem %s4377_s3, %s2397_s12 }
 0x115   : > { %v3942_v0 = vadd.f32 %v2436_v8, %v2435_v28  ;;  %v3944_v17 = vadd.f32 %v2508_v50, %v2507_v19  ;;  %v317_v28 = vunpack.c.l.bf16 %v263_v4 }
 0x116   : > { %1859 = vmatmul.mubr.bf16.gmra.mrb[120].mxu1 %v3140_v13  ;;  %2895 = vmatmul.mubr.bf16.gmra.mrb[120].mxu0 %v3760_v52 }
 0x117   : > { %1866 = vmatprep.mubr.bf16.mxu1 %v3245_v3  ;;  %2898 = vmatprep.mubr.bf16.mxu0 %v3774_v33  ;;  %v1301_v33 = vadd.f32 %v3906_v48, %v3953_v36 }
 0x119   : > { %v2438_v20 = vpop.f32.mrb[16].mxu0  ;;  %v2526_v59 = vpop.f32.mrb[16].mxu1 }
 0x11a   : > { %v2439_v46 = vpop.f32.mrb[17].mxu0  ;;  %v2527_v25 = vpop.f32.mrb[17].mxu1 }
 0x11b   : > { %v3957_v15 = vadd.f32 %v2439_v46, %v2438_v20  ;;  %v2528_v13 = vadd.f32 %v2527_v25, %v2526_v59  ;;  %v2441_v52 = vpop.f32.mrb[18].mxu0  ;;  %v2529_v6 = vpop.f32.mrb[18].mxu1 }
 0x11c   : > { %v2442_v3 = vpop.f32.mrb[19].mxu0  ;;  %v2530_v18 = vpop.f32.mrb[19].mxu1 }
 0x11d   : > { %v3961_v45 = vadd.f32 %v2528_v13, %v1298_v29  ;;  %v3963_v47 = vadd.f32 %v2442_v3, %v2441_v52  ;;  %v2531_v1 = vadd.f32 %v2530_v18, %v2529_v6  ;;  %v665_v13 = vrot.slane %v316_v40, 1 }
 0x11e   : > { %1867 = vmatmul.mubr.bf16.gmra.mrb[124].mxu1 %v3191_v42  ;;  %2899 = vmatmul.mubr.bf16.gmra.mrb[124].mxu0 %v3795_v34  ;;  %v667_v52 = vrot.slane %v317_v28, 1  ;;  %v1317_v6 = vadd.f32 %v3930_v63, %v3953_v36 }
 0x11f   : > { %v3967_v10 = vadd.f32 %v2531_v1, %v1301_v33  ;;  %1874 = vmatprep.mubr.bf16.mxu1 %v3311_v56  ;;  %2902 = vmatprep.mubr.bf16.mxu0 %v3815_v14  ;;  %v1309_v56 = vadd.f32 %v3918_v49, %v3953_v36  ;;  %v315_v49 = vunpack.c.l.bf16 %v3982_v61 }
 0x121   : > { %v2444_v44 = vpop.f32.mrb[20].mxu0  ;;  %v2532_v58 = vpop.f32.mrb[20].mxu1 }
 0x122   : > { %v2445_v48 = vpop.f32.mrb[21].mxu0  ;;  %v2533_v12 = vpop.f32.mrb[21].mxu1 }
 0x123   : > { %v3973_v35 = vadd.f32 %v2445_v48, %v2444_v44  ;;  %v2534_v42 = vadd.f32 %v2533_v12, %v2532_v58  ;;  %v2447_v16 = vpop.f32.mrb[22].mxu0  ;;  %v2535_v34 = vpop.f32.mrb[22].mxu1  ;;  %v668_v44 = vsel %vm382_vm0, %v665_v13, %v667_v52 }
 0x124   : > { %v2448_v39 = vpop.f32.mrb[23].mxu0  ;;  %v2536_v38 = vpop.f32.mrb[23].mxu1 }
 0x125   : > { %v3977_v14 = vadd.f32 %v2534_v42, %v1306_v5  ;;  %v3979_v2 = vadd.f32 %v2448_v39, %v2447_v16  ;;  %v2537_v55 = vadd.f32 %v2536_v38, %v2535_v34  ;;  %v672_v5 = vrot.slane %v315_v49, 2 }
 0x126   : > { %1875 = vmatmul.mubr.bf16.gmra.mrb[128].mxu1 %v3251_v7  ;;  %2903 = vmatmul.mubr.bf16.gmra.mrb[128].mxu0 %v3835_v23  ;;  %v1314_v7 = vadd.f32 %v3926_v30, %v3953_v36  ;;  %v673_v42 = vrot.slane %v316_v40, 2  ;;  %v675_v16 = vrot.slane %v317_v28, 2 }
 0x127   : > { %v3987_v31 = vadd.f32 %v2537_v55, %v1309_v56  ;;  %1882 = vmatprep.mubr.bf16.mxu1 %v3365_v60  ;;  %2906 = vmatprep.mubr.bf16.mxu0 %v3628_v26  ;;  %v664_v26 = vrot.slane %v315_v49, 1  ;;  %v1325_v55 = vadd.f32 %v3942_v0, %v3953_v36 }
 0x128   : > { %v674_v40 = vsel %vm511_vm1, %v672_v5, %v673_v42  ;;  %v676_v28 = vsel %vm511_vm1, %v673_v42, %v675_v16 }
 0x129   : > { %v2450_v19 = vpop.f32.mrb[24].mxu0  ;;  %v2538_v8 = vpop.f32.mrb[24].mxu1  ;;  %v666_v1 = vsel %vm382_vm0, %v664_v26, %v665_v13 }
 0x12a   : > { %v2451_v50 = vpop.f32.mrb[25].mxu0  ;;  %v2539_v20 = vpop.f32.mrb[25].mxu1 }
 0x12b   : > { %v3995_v59 = vadd.f32 %v2451_v50, %v2450_v19  ;;  %v2540_v23 = vadd.f32 %v2539_v20, %v2538_v8  ;;  %v2453_v46 = vpop.f32.mrb[26].mxu0  ;;  %v2541_v25 = vpop.f32.mrb[26].mxu1 }
 0x12c   : > { %v2454_v60 = vpop.f32.mrb[27].mxu0  ;;  %v2542_v29 = vpop.f32.mrb[27].mxu1 }
 0x12d   : > { %v3999_v3 = vadd.f32 %v2540_v23, %v1314_v7  ;;  %v4001_v18 = vadd.f32 %v2454_v60, %v2453_v46  ;;  %v2543_v33 = vadd.f32 %v2542_v29, %v2541_v25  ;;  %v679_v7 = vpack.c.bf16 %v676_v28, %v674_v40 }
 0x12e   : > { %1883 = vmatmul.mubr.bf16.gmra.mrb[132].mxu1 %v3303_v53  ;;  %2907 = vmatmul.mubr.bf16.gmra.mrb[132].mxu0 %v3650_v24  ;;  %v1322_v53 = vadd.f32 %v3938_v51, %v3953_v36  ;;  %v1330_v23 = vadd.f32 %v3957_v15, %v3953_v36 }
 0x12f   : > { %v4005_v30 = vadd.f32 %v2543_v33, %v1317_v6  ;;  %1890 = vmatprep.mubr.bf16.mxu1 %v3900_v22  ;;  %2910 = vmatprep.mubr.bf16.mxu0 %v3657_v62  ;;  %v671_v62 = vpack.c.bf16 %v668_v44, %v666_v1 }
 0x131   : > { %v2456_v63 = vpop.f32.mrb[28].mxu0  ;;  %v2544_v58 = vpop.f32.mrb[28].mxu1 }
 0x132   : > { %v2457_v48 = vpop.f32.mrb[29].mxu0  ;;  %v2545_v12 = vpop.f32.mrb[29].mxu1 }
 0x133   : > { %v4013_v24 = vadd.f32 %v2457_v48, %v2456_v63  ;;  %v2546_v34 = vadd.f32 %v2545_v12, %v2544_v58  ;;  %v2459_v22 = vpop.f32.mrb[30].mxu0  ;;  %v2547_v39 = vpop.f32.mrb[30].mxu1  ;;  %v1338_v63 = vadd.f32 %v3973_v35, %v3953_v36 }
 0x134   : > { %v2460_v38 = vpop.f32.mrb[31].mxu0  ;;  %v2548_v56 = vpop.f32.mrb[31].mxu1 }
 0x135   : > { %v4017_v4 = vadd.f32 %v2546_v34, %v1322_v53  ;;  %v4019_v19 = vadd.f32 %v2460_v38, %v2459_v22  ;;  %v2549_v49 = vadd.f32 %v2548_v56, %v2547_v39  ;;  %v1346_v56 = vadd.f32 %v3995_v59, %v3953_v36 }
 0x136   : > { %1891 = vmatmul.mubr.bf16.gmra.mrb[136].mxu1 %v3853_v57  ;;  %2911 = vmatmul.mubr.bf16.gmra.mrb[136].mxu0 %v3685_v27 }
 0x137   : > { %v4023_v51 = vadd.f32 %v2549_v49, %v1325_v55  ;;  %1898 = vmatprep.mubr.bf16.mxu1 %v671_v62  ;;  %2914 = vmatprep.mubr.bf16.mxu0 %v3892_v54  ;;  %v1333_v54 = vadd.f32 %v3963_v47, %v3953_v36 }
 0x139   : > { %v2462_v8 = vpop.f32.mrb[32].mxu0  ;;  %v2550_v0 = vpop.f32.mrb[32].mxu1 }
 0x13a   : > { %v2463_v50 = vpop.f32.mrb[33].mxu0  ;;  %v2551_v20 = vpop.f32.mrb[33].mxu1 }
 0x13b   : > { %v4030_v57 = vadd.f32 %v2463_v50, %v2462_v8  ;;  %v2552_v27 = vadd.f32 %v2551_v20, %v2550_v0  ;;  %v2465_v46 = vpop.f32.mrb[34].mxu0  ;;  %v2553_v25 = vpop.f32.mrb[34].mxu1  ;;  %v1349_v0 = vadd.f32 %v4001_v18, %v3953_v36 }
 0x13c   : > { %v2466_v60 = vpop.f32.mrb[35].mxu0  ;;  %v2554_v29 = vpop.f32.mrb[35].mxu1 }
 0x13d   : > { %v4034_v26 = vadd.f32 %v2552_v27, %v1330_v23  ;;  %v2467_v13 = vadd.f32 %v2466_v60, %v2465_v46  ;;  %v2555_v52 = vadd.f32 %v2554_v29, %v2553_v25  ;;  %v1354_v60 = vadd.f32 %v4013_v24, %v3953_v36 }
 0x13e   : > { %1899 = vmatmul.mubr.bf16.gmra.mrb[140].mxu1 %v3982_v61  ;;  %2915 = vmatmul.mubr.bf16.gmra.mrb[140].mxu0 %v679_v7  ;;  %v1341_v61 = vadd.f32 %v3979_v2, %v3953_v36 }
 0x13f   : > { %v4037_v6 = vadd.f32 %v2555_v52, %v1333_v54 }
 0x141   : > { %v2468_v15 = vpop.f32.mrb[36].mxu0  ;;  %v2556_v33 = vpop.f32.mrb[36].mxu1 }
 0x142   : > { %v2469_v1 = vpop.f32.mrb[37].mxu0  ;;  %v2557_v44 = vpop.f32.mrb[37].mxu1 }
 0x143   : > { %v4041_v58 = vadd.f32 %v2469_v1, %v2468_v15  ;;  %v2558_v48 = vadd.f32 %v2557_v44, %v2556_v33  ;;  %v2471_v47 = vpop.f32.mrb[38].mxu0  ;;  %v2559_v12 = vpop.f32.mrb[38].mxu1  ;;  %v1357_v1 = vadd.f32 %v4019_v19, %v3953_v36  ;;  %v1365_v19 = vadd.f32 %v2467_v13, %v3953_v36 }
 0x144   : > { %v2472_v5 = vpop.f32.mrb[39].mxu0  ;;  %v2560_v42 = vpop.f32.mrb[39].mxu1 }
 0x145   : > { %v4045_v16 = vadd.f32 %v2558_v48, %v1338_v63  ;;  %v2473_v53 = vadd.f32 %v2472_v5, %v2471_v47  ;;  %v2561_v34 = vadd.f32 %v2560_v42, %v2559_v12  ;;  %v1370_v13 = vadd.f32 %v4041_v58, %v3953_v36 }
 0x147   : > { %v4047_v22 = vadd.f32 %v2561_v34, %v1341_v61  ;;  %v1362_v61 = vadd.f32 %v4030_v57, %v3953_v36 }
 0x149   : > { %v2474_v39 = vpop.f32.mrb[40].mxu0  ;;  %v2562_v62 = vpop.f32.mrb[40].mxu1 }
 0x14a   : > { %v2475_v38 = vpop.f32.mrb[41].mxu0  ;;  %v2563_v35 = vpop.f32.mrb[41].mxu1 }
 0x14b   : > { %v4051_v55 = vadd.f32 %v2475_v38, %v2474_v39  ;;  %v2564_v49 = vadd.f32 %v2563_v35, %v2562_v62  ;;  %v2477_v40 = vpop.f32.mrb[42].mxu0  ;;  %v2565_v28 = vpop.f32.mrb[42].mxu1 }
 0x14c   : > { %v2478_v8 = vpop.f32.mrb[43].mxu0  ;;  %v2566_v2 = vpop.f32.mrb[43].mxu1 }
 0x14d   : > { %v4055_v50 = vadd.f32 %v2564_v49, %v1346_v56  ;;  %v4057_v20 = vadd.f32 %v2478_v8, %v2477_v40  ;;  %v2567_v7 = vadd.f32 %v2566_v2, %v2565_v28 }
 0x14f   : > { %v4059_v23 = vadd.f32 %v2567_v7, %v1349_v0 }
 0x151   : > { %v2480_v27 = vpop.f32.mrb[44].mxu0  ;;  %v2568_v46 = vpop.f32.mrb[44].mxu1 }
 0x152   : > { %v2481_v59 = vpop.f32.mrb[45].mxu0  ;;  %v2569_v25 = vpop.f32.mrb[45].mxu1 }
 0x153   : > { %v4063_v29 = vadd.f32 %v2481_v59, %v2480_v27  ;;  %v2570_v54 = vadd.f32 %v2569_v25, %v2568_v46  ;;  %v2483_v52 = vpop.f32.mrb[46].mxu0  ;;  %v2571_v15 = vpop.f32.mrb[46].mxu1 }
 0x154   : > { %v2484_v18 = vpop.f32.mrb[47].mxu0  ;;  %v2572_v33 = vpop.f32.mrb[47].mxu1 }
 0x155   : > { %v4067_v44 = vadd.f32 %v2570_v54, %v1354_v60  ;;  %v4069_v63 = vadd.f32 %v2484_v18, %v2483_v52  ;;  %v2573_v48 = vadd.f32 %v2572_v33, %v2571_v15 }
 0x157   : > { %v4071_v47 = vadd.f32 %v2573_v48, %v1357_v1 }
 0x159   : > { %v2574_v12 = vpop.f32.mrb[48].mxu1  ;;  %v2638_v5 = vpop.f32.mrb[48].mxu0 }
 0x15a   : > { %v2575_v24 = vpop.f32.mrb[49].mxu1  ;;  %v2639_v42 = vpop.f32.mrb[49].mxu0 }
 0x15b   : > { %v2576_v34 = vadd.f32 %v2575_v24, %v2574_v12  ;;  %v2640_v39 = vadd.f32 %v2639_v42, %v2638_v5  ;;  %v2577_v62 = vpop.f32.mrb[50].mxu1  ;;  %v2641_v38 = vpop.f32.mrb[50].mxu0 }
 0x15c   : > { %v2578_v35 = vpop.f32.mrb[51].mxu1  ;;  %v2642_v56 = vpop.f32.mrb[51].mxu0 }
 0x15d   : > { %v4076_v49 = vadd.f32 %v2576_v34, %v1362_v61  ;;  %v4079_v40 = vadd.f32 %v2640_v39, %v3961_v45  ;;  %v2579_v28 = vadd.f32 %v2578_v35, %v2577_v62  ;;  %v2643_v8 = vadd.f32 %v2642_v56, %v2641_v38 }
 0x15e   : > { %v1373_v45 = vadd.f32 %v2473_v53, %v3953_v36  ;;  %v1378_v53 = vadd.f32 %v4051_v55, %v3953_v36 }
 0x15f   : > { %v4081_v2 = vadd.f32 %v2579_v28, %v1365_v19  ;;  %v4084_v0 = vadd.f32 %v2643_v8, %v3967_v10 }
 0x161   : > { %v2580_v57 = vpop.f32.mrb[52].mxu1  ;;  %v2644_v7 = vpop.f32.mrb[52].mxu0 }
 0x162   : > { %v2581_v27 = vpop.f32.mrb[53].mxu1  ;;  %v2645_v46 = vpop.f32.mrb[53].mxu0 }
 0x163   : > { %v2582_v59 = vadd.f32 %v2581_v27, %v2580_v57  ;;  %v2646_v25 = vadd.f32 %v2645_v46, %v2644_v7  ;;  %v2583_v60 = vpop.f32.mrb[54].mxu1  ;;  %v2647_v54 = vpop.f32.mrb[54].mxu0 }
 0x164   : > { %v2584_v52 = vpop.f32.mrb[55].mxu1  ;;  %v2648_v15 = vpop.f32.mrb[55].mxu0 }
 0x165   : > { %v4089_v18 = vadd.f32 %v2582_v59, %v1370_v13  ;;  %v4092_v10 = vadd.f32 %v2646_v25, %v3977_v14  ;;  %v2585_v33 = vadd.f32 %v2584_v52, %v2583_v60  ;;  %v2649_v1 = vadd.f32 %v2648_v15, %v2647_v54 }
 0x166   : > { %v1381_v14 = vadd.f32 %v4057_v20, %v3953_v36  ;;  %v1386_v20 = vadd.f32 %v4063_v29, %v3953_v36 }
 0x167   : > { %v4094_v48 = vadd.f32 %v2585_v33, %v1373_v45  ;;  %v4097_v12 = vadd.f32 %v2649_v1, %v3987_v31 }
 0x169   : > { %v2586_v58 = vpop.f32.mrb[56].mxu1  ;;  %v2650_v5 = vpop.f32.mrb[56].mxu0 }
 0x16a   : > { %v2587_v24 = vpop.f32.mrb[57].mxu1  ;;  %v2651_v42 = vpop.f32.mrb[57].mxu0 }
 0x16b   : > { %v2588_v61 = vadd.f32 %v2587_v24, %v2586_v58  ;;  %v2652_v34 = vadd.f32 %v2651_v42, %v2650_v5  ;;  %v2589_v39 = vpop.f32.mrb[58].mxu1  ;;  %v2653_v62 = vpop.f32.mrb[58].mxu0 }
 0x16c   : > { %v2590_v38 = vpop.f32.mrb[59].mxu1  ;;  %v2654_v19 = vpop.f32.mrb[59].mxu0 }
 0x16d   : > { %v4103_v35 = vadd.f32 %v2588_v61, %v1378_v53  ;;  %v4106_v31 = vadd.f32 %v2652_v34, %v3999_v3  ;;  %v2591_v56 = vadd.f32 %v2590_v38, %v2589_v39  ;;  %v2655_v28 = vadd.f32 %v2654_v19, %v2653_v62 }
 0x16e   : > { %v1389_v3 = vadd.f32 %v4069_v63, %v3953_v36  ;;  %v1394_v63 = vadd.f32 %v3904_v41, %v3953_v36 }
 0x16f   : > { %v4108_v8 = vadd.f32 %v2591_v56, %v1381_v14  ;;  %v4111_v55 = vadd.f32 %v2655_v28, %v4005_v30 }
 0x171   : > { %v2592_v57 = vpop.f32.mrb[60].mxu1  ;;  %v2656_v7 = vpop.f32.mrb[60].mxu0 }
 0x172   : > { %v2593_v27 = vpop.f32.mrb[61].mxu1  ;;  %v2657_v46 = vpop.f32.mrb[61].mxu0 }
 0x173   : > { %v2594_v13 = vadd.f32 %v2593_v27, %v2592_v57  ;;  %v2658_v59 = vadd.f32 %v2657_v46, %v2656_v7  ;;  %v2595_v25 = vpop.f32.mrb[62].mxu1  ;;  %v2659_v60 = vpop.f32.mrb[62].mxu0 }
 0x174   : > { %v2596_v54 = vpop.f32.mrb[63].mxu1  ;;  %v2660_v45 = vpop.f32.mrb[63].mxu0 }
 0x175   : > { %v4117_v52 = vadd.f32 %v2594_v13, %v1386_v20  ;;  %v4120_v30 = vadd.f32 %v2658_v59, %v4017_v4  ;;  %v2597_v15 = vadd.f32 %v2596_v54, %v2595_v25  ;;  %v2661_v33 = vadd.f32 %v2660_v45, %v2659_v60 }
 0x176   : > { %v1397_v4 = vadd.f32 %v3908_v43, %v3953_v36  ;;  %v1402_v43 = vadd.f32 %v3916_v21, %v3953_v36 }
 0x177   : > { %v4122_v1 = vadd.f32 %v2597_v15, %v1389_v3  ;;  %v4125_v29 = vadd.f32 %v2661_v33, %v4023_v51 }
 0x179   : > { %v2598_v58 = vpop.f32.mrb[64].mxu1  ;;  %v2662_v5 = vpop.f32.mrb[64].mxu0 }
 0x17a   : > { %v2599_v24 = vpop.f32.mrb[65].mxu1  ;;  %v2663_v42 = vpop.f32.mrb[65].mxu0 }
 0x17b   : > { %v2600_v53 = vadd.f32 %v2599_v24, %v2598_v58  ;;  %v2664_v61 = vadd.f32 %v2663_v42, %v2662_v5  ;;  %v2601_v34 = vpop.f32.mrb[66].mxu1  ;;  %v2665_v39 = vpop.f32.mrb[66].mxu0 }
 0x17c   : > { %v2602_v62 = vpop.f32.mrb[67].mxu1  ;;  %v2666_v14 = vpop.f32.mrb[67].mxu0 }
 0x17d   : > { %v4131_v38 = vadd.f32 %v2600_v53, %v1394_v63  ;;  %v4134_v51 = vadd.f32 %v2664_v61, %v4034_v26  ;;  %v2603_v19 = vadd.f32 %v2602_v62, %v2601_v34  ;;  %v2667_v56 = vadd.f32 %v2666_v14, %v2665_v39 }
 0x17e   : > { %v1405_v26 = vadd.f32 %v3920_v32, %v3953_v36  ;;  %v1410_v32 = vadd.f32 %v3928_v11, %v3953_v36 }
 0x17f   : > { %v4136_v28 = vadd.f32 %v2603_v19, %v1397_v4  ;;  %v4139_v41 = vadd.f32 %v2667_v56, %v4037_v6 }
 0x181   : > { %v2604_v57 = vpop.f32.mrb[68].mxu1  ;;  %v2668_v7 = vpop.f32.mrb[68].mxu0 }
 0x182   : > { %v2605_v27 = vpop.f32.mrb[69].mxu1  ;;  %v2669_v46 = vpop.f32.mrb[69].mxu0 }
 0x183   : > { %v2606_v20 = vadd.f32 %v2605_v27, %v2604_v57  ;;  %v2670_v13 = vadd.f32 %v2669_v46, %v2668_v7  ;;  %v2607_v59 = vpop.f32.mrb[70].mxu1  ;;  %v2671_v25 = vpop.f32.mrb[70].mxu0 }
 0x184   : > { %v2608_v60 = vpop.f32.mrb[71].mxu1  ;;  %v2672_v3 = vpop.f32.mrb[71].mxu0 }
 0x185   : > { %v4145_v54 = vadd.f32 %v2606_v20, %v1402_v43  ;;  %v4148_v6 = vadd.f32 %v2670_v13, %v4045_v16  ;;  %v2609_v45 = vadd.f32 %v2608_v60, %v2607_v59  ;;  %v2673_v15 = vadd.f32 %v2672_v3, %v2671_v25 }
 0x186   : > { %v1413_v16 = vadd.f32 %v3932_v9, %v3953_v36  ;;  %v1418_v9 = vadd.f32 %v3940_v37, %v3953_v36 }
 0x187   : > { %v4150_v33 = vadd.f32 %v2609_v45, %v1405_v26  ;;  %v4153_v21 = vadd.f32 %v2673_v15, %v4047_v22 }
 0x189   : > { %v2610_v58 = vpop.f32.mrb[72].mxu1  ;;  %v2674_v5 = vpop.f32.mrb[72].mxu0 }
 0x18a   : > { %v2611_v24 = vpop.f32.mrb[73].mxu1  ;;  %v2675_v42 = vpop.f32.mrb[73].mxu0 }
 0x18b   : > { %v2612_v63 = vadd.f32 %v2611_v24, %v2610_v58  ;;  %v2676_v53 = vadd.f32 %v2675_v42, %v2674_v5  ;;  %v2613_v61 = vpop.f32.mrb[74].mxu1  ;;  %v2677_v34 = vpop.f32.mrb[74].mxu0 }
 0x18c   : > { %v2614_v39 = vpop.f32.mrb[75].mxu1  ;;  %v2678_v4 = vpop.f32.mrb[75].mxu0 }
 0x18d   : > { %v4159_v62 = vadd.f32 %v2612_v63, %v1410_v32  ;;  %v4162_v22 = vadd.f32 %v2676_v53, %v4055_v50  ;;  %v2615_v14 = vadd.f32 %v2614_v39, %v2613_v61  ;;  %v2679_v19 = vadd.f32 %v2678_v4, %v2677_v34 }
 0x18e   : > { %v1421_v50 = vadd.f32 %v3944_v17, %v3953_v36 }
 0x18f   : > { %v4164_v56 = vadd.f32 %v2615_v14, %v1413_v16  ;;  %v4167_v11 = vadd.f32 %v2679_v19, %v4059_v23 }
 0x191   : > { %v2616_v57 = vpop.f32.mrb[76].mxu1  ;;  %v2680_v7 = vpop.f32.mrb[76].mxu0 }
 0x192   : > { %v2617_v27 = vpop.f32.mrb[77].mxu1  ;;  %v2681_v46 = vpop.f32.mrb[77].mxu0 }
 0x193   : > { %v2618_v43 = vadd.f32 %v2617_v27, %v2616_v57  ;;  %v2682_v20 = vadd.f32 %v2681_v46, %v2680_v7  ;;  %v2619_v13 = vpop.f32.mrb[78].mxu1  ;;  %v2683_v59 = vpop.f32.mrb[78].mxu0 }
 0x194   : > { %v2620_v25 = vpop.f32.mrb[79].mxu1  ;;  %v2684_v26 = vpop.f32.mrb[79].mxu0 }
 0x195   : > { %v4173_v60 = vadd.f32 %v2618_v43, %v1418_v9  ;;  %v4176_v23 = vadd.f32 %v2682_v20, %v4067_v44  ;;  %v2621_v3 = vadd.f32 %v2620_v25, %v2619_v13  ;;  %v2685_v45 = vadd.f32 %v2684_v26, %v2683_v59 }
 0x197   : > { %v4178_v15 = vadd.f32 %v2621_v3, %v1421_v50  ;;  %v4181_v37 = vadd.f32 %v2685_v45, %v4071_v47 }
 0x199   : > { %v2686_v58 = vpop.f32.mrb[80].mxu0  ;;  %v2750_v5 = vpop.f32.mrb[80].mxu1 }
 0x19a   : > { %v2687_v24 = vpop.f32.mrb[81].mxu0  ;;  %v2751_v42 = vpop.f32.mrb[81].mxu1 }
 0x19b   : > { %v2688_v32 = vadd.f32 %v2687_v24, %v2686_v58  ;;  %v2752_v17 = vadd.f32 %v2751_v42, %v2750_v5  ;;  %v2689_v36 = vpop.f32.mrb[82].mxu0  ;;  %v2753_v63 = vpop.f32.mrb[82].mxu1 }
 0x19c   : > { %v2690_v53 = vpop.f32.mrb[83].mxu0  ;;  %v2754_v61 = vpop.f32.mrb[83].mxu1 }
 0x19d   : > { %v4184_v44 = vadd.f32 %v2688_v32, %v4076_v49  ;;  %v2691_v34 = vadd.f32 %v2690_v53, %v2689_v36  ;;  %v2755_v16 = vadd.f32 %v2754_v61, %v2753_v63  ;;  %v4187_v39 = vadd.f32 %v2752_v17, %v4079_v40 }
 0x19f   : > { %v4190_v47 = vadd.f32 %v2691_v34, %v4081_v2  ;;  %v4193_v4 = vadd.f32 %v2755_v16, %v4084_v0 }
 0x1a1   : > { %v2692_v14 = vpop.f32.mrb[84].mxu0  ;;  %v2756_v19 = vpop.f32.mrb[84].mxu1 }
 0x1a2   : > { %v2693_v57 = vpop.f32.mrb[85].mxu0  ;;  %v2757_v7 = vpop.f32.mrb[85].mxu1 }
 0x1a3   : > { %v2694_v27 = vadd.f32 %v2693_v57, %v2692_v14  ;;  %v2758_v46 = vadd.f32 %v2757_v7, %v2756_v19  ;;  %v2695_v9 = vpop.f32.mrb[86].mxu0  ;;  %v2759_v49 = vpop.f32.mrb[86].mxu1 }
 0x1a4   : > { %v2696_v43 = vpop.f32.mrb[87].mxu0  ;;  %v2760_v20 = vpop.f32.mrb[87].mxu1 }
 0x1a5   : > { %v4196_v13 = vadd.f32 %v2694_v27, %v4089_v18  ;;  %v2697_v40 = vadd.f32 %v2696_v43, %v2695_v9  ;;  %v2761_v59 = vadd.f32 %v2760_v20, %v2759_v49  ;;  %v4199_v2 = vadd.f32 %v2758_v46, %v4092_v10 }
 0x1a7   : > { %v4202_v0 = vadd.f32 %v2697_v40, %v4094_v48  ;;  %v4205_v50 = vadd.f32 %v2761_v59, %v4097_v12 }
 0x1a9   : > { %v2698_v25 = vpop.f32.mrb[88].mxu0  ;;  %v2762_v26 = vpop.f32.mrb[88].mxu1 }
 0x1aa   : > { %v2699_v3 = vpop.f32.mrb[89].mxu0  ;;  %v2763_v45 = vpop.f32.mrb[89].mxu1 }
 0x1ab   : > { %v2700_v58 = vadd.f32 %v2699_v3, %v2698_v25  ;;  %v2764_v5 = vadd.f32 %v2763_v45, %v2762_v26  ;;  %v2701_v24 = vpop.f32.mrb[90].mxu0  ;;  %v2765_v18 = vpop.f32.mrb[90].mxu1 }
 0x1ac   : > { %v2702_v42 = vpop.f32.mrb[91].mxu0  ;;  %v2766_v32 = vpop.f32.mrb[91].mxu1 }
 0x1ad   : > { %v4208_v17 = vadd.f32 %v2700_v58, %v4103_v35  ;;  %v2703_v10 = vadd.f32 %v2702_v42, %v2701_v24  ;;  %v2767_v36 = vadd.f32 %v2766_v32, %v2765_v18  ;;  %v4211_v48 = vadd.f32 %v2764_v5, %v4106_v31 }
 0x1af   : > { %v4214_v12 = vadd.f32 %v2703_v10, %v4108_v8  ;;  %v4217_v63 = vadd.f32 %v2767_v36, %v4111_v55 }
 0x1b1   : > { %v2704_v53 = vpop.f32.mrb[92].mxu0  ;;  %v2768_v61 = vpop.f32.mrb[92].mxu1 }
 0x1b2   : > { %v2705_v34 = vpop.f32.mrb[93].mxu0  ;;  %v2769_v16 = vpop.f32.mrb[93].mxu1 }
 0x1b3   : > { %v2706_v14 = vadd.f32 %v2705_v34, %v2704_v53  ;;  %v2770_v19 = vadd.f32 %v2769_v16, %v2768_v61  ;;  %v2707_v57 = vpop.f32.mrb[94].mxu0  ;;  %v2771_v35 = vpop.f32.mrb[94].mxu1 }
 0x1b4   : > { %v2708_v7 = vpop.f32.mrb[95].mxu0  ;;  %v2772_v27 = vpop.f32.mrb[95].mxu1 }
 0x1b5   : > { %v4220_v46 = vadd.f32 %v2706_v14, %v4117_v52  ;;  %v2709_v31 = vadd.f32 %v2708_v7, %v2707_v57  ;;  %v2773_v9 = vadd.f32 %v2772_v27, %v2771_v35  ;;  %v4223_v8 = vadd.f32 %v2770_v19, %v4120_v30 }
 0x1b7   : > { %v4226_v55 = vadd.f32 %v2709_v31, %v4122_v1  ;;  %v4229_v49 = vadd.f32 %v2773_v9, %v4125_v29 }
 0x1b9   : > { %v2710_v43 = vpop.f32.mrb[96].mxu0  ;;  %v2774_v20 = vpop.f32.mrb[96].mxu1 }
 0x1ba   : > { %v2711_v40 = vpop.f32.mrb[97].mxu0  ;;  %v2775_v59 = vpop.f32.mrb[97].mxu1 }
 0x1bb   : > { %v2712_v25 = vadd.f32 %v2711_v40, %v2710_v43  ;;  %v2776_v26 = vadd.f32 %v2775_v59, %v2774_v20  ;;  %v2713_v3 = vpop.f32.mrb[98].mxu0  ;;  %v2777_v52 = vpop.f32.mrb[98].mxu1 }
 0x1bc   : > { %v2714_v45 = vpop.f32.mrb[99].mxu0  ;;  %v2778_v58 = vpop.f32.mrb[99].mxu1 }
 0x1bd   : > { %v4232_v5 = vadd.f32 %v2712_v25, %v4131_v38  ;;  %v2715_v30 = vadd.f32 %v2714_v45, %v2713_v3  ;;  %v2779_v24 = vadd.f32 %v2778_v58, %v2777_v52  ;;  %v4235_v1 = vadd.f32 %v2776_v26, %v4134_v51 }
 0x1bf   : > { %v4238_v29 = vadd.f32 %v2715_v30, %v4136_v28  ;;  %v4241_v18 = vadd.f32 %v2779_v24, %v4139_v41 }
 0x1c1   : > { %v2716_v42 = vpop.f32.mrb[100].mxu0  ;;  %v2780_v32 = vpop.f32.mrb[100].mxu1 }
 0x1c2   : > { %v2717_v10 = vpop.f32.mrb[101].mxu0  ;;  %v2781_v36 = vpop.f32.mrb[101].mxu1 }
 0x1c3   : > { %v2718_v53 = vadd.f32 %v2717_v10, %v2716_v42  ;;  %v2782_v61 = vadd.f32 %v2781_v36, %v2780_v32  ;;  %v2719_v34 = vpop.f32.mrb[102].mxu0  ;;  %v2783_v38 = vpop.f32.mrb[102].mxu1 }
 0x1c4   : > { %v2720_v16 = vpop.f32.mrb[103].mxu0  ;;  %v2784_v14 = vpop.f32.mrb[103].mxu1 }
 0x1c5   : > { %v4244_v19 = vadd.f32 %v2718_v53, %v4145_v54  ;;  %v2721_v51 = vadd.f32 %v2720_v16, %v2719_v34  ;;  %v2785_v57 = vadd.f32 %v2784_v14, %v2783_v38  ;;  %v4247_v28 = vadd.f32 %v2782_v61, %v4148_v6 }
 0x1c7   : > { %v4250_v41 = vadd.f32 %v2721_v51, %v4150_v33  ;;  %v4253_v35 = vadd.f32 %v2785_v57, %v4153_v21 }
 0x1c9   : > { %v2722_v7 = vpop.f32.mrb[104].mxu0  ;;  %v2786_v27 = vpop.f32.mrb[104].mxu1 }
 0x1ca   : > { %v2723_v31 = vpop.f32.mrb[105].mxu0  ;;  %v2787_v9 = vpop.f32.mrb[105].mxu1 }
 0x1cb   : > { %v2724_v43 = vadd.f32 %v2723_v31, %v2722_v7  ;;  %v2788_v20 = vadd.f32 %v2787_v9, %v2786_v27  ;;  %v2725_v40 = vpop.f32.mrb[106].mxu0  ;;  %v2789_v54 = vpop.f32.mrb[106].mxu1 }
 0x1cc   : > { %v2726_v59 = vpop.f32.mrb[107].mxu0  ;;  %v2790_v25 = vpop.f32.mrb[107].mxu1 }
 0x1cd   : > { %v4256_v26 = vadd.f32 %v2724_v43, %v4159_v62  ;;  %v2727_v6 = vadd.f32 %v2726_v59, %v2725_v40  ;;  %v2791_v3 = vadd.f32 %v2790_v25, %v2789_v54  ;;  %v4259_v33 = vadd.f32 %v2788_v20, %v4162_v22 }
 0x1cf   : > { %v4262_v21 = vadd.f32 %v2727_v6, %v4164_v56  ;;  %v4265_v52 = vadd.f32 %v2791_v3, %v4167_v11 }
 0x1d1   : > { %v2728_v45 = vpop.f32.mrb[108].mxu0  ;;  %v2792_v58 = vpop.f32.mrb[108].mxu1 }
 0x1d2   : > { %v2729_v30 = vpop.f32.mrb[109].mxu0  ;;  %v2793_v24 = vpop.f32.mrb[109].mxu1 }
 0x1d3   : > { %v2730_v42 = vadd.f32 %v2729_v30, %v2728_v45  ;;  %v2794_v32 = vadd.f32 %v2793_v24, %v2792_v58  ;;  %v2731_v62 = vpop.f32.mrb[110].mxu0  ;;  %v2795_v10 = vpop.f32.mrb[110].mxu1 }
 0x1d4   : > { %v2732_v36 = vpop.f32.mrb[111].mxu0  ;;  %v2796_v53 = vpop.f32.mrb[111].mxu1 }
 0x1d5   : > { %v4268_v22 = vadd.f32 %v2730_v42, %v4173_v60  ;;  %v2733_v61 = vadd.f32 %v2732_v36, %v2731_v62  ;;  %v2797_v56 = vadd.f32 %v2796_v53, %v2795_v10  ;;  %v4271_v34 = vadd.f32 %v2794_v32, %v4176_v23 }
 0x1d7   : > { %v4275_v11 = vadd.f32 %v2733_v61, %v4178_v15  ;;  %v4278_v38 = vadd.f32 %v2797_v56, %v4181_v37 }
 0x1d9   : > { %v2798_v16 = vpop.f32.mrb[112].mxu1  ;;  %v2888_v60 = vpop.f32.mrb[112].mxu0 }
 0x1da   : > { %v1950_v23 = vadd.f32 %v2888_v60, %v4199_v2  ;;  %v2799_v14 = vpop.f32.mrb[113].mxu1  ;;  %v1941_v51 = vpop.f32.mrb[113].mxu0 }
 0x1db   : > { %v2800_v15 = vadd.f32 %v2799_v14, %v2798_v16  ;;  %v1942_v57 = vadd.f32 %v1941_v51, %v4187_v39  ;;  %v2801_v37 = vpop.f32.mrb[114].mxu1  ;;  %v2889_v7 = vpop.f32.mrb[114].mxu0 }
 0x1dc   : > { %2070 = vst [vmem:[%s4283_s30 + $0x10] sm:$0xff] %v1950_v23  ;;  %v1953_v27 = vadd.f32 %v2889_v7, %v4205_v50  ;;  %v2802_v31 = vpop.f32.mrb[115].mxu1  ;;  %v1944_v9 = vpop.f32.mrb[115].mxu0  ;;  %v2139_v25 = vmul.f32 %v1950_v23, %v1950_v23 }
 0x1dd   : > { %2068 = vst [vmem:[%s4283_s30] sm:$0xff] %v1942_v57  ;;  %v2803_v43 = vadd.f32 %v2802_v31, %v2801_v37  ;;  %v1945_v20 = vadd.f32 %v1944_v9, %v4193_v4  ;;  %v4292_v40 = vadd.f32 %v2800_v15, %v4184_v44  ;;  %v2137_v2 = vmul.f32 %v1942_v57, %v1942_v57 }
 0x1de   : > { %2071 = vst [vmem:[%s4283_s30 + $0x18] sm:$0xff] %v1953_v27  ;;  %v2140_v58 = vmul.f32 %v1953_v27, %v1953_v27 }
 0x1df   : > { %2069 = vst [vmem:[%s4283_s30 + $0x8] sm:$0xff] %v1945_v20  ;;  %v2100_v54 = vadd.f32 %v1945_v20, %v1942_v57  ;;  %v2138_v59 = vmul.f32 %v1945_v20, %v1945_v20  ;;  %v4297_v39 = vadd.f32 %v2803_v43, %v4190_v47 }
 0x1e1   : > { %v2101_v50 = vadd.f32 %v2100_v54, %v1950_v23  ;;  %v2169_v6 = vadd.f32 %v2138_v59, %v2137_v2  ;;  %v2804_v3 = vpop.f32.mrb[116].mxu1  ;;  %v2892_v45 = vpop.f32.mrb[116].mxu0 }
 0x1e2   : > { %v1966_v4 = vadd.f32 %v2892_v45, %v4223_v8  ;;  %v2805_v44 = vpop.f32.mrb[117].mxu1  ;;  %v1957_v30 = vpop.f32.mrb[117].mxu0 }
 0x1e3   : > { %v2170_v24 = vadd.f32 %v2169_v6, %v2139_v25  ;;  %v2806_v42 = vadd.f32 %v2805_v44, %v2804_v3  ;;  %v1958_v32 = vadd.f32 %v1957_v30, %v4211_v48  ;;  %v2102_v62 = vadd.f32 %v2101_v50, %v1953_v27  ;;  %v2807_v47 = vpop.f32.mrb[118].mxu1  ;;  %v2893_v10 = vpop.f32.mrb[118].mxu0 }
 0x1e4   : > { %2074 = vst [vmem:[%s4283_s30 + $0x30] sm:$0xff] %v1966_v4  ;;  %v1969_v36 = vadd.f32 %v2893_v10, %v4229_v49  ;;  %v2808_v53 = vpop.f32.mrb[119].mxu1  ;;  %v1960_v61 = vpop.f32.mrb[119].mxu0  ;;  %v2143_v7 = vmul.f32 %v1966_v4, %v1966_v4 }
 0x1e5   : > { %2072 = vst [vmem:[%s4283_s30 + $0x20] sm:$0xff] %v1958_v32  ;;  %v2103_v56 = vadd.f32 %v2102_v62, %v1958_v32  ;;  %v2141_v16 = vmul.f32 %v1958_v32, %v1958_v32  ;;  %v2171_v8 = vadd.f32 %v2170_v24, %v2140_v58  ;;  %v2809_v60 = vadd.f32 %v2808_v53, %v2807_v47 }
 0x1e6   : > { %2075 = vst [vmem:[%s4283_s30 + $0x38] sm:$0xff] %v1969_v36  ;;  %v1961_v23 = vadd.f32 %v1960_v61, %v4217_v63  ;;  %v4307_v14 = vadd.f32 %v2806_v42, %v4196_v13  ;;  %v2144_v54 = vmul.f32 %v1969_v36, %v1969_v36 }
 0x1e7   : > { %v2172_v48 = vadd.f32 %v2171_v8, %v2141_v16  ;;  %v4310_v51 = vadd.f32 %v2809_v60, %v4202_v0 }
 0x1e8   : > { %2073 = vst [vmem:[%s4283_s30 + $0x28] sm:$0xff] %v1961_v23  ;;  %v2104_v15 = vadd.f32 %v2103_v56, %v1961_v23  ;;  %v2142_v49 = vmul.f32 %v1961_v23, %v1961_v23 }
 0x1e9   : > { %v2810_v57 = vpop.f32.mrb[120].mxu1  ;;  %v2896_v37 = vpop.f32.mrb[120].mxu0 }
 0x1ea   : > { %v2105_v27 = vadd.f32 %v2104_v15, %v1966_v4  ;;  %v2173_v31 = vadd.f32 %v2172_v48, %v2142_v49  ;;  %v1982_v9 = vadd.f32 %v2896_v37, %v4247_v28  ;;  %v2811_v63 = vpop.f32.mrb[121].mxu1  ;;  %v1973_v43 = vpop.f32.mrb[121].mxu0 }
 0x1eb   : > { %v2812_v13 = vadd.f32 %v2811_v63, %v2810_v57  ;;  %v1974_v20 = vadd.f32 %v1973_v43, %v4235_v1  ;;  %v2813_v2 = vpop.f32.mrb[122].mxu1  ;;  %v2897_v0 = vpop.f32.mrb[122].mxu0 }
 0x1ec   : > { %v2174_v59 = vadd.f32 %v2173_v31, %v2143_v7  ;;  %2078 = vst [vmem:[%s4283_s30 + $0x50] sm:$0xff] %v1982_v9  ;;  %v2106_v25 = vadd.f32 %v2105_v27, %v1969_v36  ;;  %v1985_v50 = vadd.f32 %v2897_v0, %v4253_v35  ;;  %v2814_v6 = vpop.f32.mrb[123].mxu1  ;;  %v1976_v3 = vpop.f32.mrb[123].mxu0  ;;  %v2147_v47 = vmul.f32 %v1982_v9, %v1982_v9 }
 0x1ed   : > { %2076 = vst [vmem:[%s4283_s30 + $0x40] sm:$0xff] %v1974_v20  ;;  %v2145_v45 = vmul.f32 %v1974_v20, %v1974_v20  ;;  %v2815_v28 = vadd.f32 %v2814_v6, %v2813_v2  ;;  %v1977_v58 = vadd.f32 %v1976_v3, %v4241_v18  ;;  %v4320_v4 = vadd.f32 %v2812_v13, %v4208_v17 }
 0x1ee   : > { %v2107_v1 = vadd.f32 %v2106_v25, %v1974_v20  ;;  %v2175_v44 = vadd.f32 %v2174_v59, %v2144_v54  ;;  %2079 = vst [vmem:[%s4283_s30 + $0x58] sm:$0xff] %v1985_v50  ;;  %v2148_v8 = vmul.f32 %v1985_v50, %v1985_v50 }
 0x1ef   : > { %2077 = vst [vmem:[%s4283_s30 + $0x48] sm:$0xff] %v1977_v58  ;;  %v2146_v30 = vmul.f32 %v1977_v58, %v1977_v58  ;;  %v4325_v24 = vadd.f32 %v2815_v28, %v4214_v12 }
 0x1f0   : > { %v2176_v42 = vadd.f32 %v2175_v44, %v2145_v45  ;;  %v2108_v35 = vadd.f32 %v2107_v1, %v1977_v58 }
 0x1f1   : > { %v2816_v32 = vpop.f32.mrb[124].mxu1  ;;  %v2900_v62 = vpop.f32.mrb[124].mxu0 }
 0x1f2   : > { %v2109_v10 = vadd.f32 %v2108_v35, %v1982_v9  ;;  %v2177_v18 = vadd.f32 %v2176_v42, %v2146_v30  ;;  %v1998_v17 = vadd.f32 %v2900_v62, %v4271_v34  ;;  %v2817_v36 = vpop.f32.mrb[125].mxu1  ;;  %v1989_v53 = vpop.f32.mrb[125].mxu0 }
 0x1f3   : > { %v2818_v61 = vadd.f32 %v2817_v36, %v2816_v32  ;;  %v1990_v56 = vadd.f32 %v1989_v53, %v4259_v33  ;;  %v2819_v16 = vpop.f32.mrb[126].mxu1  ;;  %v2901_v12 = vpop.f32.mrb[126].mxu0 }
 0x1f4   : > { %v2178_v60 = vadd.f32 %v2177_v18, %v2147_v47  ;;  %2082 = vst [vmem:[%s4283_s30 + $0x70] sm:$0xff] %v1998_v17  ;;  %v2110_v23 = vadd.f32 %v2109_v10, %v1985_v50  ;;  %v2001_v48 = vadd.f32 %v2901_v12, %v4278_v38  ;;  %v2820_v15 = vpop.f32.mrb[127].mxu1  ;;  %v1992_v49 = vpop.f32.mrb[127].mxu0  ;;  %v2151_v20 = vmul.f32 %v1998_v17, %v1998_v17 }
 0x1f5   : > { %2080 = vst [vmem:[%s4283_s30 + $0x60] sm:$0xff] %v1990_v56  ;;  %v2149_v57 = vmul.f32 %v1990_v56, %v1990_v56  ;;  %v2821_v34 = vadd.f32 %v2820_v15, %v2819_v16  ;;  %v1993_v37 = vadd.f32 %v1992_v49, %v4265_v52  ;;  %v1869_v7 = vadd.f32 %v2818_v61, %v4220_v46 }
 0x1f6   : > { %v2111_v33 = vadd.f32 %v2110_v23, %v1990_v56  ;;  %v2179_v27 = vadd.f32 %v2178_v60, %v2148_v8  ;;  %2083 = vst [vmem:[%s4283_s30 + $0x78] sm:$0xff] %v2001_v48 }
 0x1f7   : > { %2081 = vst [vmem:[%s4283_s30 + $0x68] sm:$0xff] %v1993_v37  ;;  %v2150_v31 = vmul.f32 %v1993_v37, %v1993_v37  ;;  %v1872_v9 = vadd.f32 %v2821_v34, %v4226_v55  ;;  %v2152_v55 = vmul.f32 %v2001_v48, %v2001_v48 }
 0x1f8   : > { %v2180_v63 = vadd.f32 %v2179_v27, %v2149_v57  ;;  %v2112_v43 = vadd.f32 %v2111_v33, %v1993_v37 }
 0x1f9   : > { %v2822_v38 = vpop.f32.mrb[128].mxu1  ;;  %v2904_v13 = vpop.f32.mrb[128].mxu0 }
 0x1fa   : > { %v2113_v2 = vadd.f32 %v2112_v43, %v1998_v17  ;;  %v2181_v0 = vadd.f32 %v2180_v63, %v2150_v31  ;;  %v2014_v52 = vadd.f32 %v2904_v13, %v4307_v14  ;;  %v2823_v54 = vpop.f32.mrb[129].mxu1  ;;  %v2005_v46 = vpop.f32.mrb[129].mxu0 }
 0x1fb   : > { %v2824_v59 = vadd.f32 %v2823_v54, %v2822_v38  ;;  %v2006_v25 = vadd.f32 %v2005_v46, %v4292_v40  ;;  %v2825_v50 = vpop.f32.mrb[130].mxu1  ;;  %v2905_v6 = vpop.f32.mrb[130].mxu0 }
 0x1fc   : > { %v2182_v3 = vadd.f32 %v2181_v0, %v2151_v20  ;;  %2086 = vst [vmem:[%s4283_s30 + $0x90] sm:$0xff] %v2014_v52  ;;  %v2114_v45 = vadd.f32 %v2113_v2, %v2001_v48  ;;  %v2017_v28 = vadd.f32 %v2905_v6, %v4310_v51  ;;  %v2826_v58 = vpop.f32.mrb[131].mxu1  ;;  %v2008_v1 = vpop.f32.mrb[131].mxu0  ;;  %v2155_v17 = vmul.f32 %v2014_v52, %v2014_v52 }
 0x1fd   : > { %2084 = vst [vmem:[%s4283_s30 + $0x80] sm:$0xff] %v2006_v25  ;;  %v2153_v44 = vmul.f32 %v2006_v25, %v2006_v25  ;;  %v2827_v14 = vadd.f32 %v2826_v58, %v2825_v50  ;;  %v2009_v30 = vadd.f32 %v2008_v1, %v4297_v39  ;;  %v1877_v42 = vadd.f32 %v2824_v59, %v4232_v5 }
 0x1fe   : > { %v2115_v40 = vadd.f32 %v2114_v45, %v2006_v25  ;;  %v2183_v35 = vadd.f32 %v2182_v3, %v2152_v55  ;;  %2087 = vst [vmem:[%s4283_s30 + $0x98] sm:$0xff] %v2017_v28 }
 0x1ff   : > { %2085 = vst [vmem:[%s4283_s30 + $0x88] sm:$0xff] %v2009_v30  ;;  %v2154_v32 = vmul.f32 %v2009_v30, %v2009_v30  ;;  %v1880_v62 = vadd.f32 %v2827_v14, %v4238_v29  ;;  %v2156_v29 = vmul.f32 %v2017_v28, %v2017_v28 }
 0x200   : > { %v2184_v47 = vadd.f32 %v2183_v35, %v2153_v44  ;;  %v2116_v10 = vadd.f32 %v2115_v40, %v2009_v30 }
 0x201   : > { %v2828_v51 = vpop.f32.mrb[132].mxu1  ;;  %v2908_v18 = vpop.f32.mrb[132].mxu0 }
 0x202   : > { %v2117_v36 = vadd.f32 %v2116_v10, %v2014_v52  ;;  %v2185_v53 = vadd.f32 %v2184_v47, %v2154_v32  ;;  %v2030_v61 = vadd.f32 %v2908_v18, %v1869_v7  ;;  %v2829_v39 = vpop.f32.mrb[133].mxu1  ;;  %v2021_v56 = vpop.f32.mrb[133].mxu0 }
 0x203   : > { %v2830_v5 = vadd.f32 %v2829_v39, %v2828_v51  ;;  %v2022_v16 = vadd.f32 %v2021_v56, %v4320_v4  ;;  %v2831_v12 = vpop.f32.mrb[134].mxu1  ;;  %v2909_v8 = vpop.f32.mrb[134].mxu0 }
 0x204   : > { %v2186_v60 = vadd.f32 %v2185_v53, %v2155_v17  ;;  %2090 = vst [vmem:[%s4283_s30 + $0xb0] sm:$0xff] %v2030_v61  ;;  %v2118_v23 = vadd.f32 %v2117_v36, %v2017_v28  ;;  %v2033_v48 = vadd.f32 %v2909_v8, %v1872_v9  ;;  %v2832_v15 = vpop.f32.mrb[135].mxu1  ;;  %v2024_v49 = vpop.f32.mrb[135].mxu0  ;;  %v2159_v13 = vmul.f32 %v2030_v61, %v2030_v61 }
 0x205   : > { %2088 = vst [vmem:[%s4283_s30 + $0xa0] sm:$0xff] %v2022_v16  ;;  %v2157_v57 = vmul.f32 %v2022_v16, %v2022_v16  ;;  %v2833_v34 = vadd.f32 %v2832_v15, %v2831_v12  ;;  %v2025_v37 = vadd.f32 %v2024_v49, %v4325_v24  ;;  %v1885_v7 = vadd.f32 %v2830_v5, %v4244_v19 }
 0x206   : > { %v2119_v33 = vadd.f32 %v2118_v23, %v2022_v16  ;;  %v2187_v4 = vadd.f32 %v2186_v60, %v2156_v29  ;;  %2091 = vst [vmem:[%s4283_s30 + $0xb8] sm:$0xff] %v2033_v48  ;;  %v2160_v25 = vmul.f32 %v2033_v48, %v2033_v48 }
 0x207   : > { %2089 = vst [vmem:[%s4283_s30 + $0xa8] sm:$0xff] %v2025_v37  ;;  %v2158_v27 = vmul.f32 %v2025_v37, %v2025_v37  ;;  %v1888_v31 = vadd.f32 %v2833_v34, %v4250_v41 }
 0x208   : > { %v2188_v63 = vadd.f32 %v2187_v4, %v2157_v57  ;;  %v2120_v43 = vadd.f32 %v2119_v33, %v2025_v37 }
 0x209   : > { %v2834_v9 = vpop.f32.mrb[136].mxu1  ;;  %v2912_v38 = vpop.f32.mrb[136].mxu0 }
 0x20a   : > { %v2121_v20 = vadd.f32 %v2120_v43, %v2030_v61  ;;  %v2189_v2 = vadd.f32 %v2188_v63, %v2158_v27  ;;  %v2046_v0 = vadd.f32 %v2912_v38, %v1885_v7  ;;  %v2835_v24 = vpop.f32.mrb[137].mxu1  ;;  %v2037_v52 = vpop.f32.mrb[137].mxu0 }
 0x20b   : > { %v2836_v19 = vadd.f32 %v2835_v24, %v2834_v9  ;;  %v2038_v54 = vadd.f32 %v2037_v52, %v1877_v42  ;;  %v2837_v46 = vpop.f32.mrb[138].mxu1  ;;  %v2913_v59 = vpop.f32.mrb[138].mxu0 }
 0x20c   : > { %v2190_v41 = vadd.f32 %v2189_v2, %v2159_v13  ;;  %2094 = vst [vmem:[%s4283_s30 + $0xd0] sm:$0xff] %v2046_v0  ;;  %v2122_v50 = vadd.f32 %v2121_v20, %v2033_v48  ;;  %v2049_v6 = vadd.f32 %v2913_v59, %v1888_v31  ;;  %v2838_v55 = vpop.f32.mrb[139].mxu1  ;;  %v2040_v3 = vpop.f32.mrb[139].mxu0  ;;  %v2163_v10 = vmul.f32 %v2046_v0, %v2046_v0 }
 0x20d   : > { %2092 = vst [vmem:[%s4283_s30 + $0xc0] sm:$0xff] %v2038_v54  ;;  %v2161_v45 = vmul.f32 %v2038_v54, %v2038_v54  ;;  %v2839_v28 = vadd.f32 %v2838_v55, %v2837_v46  ;;  %v2041_v58 = vadd.f32 %v2040_v3, %v1880_v62  ;;  %v1893_v1 = vadd.f32 %v2836_v19, %v4256_v26 }
 0x20e   : > { %v2123_v44 = vadd.f32 %v2122_v50, %v2038_v54  ;;  %v2191_v14 = vadd.f32 %v2190_v41, %v2160_v25  ;;  %2095 = vst [vmem:[%s4283_s30 + $0xd8] sm:$0xff] %v2049_v6  ;;  %v2164_v39 = vmul.f32 %v2049_v6, %v2049_v6 }
 0x20f   : > { %2093 = vst [vmem:[%s4283_s30 + $0xc8] sm:$0xff] %v2041_v58  ;;  %v2162_v30 = vmul.f32 %v2041_v58, %v2041_v58  ;;  %v1896_v42 = vadd.f32 %v2839_v28, %v4262_v21 }
 0x210   : > { %v2192_v40 = vadd.f32 %v2191_v14, %v2161_v45  ;;  %v2124_v35 = vadd.f32 %v2123_v44, %v2041_v58 }
 0x211   : > { %v2840_v32 = vpop.f32.mrb[140].mxu1  ;;  %v2916_v47 = vpop.f32.mrb[140].mxu0 }
 0x212   : > { %v2125_v51 = vadd.f32 %v2124_v35, %v2046_v0  ;;  %v2193_v18 = vadd.f32 %v2192_v40, %v2162_v30  ;;  %v2841_v17 = vpop.f32.mrb[141].mxu1  ;;  %v2053_v36 = vpop.f32.mrb[141].mxu0 }
 0x213   : > { %v2842_v62 = vadd.f32 %v2841_v17, %v2840_v32  ;;  %v2054_v53 = vadd.f32 %v2053_v36, %v1893_v1  ;;  %v2843_v26 = vpop.f32.mrb[142].mxu1  ;;  %v2917_v61 = vpop.f32.mrb[142].mxu0 }
 0x214   : > { %v2194_v56 = vadd.f32 %v2193_v18, %v2163_v10  ;;  %v2126_v5 = vadd.f32 %v2125_v51, %v2049_v6  ;;  %v2844_v21 = vpop.f32.mrb[143].mxu1  ;;  %v2056_v16 = vpop.f32.mrb[143].mxu0 }
 0x215   : > { %v1901_v12 = vadd.f32 %v2842_v62, %v4268_v22  ;;  %2096 = vst [vmem:[%s4283_s30 + $0xe0] sm:$0xff] %v2054_v53  ;;  %v2165_v8 = vmul.f32 %v2054_v53, %v2054_v53  ;;  %v2845_v29 = vadd.f32 %v2844_v21, %v2843_v26  ;;  %v2057_v60 = vadd.f32 %v2056_v16, %v1896_v42 }
 0x216   : > { %v2127_v23 = vadd.f32 %v2126_v5, %v2054_v53  ;;  %v2195_v48 = vadd.f32 %v2194_v56, %v2164_v39 }
 0x217   : > { %v2062_v15 = vadd.f32 %v2916_v47, %v1901_v12  ;;  %v1904_v49 = vadd.f32 %v2845_v29, %v4275_v11  ;;  %2097 = vst [vmem:[%s4283_s30 + $0xe8] sm:$0xff] %v2057_v60  ;;  %v2166_v57 = vmul.f32 %v2057_v60, %v2057_v60 }
 0x218   : > { %v2196_v34 = vadd.f32 %v2195_v48, %v2165_v8  ;;  %v2128_v37 = vadd.f32 %v2127_v23, %v2057_v60 }
 0x219   : > { %2098 = vst [vmem:[%s4283_s30 + $0xf0] sm:$0xff] %v2062_v15  ;;  %v2167_v7 = vmul.f32 %v2062_v15, %v2062_v15  ;;  %v2065_v33 = vadd.f32 %v2917_v61, %v1904_v49 }
 0x21a   : > { %v2129_v4 = vadd.f32 %v2128_v37, %v2062_v15  ;;  %v2197_v22 = vadd.f32 %v2196_v34, %v2166_v57 }
 0x21b   : > { %2099 = vst [vmem:[%s4283_s30 + $0xf8] sm:$0xff] %v2065_v33  ;;  %v2168_v27 = vmul.f32 %v2065_v33, %v2065_v33 }
 0x21c   : > { %v2130_v31 = vadd.f32 %v2129_v4, %v2065_v33  ;;  %v2198_v63 = vadd.f32 %v2197_v22, %v2167_v7 }
 0x21e   : > { %v2131_v43 = vrot.slane %v2130_v31, 4  ;;  %v2199_v9 = vadd.f32 %v2198_v63, %v2168_v27 }
 0x220   : > { %v2132_v38 = vadd.f32 %v2131_v43, %v2130_v31  ;;  %v2200_v13 = vrot.slane %v2199_v9, 4 }
 0x222   : > { %v2133_v20 = vrot.slane %v2132_v38, 2  ;;  %v2201_v11 = vadd.f32 %v2200_v13, %v2199_v9 }
 0x224   : > { %v2134_v2 = vadd.f32 %v2133_v20, %v2132_v38  ;;  %v2202_v0 = vrot.slane %v2201_v11, 2 }
 0x226   : > { %v2135_v24 = vrot.slane %v2134_v2, 1  ;;  %v2203_v52 = vadd.f32 %v2202_v0, %v2201_v11 }
 0x228   : > { %v2204_v19 = vrot.slane %v2203_v52, 1  ;;  %v2136_v54 = vadd.f32 %v2135_v24, %v2134_v2 }
 0x22a   : > { %v2205_v46 = vadd.f32 %v2204_v19, %v2203_v52 }
 0x22c   : > { %v2207_v59 = vsel %vm2206_vm2, %v2136_v54, %v2205_v46 }
 0x22d   : > { %2208 = vst [vmem:[%s208_s8] sm:$0x3] %v2207_v59 }
 0x22e PF: > { %s15_s15 = sadd.s32 1, %s3057_s15  }
 0x22f   : > { %p12_p4 = scmp.ge.s32.totalorder %s15_s15, 4  }
 0x231   :  { %14 = sbr.rel (!%p12_p4) target bundleno = 1 (0x1), region = 74 }

// kernel: double_conv2d_forward.4
= control target key start
LH: loop header
LB: loop body
LE: loop exit
PB: predicated region body
PF: predicated region fallthrough
CT: control target
= control target key end

     0   :  { %s3452_s21 = smov 0   ;;  %s5007_s0 = inlined_call_operand.vmem [shape: f32[2,18,18,128], index: 0, kind: input, shape index: {}]   ;;  %s5008_s1 = inlined_call_operand.vmem [shape: f32[1,128], index: 1, kind: input, shape index: {}]   ;;  %s5009_s2 = inlined_call_operand.vmem [shape: f32[1,128], index: 2, kind: input, shape index: {}]   ;;  %s5010_s3 = inlined_call_operand.vmem [shape: bf16[1152,128], index: 3, kind: input, shape index: {}]   ;;  %s5011_s4 = inlined_call_operand.vmem [shape: f32[1,128], index: 4, kind: input, shape index: {}]   ;;  %s5012_s5 = inlined_call_operand.vmem [shape: f32[2,16,16,128], index: 5, kind: output, shape index: {0}]   ;;  %s5013_s6 = inlined_call_operand.vmem [shape: f32[2,2,128], index: 6, kind: output, shape index: {1}]  }
   0x1 LB: > { %s2559_s22 = sadd.s32 4294967295, %s3412_s21   ;;  %p2563_p0 = scmp.ge.s32.totalorder %s3412_s21, 1  ;;  %s3412_s21 = sphi %s3452_s21, %s17_s21  }
   0x2   : > { %p215_p1 = scmp.lt.s32.totalorder %s3412_s21, 3 }
   0x4   : > { %p216_p2 = pnand %p2563_p0, %p215_p1 }
   0x6   : > { %219 = sbr.rel (%p216_p2) target bundleno = 566 (0x236), region = 40 }
   0xd   : > { %v3332_v0 = vld [vmem:[%s5010_s3 + $0x40] sm:$0xff]   ;;  %v3414_v2 = vmov 0.0   ;;  %v3334_v4 = vld [vmem:[%s5010_s3 + $0x48] sm:$0xff]   ;;  %p249_p3 = scmp.lt.s32.totalorder %s2559_s22, 1  ;;  %v3336_v7 = vld [vmem:[%s5010_s3 + $0x50] sm:$0xff]   ;;  %v494_v10 = vlaneseq  ;;  %vm646_vm2 = vcmask 1046528  }
   0xe   : > { %v3333_v1 = vld [vmem:[%s5010_s3] sm:$0xff]   ;;  %v647_v3 = vrot.slane %v3414_v2, 1  ;;  %2784 = vmatprep.subr.bf16.mxu0 %v3332_v0  ;;  %3304 = vmatprep.subr.bf16.mxu1 %v3332_v0  ;;  %v3335_v5 = vld [vmem:[%s5010_s3 + $0x8] sm:$0xff]   ;;  %v3337_v8 = vld [vmem:[%s5010_s3 + $0x10] sm:$0xff]   ;;  %vm3415_vm3 = vmmov 1   ;;  %vm775_vm5 = vcmask 1045504  }
   0xf   : > { %2785 = vmatpush3.bf16.msra.mxu0 %v3333_v1  ;;  %3312 = vmatpush3.bf16.msra.mxu1 %v3333_v1  ;;  %s5098_s22 = smov (!%p249_p3, %s2559_s22), 1  ;;  %v3338_v9 = vld [vmem:[%s5010_s3 + $0x58] sm:$0xff]   ;;  %v3340_v12 = vld [vmem:[%s5010_s3 + $0x60] sm:$0xff]   ;;  %v3499_v13 = vshrl.u32 %v494_v10, 7  ;;  %v3342_v15 = vld [vmem:[%s5010_s3 + $0x68] sm:$0xff]   ;;  %vm2470_vm6 = vcmask 1040384  }
  0x10   : > { %v3473_v6 = vpack.c.bf16 %v647_v3, %v647_v3  ;;  %2786 = vmatprep.subr.bf16.mxu0 %v3334_v4  ;;  %3305 = vmatprep.subr.bf16.mxu1 %v3334_v4  ;;  %s3320_s13 = smul.u32 432, %s5098_s22  ;;  %v3339_v11 = vld [vmem:[%s5010_s3 + $0x18] sm:$0xff]   ;;  %v3341_v14 = vld [vmem:[%s5010_s3 + $0x20] sm:$0xff]   ;;  %v3343_v25 = vld [vmem:[%s5010_s3 + $0x28] sm:$0xff]   ;;  %s2783_s8 = sshll.u32 %s5098_s22, 8 }
  0x11   : > { %v3513_v19 = vld [vmem:[%s5008_s1] ss:$0 sm:$0xff]  ;;  %v3521_v21 = vadd.s32 16, %v3499_v13  ;;  %v3344_v26 = vld [vmem:[%s5010_s3 + $0x70] sm:$0xff]   ;;  %vm498_vm0 = vcmp.ge.s32.totalorder %v3499_v13, 1  ;;  %v3346_v34 = vld [vmem:[%s5010_s3 + $0x78] sm:$0xff]   ;;  %s4916_s11 = scalar_lea.vmem %s5012_s5, %s2783_s8 }
  0x12   : > { %5049 = vst [vmem:[#allocation2_spill] sm:$0xff] %v3473_v6  ;;  %1559 = vmatprep.mubr.bf16.mxu0 %v3473_v6  ;;  %s3497_s20 = scalar_lea.vmem %s5007_s0, %s3320_s13  ;;  %v3518_v20 = vld [vmem:[%s5009_s2] ss:$0 sm:$0xff]  ;;  %v3345_v30 = vld [vmem:[%s5010_s3 + $0x30] sm:$0xff]   ;;  %v3347_v40 = vld [vmem:[%s5010_s3 + $0x38] sm:$0xff]   ;;  %s2567_s12 = sshll.u32 %s5098_s22, 1 }
  0x13   : > { %2787 = vmatpush3.bf16.msra.mxu0 %v3335_v5  ;;  %3313 = vmatpush3.bf16.msra.mxu1 %v3335_v5  ;;  %v300_v16 = vld [vmem:[%s3497_s20 + $0x120] sm:$0xff]  ;;  %v301_v17 = vld [vmem:[%s3497_s20 + $0x128] sm:$0xff]  ;;  %v302_v18 = vld [vmem:[%s3497_s20 + $0x130] sm:$0x3]  ;;  %vm509_vm1 = vcmp.le.s32.totalorder %v3521_v21, 16  ;;  %s262_s15 = scalar_lea.vmem %s5013_s6, %s2567_s12 }
  0x14   : > { %2788 = vmatprep.subr.bf16.mxu0 %v3336_v7  ;;  %3306 = vmatprep.subr.bf16.mxu1 %v3336_v7  ;;  %v361_v22 = vmul.f32 %v3513_v19, %v300_v16  ;;  %v362_v23 = vmul.f32 %v3513_v19, %v301_v17  ;;  %v363_v24 = vmul.f32 %v3513_v19, %v302_v18  ;;  %v267_v38 = vld [vmem:[%s3497_s20 + $0x18] sm:$0xff]  ;;  %v268_v39 = vld [vmem:[%s3497_s20 + $0x20] sm:$0xff]  ;;  %v269_v43 = vld [vmem:[%s3497_s20 + $0x28] sm:$0x3] }
  0x15   : > { %v328_v44 = vmul.f32 %v3513_v19, %v267_v38  ;;  %v329_v45 = vmul.f32 %v3513_v19, %v268_v39  ;;  %v303_v46 = vld [vmem:[%s3497_s20 + $0x138] sm:$0xff]  ;;  %v304_v47 = vld [vmem:[%s3497_s20 + $0x140] sm:$0xff]  ;;  %v330_v48 = vmul.f32 %v3513_v19, %v269_v43  ;;  %v305_v49 = vld [vmem:[%s3497_s20 + $0x148] sm:$0x3] }
  0x16   : > { %v422_v27 = vadd.f32 %v3518_v20, %v361_v22  ;;  %v423_v28 = vadd.f32 %v3518_v20, %v362_v23  ;;  %v424_v29 = vadd.f32 %v3518_v20, %v363_v24  ;;  %v364_v50 = vmul.f32 %v3513_v19, %v303_v46  ;;  %v3348_v54 = vld [vmem:[%s5010_s3 + $0xc0] sm:$0xff]   ;;  %v3352_v4 = vld [vmem:[%s5010_s3 + $0xc8] sm:$0xff]   ;;  %vm3603_vm4 = vmpackc.low %vm3415_vm3, %vm498_vm0 }
  0x17   : > { %2789 = vmatpush3.bf16.msra.mxu0 %v3337_v8  ;;  %3314 = vmatpush3.bf16.msra.mxu1 %v3337_v8  ;;  %v365_v51 = vmul.f32 %v3513_v19, %v304_v47  ;;  %v389_v55 = vadd.f32 %v3518_v20, %v328_v44  ;;  %v3349_v57 = vld [vmem:[%s5010_s3 + $0x140] sm:$0xff]   ;;  %v390_v58 = vadd.f32 %v3518_v20, %v329_v45  ;;  %v270_v18 = vld [vmem:[%s3497_s20 + $0x30] sm:$0xff]  ;;  %v3353_v22 = vld [vmem:[%s5010_s3 + $0x88] sm:$0xff]  }
  0x18   : > { %2790 = vmatprep.subr.bf16.mxu0 %v3338_v9  ;;  %3307 = vmatprep.subr.bf16.mxu1 %v3338_v9  ;;  %v476_v31 = vmax.f32 %v422_v27, 0.0  ;;  %v3540_v32 = vmax.f32 %v423_v28, 0.0  ;;  %v478_v33 = vmax.f32 %v424_v29, 0.0  ;;  %v391_v59 = vadd.f32 %v3518_v20, %v330_v48  ;;  %v3350_v60 = vld [vmem:[%s5010_s3 + $0x80] sm:$0xff]   ;;  %v3359_v27 = vld [vmem:[%s5010_s3 + $0x108] sm:$0xff]   ;;  %v306_v38 = vld [vmem:[%s3497_s20 + $0x150] sm:$0xff] }
  0x19   : > { %v443_v61 = vmax.f32 %v389_v55, 0.0  ;;  %v366_v62 = vmul.f32 %v3513_v19, %v305_v49  ;;  %v425_v63 = vadd.f32 %v3518_v20, %v364_v50  ;;  %v426_v0 = vadd.f32 %v3518_v20, %v365_v51  ;;  %v3351_v3 = vld [vmem:[%s5010_s3 + $0x100] sm:$0xff]   ;;  %v307_v43 = vld [vmem:[%s3497_s20 + $0x158] sm:$0xff]  ;;  %v3354_v48 = vld [vmem:[%s5010_s3 + $0xd0] sm:$0xff]  }
  0x1a   : > { %v3547_v35 = vsel %vm498_vm0, %v476_v31, 0.0  ;;  %v3551_v36 = vsel %vm509_vm1, %v478_v33, 0.0  ;;  %v708_v37 = vrot.slane %v3540_v32, 1  ;;  %v3591_v1 = vpack.c.bf16 %v3540_v32, %v476_v31  ;;  %v271_v33 = vld [vmem:[%s3497_s20 + $0x38] sm:$0xff]  ;;  %v308_v44 = vld [vmem:[%s3497_s20 + $0x160] sm:$0x3] }
  0x1b   : > { %2791 = vmatpush3.bf16.msra.mxu0 %v3339_v11  ;;  %3315 = vmatpush3.bf16.msra.mxu1 %v3339_v11  ;;  %v707_v41 = vrot.slane %v3547_v35, 1  ;;  %v710_v42 = vrot.slane %v3551_v36, 1  ;;  %v3599_v5 = vmax.f32 %v390_v58, 0.0  ;;  %v445_v7 = vmax.f32 %v391_v59, 0.0 }
  0x1c   : > { %2792 = vmatprep.subr.bf16.mxu0 %v3340_v12  ;;  %3308 = vmatprep.subr.bf16.mxu1 %v3340_v12  ;;  %v3609_v9 = vsel %vm498_vm0, %v443_v61, 0.0  ;;  %v427_v10 = vadd.f32 %v3518_v20, %v366_v62  ;;  %v479_v11 = vmax.f32 %v425_v63, 0.0  ;;  %v3612_v12 = vmax.f32 %v426_v0, 0.0  ;;  %v273_v0 = vld [vmem:[%s3497_s20 + $0x48] sm:$0xff] }
  0x1d   : > { %v709_v52 = vsel %vm646_vm2, %v707_v41, %v708_v37  ;;  %v711_v53 = vsel %vm646_vm2, %v708_v37, %v710_v42  ;;  %v652_v16 = vrot.slane %v3609_v9, 1  ;;  %v653_v17 = vrot.slane %v3599_v5, 1 }
  0x1e   : > { %v3576_v56 = vpack.c.bf16 %v711_v53, %v709_v52  ;;  %5053 = vst [vmem:[#allocation4_spill] sm:$0xff] %v3612_v12  ;;  %v481_v24 = vmax.f32 %v427_v10, 0.0  ;;  %v5014_v28 = vmov 0.0|0.0   ;;  %v3643_v31 = vpack.c.bf16 %v3599_v5, %v443_v61 }
  0x1f   : > { %2793 = vmatpush3.bf16.msra.mxu0 %v3341_v14  ;;  %3316 = vmatpush3.bf16.msra.mxu1 %v3341_v14  ;;  %v3357_v14 = vld [vmem:[%s5010_s3 + $0x148] sm:$0xff]   ;;  %v654_v29 = vsel %vm646_vm2, %v652_v16, %v653_v17  ;;  %v331_v37 = vmul.f32 %v3513_v19, %v270_v18  ;;  %v332_v41 = vmul.f32 %v3513_v19, %v271_v33 }
  0x20   : > { %2794 = vmatprep.subr.bf16.mxu0 %v3342_v15  ;;  %3309 = vmatprep.subr.bf16.mxu1 %v3342_v15  ;;  %5050 = vst [vmem:[#allocation3_spill] sm:$0xff] %v3576_v56  ;;  %v3619_v15 = vsel %vm509_vm1, %v445_v7, 0.0  ;;  %v367_v52 = vmul.f32 %v3513_v19, %v306_v38  ;;  %v368_v53 = vmul.f32 %v3513_v19, %v307_v43  ;;  %v3365_v38 = vld [vmem:[%s5010_s3 + $0x150] sm:$0xff]  }
  0x21   : > { %1655 = vmatprep.mubr.bf16.mxu1 %v3576_v56  ;;  %v655_v23 = vrot.slane %v3619_v15, 1  ;;  %v392_v49 = vadd.f32 %v3518_v20, %v331_v37  ;;  %v393_v50 = vadd.f32 %v3518_v20, %v332_v41  ;;  %v3673_v55 = vpack.c.bf16 %v3612_v12, %v479_v11  ;;  %v311_v37 = vld [vmem:[%s3497_s20 + $0x178] sm:$0x3] }
  0x22   : > { %v369_v58 = vmul.f32 %v3513_v19, %v308_v44  ;;  %v428_v63 = vadd.f32 %v3518_v20, %v367_v52  ;;  %v429_v7 = vadd.f32 %v3518_v20, %v368_v53  ;;  %v334_v16 = vmul.f32 %v3513_v19, %v273_v0  ;;  %v310_v44 = vld [vmem:[%s3497_s20 + $0x170] sm:$0xff] }
  0x23   : > { %2795 = vmatpush3.bf16.msra.mxu0 %v3343_v25  ;;  %3317 = vmatpush3.bf16.msra.mxu1 %v3343_v25  ;;  %v3630_v25 = vsel %vm498_vm0, %v479_v11, 0.0  ;;  %v656_v39 = vsel %vm646_vm2, %v653_v17, %v655_v23  ;;  %v3681_v61 = vmax.f32 %v393_v50, 0.0  ;;  %v274_v11 = vld [vmem:[%s3497_s20 + $0x50] sm:$0xff]  ;;  %v3358_v17 = vld [vmem:[%s5010_s3 + $0x98] sm:$0xff]  }
  0x24   : > { %2796 = vmatprep.subr.bf16.mxu0 %v3344_v26  ;;  %3310 = vmatprep.subr.bf16.mxu1 %v3344_v26  ;;  %5054 = vst [vmem:[#allocation5_spill] sm:$0xff] %v3630_v25  ;;  %v713_v26 = vrot.slane %v3612_v12, 1  ;;  %v3658_v45 = vpack.c.bf16 %v656_v39, %v654_v29  ;;  %v430_v10 = vadd.f32 %v3518_v20, %v369_v58  ;;  %v3715_v29 = vmax.f32 %v429_v7, 0.0  ;;  %v3367_v50 = vld [vmem:[%s5010_s3 + $0x110] sm:$0xff]   ;;  %v3361_v58 = vld [vmem:[%s5010_s3 + $0xa0] sm:$0xff]  }
  0x25   : > { %v658_v23 = vrot.slane %v3681_v61, 1 }
  0x26   : > { %5057 = vst [vmem:[#allocation8_spill] sm:$0xff] %v3715_v29 }
  0x27   : > { %2797 = vmatpush3.bf16.msra.mxu0 %v3345_v30  ;;  %3318 = vmatpush3.bf16.msra.mxu1 %v3345_v30  ;;  %v712_v30 = vrot.slane %v3630_v25, 1 }
  0x28   : > { %2798 = vmatprep.subr.bf16.mxu0 %v3346_v34  ;;  %3311 = vmatprep.subr.bf16.mxu1 %v3346_v34  ;;  %v272_v34 = vld [vmem:[%s3497_s20 + $0x40] sm:$0x3] }
  0x29   : > { %v333_v42 = vmul.f32 %v3513_v19, %v272_v34  ;;  %v714_v46 = vsel %vm646_vm2, %v712_v30, %v713_v26  ;;  %v484_v30 = vmax.f32 %v430_v10, 0.0  ;;  %v3360_v34 = vld [vmem:[%s5010_s3 + $0xe0] sm:$0xff]   ;;  %v371_v10 = vmul.f32 %v3513_v19, %v310_v44 }
  0x2b   : > { %2799 = vmatpush3.bf16.msra.mxu0 %v3347_v40  ;;  %3319 = vmatpush3.bf16.msra.mxu1 %v3347_v40  ;;  %v3652_v40 = vsel %vm509_vm1, %v481_v24, 0.0  ;;  %v394_v51 = vadd.f32 %v3518_v20, %v333_v42  ;;  %v482_v24 = vmax.f32 %v428_v63, 0.0  ;;  %v335_v42 = vmul.f32 %v3513_v19, %v274_v11 }
  0x2c   : > { %2896 = vmatprep.subr.bf16.mxu1 %v3348_v54  ;;  %3008 = vmatprep.subr.bf16.mxu0 %v3349_v57  ;;  %5055 = vst [vmem:[#allocation6_spill] sm:$0xff] %v3652_v40  ;;  %v715_v47 = vrot.slane %v3652_v40, 1  ;;  %v446_v57 = vmax.f32 %v392_v49, 0.0  ;;  %v718_v49 = vrot.slane %v3715_v29, 1  ;;  %v372_v11 = vmul.f32 %v3513_v19, %v311_v37  ;;  %v277_v37 = vld [vmem:[%s3497_s20 + $0x68] sm:$0xff] }
  0x2d   : > { %v448_v62 = vmax.f32 %v394_v51, 0.0  ;;  %v3730_v41 = vsel %vm498_vm0, %v482_v24, 0.0  ;;  %v3749_v53 = vpack.c.bf16 %v3715_v29, %v482_v24  ;;  %v290_v29 = vld [vmem:[%s3497_s20 + $0xd0] sm:$0x3] }
  0x2e   : > { %1560 = vmatmul.mubr.bf16.vlgmr.msra.gmra.mrb[0].mxu0 %v5014_v28  ;;  %2678 = vmatmul.mubr.msk.bf16.vlgmr.msra.gmra.mrb[0].mxu1 %vm3603_vm4, %v3591_v1  ;;  %v716_v54 = vsel %vm646_vm2, %v713_v26, %v715_v47  ;;  %v309_v26 = vld [vmem:[%s3497_s20 + $0x168] sm:$0xff]  ;;  %v3718_v33 = vpack.c.bf16 %v3681_v61, %v446_v57  ;;  %5059 = vst [vmem:[#allocation10_spill] sm:$0xff] %v3730_v41  ;;  %v3738_v47 = vsel %vm509_vm1, %v484_v30, 0.0  ;;  %v276_v30 = vld [vmem:[%s3497_s20 + $0x60] sm:$0xff] }
  0x2f   : > { %2897 = vmatpush3.bf16.msra.mxu1 %v3350_v60  ;;  %3009 = vmatpush3.bf16.msra.mxu0 %v3351_v3  ;;  %v3676_v59 = vpack.c.bf16 %v716_v54, %v714_v46  ;;  %v3355_v60 = vld [vmem:[%s5010_s3 + $0x90] sm:$0xff]   ;;  %v3356_v3 = vld [vmem:[%s5010_s3 + $0xd8] sm:$0xff]   ;;  %v3703_v18 = vsel %vm509_vm1, %v448_v62, 0.0  ;;  %5060 = vst [vmem:[#allocation11_spill] sm:$0xff] %v3738_v47  ;;  %v720_v52 = vrot.slane %v3738_v47, 1  ;;  %5061 = vst [vmem:[#allocation12_spill] sm:$0xff] %v3749_v53 }
  0x30   : > { %2898 = vmatprep.subr.bf16.mxu1 %v3352_v4  ;;  %3010 = vmatprep.subr.bf16.mxu0 %v3357_v14  ;;  %v3690_v4 = vsel %vm498_vm0, %v446_v57, 0.0  ;;  %v275_v14 = vld [vmem:[%s3497_s20 + $0x58] sm:$0x3]  ;;  %5058 = vst [vmem:[#allocation9_spill] sm:$0xff] %v3718_v33  ;;  %v395_v54 = vadd.f32 %v3518_v20, %v334_v16  ;;  %v370_v63 = vmul.f32 %v3513_v19, %v309_v26 }
  0x31   : > { %1567 = vmatprep.mubr.bf16.mxu0 %v3658_v45  ;;  %5056 = vst [vmem:[#allocation7_spill] sm:$0xff] %v3676_v59  ;;  %1663 = vmatprep.mubr.bf16.mxu1 %v3676_v59  ;;  %v336_v43 = vmul.f32 %v3513_v19, %v275_v14  ;;  %v721_v0 = vsel %vm646_vm2, %v718_v49, %v720_v52  ;;  %v3364_v52 = vld [vmem:[%s5010_s3 + $0xf0] sm:$0xff]   ;;  %v287_v59 = vld [vmem:[%s3497_s20 + $0xb8] sm:$0x3] }
  0x32   : > { %v449_v7 = vmax.f32 %v395_v54, 0.0  ;;  %v432_v26 = vadd.f32 %v3518_v20, %v371_v10  ;;  %v337_v54 = vmul.f32 %v3513_v19, %v276_v30 }
  0x33   : > { %2899 = vmatpush3.bf16.msra.mxu1 %v3353_v22  ;;  %3011 = vmatpush3.bf16.msra.mxu0 %v3359_v27  ;;  %v657_v22 = vrot.slane %v3690_v4, 1  ;;  %v660_v27 = vrot.slane %v3703_v18, 1  ;;  %v397_v62 = vadd.f32 %v3518_v20, %v336_v43  ;;  %v3363_v43 = vld [vmem:[%s5010_s3 + $0xa8] sm:$0xff]  }
  0x34   : > { %2900 = vmatprep.subr.bf16.mxu1 %v3354_v48  ;;  %v717_v48 = vrot.slane %v3730_v41, 1  ;;  %3012 = vmatprep.subr.bf16.mxu0 %v3365_v38  ;;  %v3776_v24 = vsel %vm498_vm0, %v449_v7, 0.0  ;;  %v278_v38 = vld [vmem:[%s3497_s20 + $0x70] sm:$0x3]  ;;  %v398_v30 = vadd.f32 %v3518_v20, %v337_v54 }
  0x35   : > { %v659_v39 = vsel %vm646_vm2, %v657_v22, %v658_v23  ;;  %v661_v46 = vsel %vm646_vm2, %v658_v23, %v660_v27  ;;  %v431_v22 = vadd.f32 %v3518_v20, %v370_v63  ;;  %v3772_v23 = vrot.slane %v3414_v2, 2 }
  0x36   : > { %2645 = vmatmul.mubr.msk.bf16.gmra.mrb[4].mxu0 %vm3603_vm4, %v3643_v31  ;;  %2681 = vmatmul.mubr.msk.bf16.gmra.mrb[4].mxu1 %vm3603_vm4, %v3673_v55  ;;  %v3745_v51 = vpack.c.bf16 %v661_v46, %v659_v39  ;;  %v719_v57 = vsel %vm646_vm2, %v717_v48, %v718_v49  ;;  %v433_v27 = vadd.f32 %v3518_v20, %v372_v11  ;;  %v3800_v46 = vmax.f32 %v432_v26, 0.0 }
  0x37   : > { %2901 = vmatpush3.bf16.msra.mxu1 %v3355_v60  ;;  %v396_v60 = vadd.f32 %v3518_v20, %v335_v42  ;;  %3013 = vmatpush3.bf16.msra.mxu0 %v3367_v50  ;;  %v3766_v14 = vpack.c.bf16 %v721_v0, %v719_v57  ;;  %v485_v42 = vmax.f32 %v431_v22, 0.0  ;;  %v338_v57 = vmul.f32 %v3513_v19, %v277_v37  ;;  %v3372_v0 = vld [vmem:[%s5010_s3 + $0x158] sm:$0xff]  }
  0x38   : > { %2902 = vmatprep.subr.bf16.mxu1 %v3356_v3  ;;  %1575 = vmatprep.mubr.bf16.mxu0 %v3745_v51  ;;  %v3362_v3 = vld [vmem:[%s5010_s3 + $0xe8] sm:$0xff]   ;;  %v487_v48 = vmax.f32 %v433_v27, 0.0  ;;  %v723_v63 = vrot.slane %v3800_v46, 1  ;;  %v3373_v22 = vld [vmem:[%s5010_s3 + $0x118] sm:$0xff]  }
  0x39   : > { %5062 = vst [vmem:[#allocation13_spill] sm:$0xff] %v3766_v14  ;;  %v3768_v16 = vmax.f32 %v396_v60, 0.0  ;;  %1671 = vmatprep.mubr.bf16.mxu1 %v3766_v14  ;;  %v3805_v50 = vsel %vm498_vm0, %v485_v42, 0.0  ;;  %v3834_v27 = vpack.c.bf16 %v3800_v46, %v485_v42  ;;  %v399_v37 = vadd.f32 %v3518_v20, %v338_v57  ;;  %3014 = vmatprep.subr.bf16.mxu0 %v3372_v0 }
  0x3a   : > { %v452_v57 = vmax.f32 %v398_v30, 0.0 }
  0x3b   : > { %2903 = vmatpush3.bf16.msra.mxu1 %v3358_v17  ;;  %v451_v17 = vmax.f32 %v397_v62, 0.0  ;;  %v663_v39 = vrot.slane %v3768_v16, 1  ;;  %v722_v62 = vrot.slane %v3805_v50, 1  ;;  %v3826_v11 = vpack.c.bf16 %v3768_v16, %v449_v7  ;;  %5064 = vst [vmem:[#allocation15_spill] sm:$0xff] %v3834_v27  ;;  %v280_v7 = vld [vmem:[%s3497_s20 + $0x80] sm:$0xff]  ;;  %3015 = vmatpush3.bf16.msra.mxu0 %v3373_v22 }
  0x3c   : > { %2904 = vmatprep.subr.bf16.mxu1 %v3360_v34  ;;  %v662_v34 = vrot.slane %v3776_v24, 1  ;;  %v3874_v22 = vsel %vm498_vm0, %v452_v57, 0.0 }
  0x3d   : > { %v3789_v2 = vsel %vm509_vm1, %v451_v17, 0.0  ;;  %5063 = vst [vmem:[#allocation14_spill] sm:$0xff] %v3826_v11  ;;  %v339_v17 = vmul.f32 %v3513_v19, %v278_v38  ;;  %v724_v26 = vsel %vm646_vm2, %v722_v62, %v723_v63  ;;  %v341_v62 = vmul.f32 %v3513_v19, %v280_v7  ;;  %v3376_v7 = vld [vmem:[%s5010_s3 + $0x120] sm:$0xff]  }
  0x3e   : > { %2648 = vmatmul.mubr.msk.bf16.gmra.mrb[8].mxu0 %vm3603_vm4, %v3718_v33  ;;  %2684 = vmatmul.mubr.msk.bf16.gmra.mrb[8].mxu1 %vm3603_vm4, %v3749_v53  ;;  %v665_v44 = vrot.slane %v3789_v2, 1  ;;  %v664_v49 = vsel %vm646_vm2, %v662_v34, %v663_v39  ;;  %v279_v34 = vld [vmem:[%s3497_s20 + $0x78] sm:$0xff]  ;;  %v293_v53 = vld [vmem:[%s3497_s20 + $0xe8] sm:$0x3] }
  0x3f   : > { %2905 = vmatpush3.bf16.msra.mxu1 %v3361_v58  ;;  %v3815_v58 = vsel %vm509_vm1, %v487_v48, 0.0  ;;  %v400_v42 = vadd.f32 %v3518_v20, %v339_v17  ;;  %v340_v48 = vmul.f32 %v3513_v19, %v279_v34  ;;  %v3369_v17 = vld [vmem:[%s5010_s3 + $0xb8] sm:$0xff]   ;;  %v402_v30 = vadd.f32 %v3518_v20, %v341_v62  ;;  %v284_v34 = vld [vmem:[%s3497_s20 + $0xa0] sm:$0x3] }
  0x40   : > { %2906 = vmatprep.subr.bf16.mxu1 %v3362_v3  ;;  %v666_v60 = vsel %vm646_vm2, %v663_v39, %v665_v44  ;;  %v725_v3 = vrot.slane %v3815_v58, 1  ;;  %v3366_v39 = vld [vmem:[%s5010_s3 + $0xb0] sm:$0xff]   ;;  %v281_v44 = vld [vmem:[%s3497_s20 + $0x88] sm:$0x3]  ;;  %v3896_v62 = vpack.c.bf16 %v3772_v23, %v3772_v23  ;;  %v3370_v23 = vld [vmem:[%s5010_s3 + $0x1c0] sm:$0xff]  }
  0x41   : > { %v3822_v10 = vpack.c.bf16 %v666_v60, %v664_v49  ;;  %v781_v49 = vrot.slane %v3609_v9, 2  ;;  %v3854_v60 = vmax.f32 %v399_v37, 0.0  ;;  %v454_v9 = vmax.f32 %v400_v42, 0.0 }
  0x42   : > { %v726_v38 = vsel %vm646_vm2, %v723_v63, %v725_v3  ;;  %v282_v63 = vld [vmem:[%s3497_s20 + $0x90] sm:$0xff]  ;;  %v342_v0 = vmul.f32 %v3513_v19, %v281_v44  ;;  %v3374_v3 = vld [vmem:[%s5010_s3 + $0x160] sm:$0xff]   ;;  %v782_v37 = vrot.slane %v3599_v5, 2  ;;  %v667_v42 = vrot.slane %v3874_v22, 1  ;;  %v283_v5 = vld [vmem:[%s3497_s20 + $0x98] sm:$0xff]  ;;  %5066 = vst [vmem:[#allocation17_spill] sm:$0xff] %v3896_v62 }
  0x43   : > { %2907 = vmatpush3.bf16.msra.mxu1 %v3363_v43  ;;  %1583 = vmatprep.mubr.bf16.mxu0 %v3822_v10  ;;  %v3849_v54 = vpack.c.bf16 %v726_v38, %v724_v26  ;;  %v3368_v43 = vld [vmem:[%s5010_s3 + $0xf8] sm:$0xff]   ;;  %v668_v26 = vrot.slane %v3854_v60, 1  ;;  %v3888_v38 = vsel %vm509_vm1, %v454_v9, 0.0  ;;  %v3902_v9 = vmax.f32 %v402_v30, 0.0 }
  0x44   : > { %2908 = vmatprep.subr.bf16.mxu1 %v3364_v52  ;;  %v3863_v52 = vadd.f32 %v3518_v20, %v340_v48  ;;  %v403_v44 = vadd.f32 %v3518_v20, %v342_v0  ;;  %3016 = vmatprep.subr.bf16.mxu0 %v3374_v3  ;;  %v670_v28 = vrot.slane %v3888_v38, 1  ;;  %v343_v0 = vmul.f32 %v3513_v19, %v282_v63 }
  0x45   : > { %5065 = vst [vmem:[#allocation16_spill] sm:$0xff] %v3849_v54  ;;  %1679 = vmatprep.mubr.bf16.mxu1 %v3849_v54  ;;  %v669_v3 = vsel %vm646_vm2, %v667_v42, %v668_v26  ;;  %3017 = vmatpush3.bf16.msra.mxu0 %v3376_v7  ;;  %v673_v42 = vrot.slane %v3902_v9, 1  ;;  %v285_v54 = vld [vmem:[%s3497_s20 + $0xa8] sm:$0xff] }
  0x46   : > { %2651 = vmatmul.mubr.msk.bf16.gmra.mrb[12].mxu0 %vm3603_vm4, %v3826_v11  ;;  %2687 = vmatmul.mubr.msk.bf16.gmra.mrb[12].mxu1 %vm3603_vm4, %v3834_v27  ;;  %v5020_v48 = vmax.f32 %v3863_v52, 0.0  ;;  %v671_v30 = vsel %vm646_vm2, %v668_v26, %v670_v28  ;;  %v345_v28 = vmul.f32 %v3513_v19, %v284_v34  ;;  %v3371_v26 = vld [vmem:[%s5010_s3 + $0x180] sm:$0xff]   ;;  %v3379_v34 = vld [vmem:[%s5010_s3 + $0x128] sm:$0xff]  }
  0x47   : > { %2909 = vmatpush3.bf16.msra.mxu1 %v3366_v39  ;;  %2690 = vmatprep.mubr.msk.bf16.mxu1 %vm3603_vm4, %v3643_v31  ;;  %v457_v39 = vmax.f32 %v403_v44, 0.0  ;;  %v784_v31 = vrot.slane %v3619_v15, 2  ;;  %v286_v44 = vld [vmem:[%s3497_s20 + $0xb0] sm:$0xff]  ;;  %v3924_v14 = vpack.c.bf16 %v671_v30, %v669_v3  ;;  %v344_v15 = vmul.f32 %v3513_v19, %v283_v5 }
  0x48   : > { %2910 = vmatprep.subr.bf16.mxu1 %v3368_v43  ;;  %v3913_v6 = vsel %vm498_vm0, %v5020_v48, 0.0  ;;  %v3918_v43 = vpack.c.bf16 %v3854_v60, %v452_v57  ;;  %v3378_v57 = vld [vmem:[%s5010_s3 + $0x168] sm:$0xff]   ;;  %v406_v30 = vadd.f32 %v3518_v20, %v345_v28 }
  0x49   : > { %v672_v63 = vrot.slane %v3913_v6, 1  ;;  %v3928_v48 = vsel %vm509_vm1, %v457_v39, 0.0  ;;  %v3941_v39 = vadd.f32 %v3518_v20, %v343_v0  ;;  %1591 = vmatprep.mubr.bf16.mxu0 %v3924_v14  ;;  %v405_v5 = vadd.f32 %v3518_v20, %v344_v15  ;;  %v3375_v0 = vld [vmem:[%s5010_s3 + $0x1c8] sm:$0xff]   ;;  %3018 = vmatprep.subr.bf16.mxu0 %v3378_v57  ;;  %v3380_v57 = vld [vmem:[%s5010_s3 + $0x1d0] sm:$0xff]  }
  0x4a   : > { %5067 = vst [vmem:[#allocation18_spill] sm:$0xff] %v3918_v43  ;;  %v675_v3 = vrot.slane %v3928_v48, 1  ;;  %v347_v15 = vmul.f32 %v3513_v19, %v286_v44  ;;  %v785_v28 = vsel %vm775_vm5, %v782_v37, %v784_v31  ;;  %v460_v47 = vmax.f32 %v406_v30, 0.0  ;;  %3019 = vmatpush3.bf16.msra.mxu0 %v3379_v34  ;;  %v288_v44 = vld [vmem:[%s3497_s20 + $0xc0] sm:$0xff] }
  0x4b   : > { %2911 = vmatpush3.bf16.msra.mxu1 %v3369_v17  ;;  %v674_v7 = vsel %vm646_vm2, %v672_v63, %v673_v42  ;;  %v783_v17 = vsel %vm775_vm5, %v781_v49, %v782_v37  ;;  %v786_v63 = vrot.slane %v3690_v4, 2  ;;  %v346_v49 = vmul.f32 %v3513_v19, %v285_v54  ;;  %v3377_v37 = vld [vmem:[%s5010_s3 + $0x188] sm:$0xff]  }
  0x4c   : > { %3120 = vmatprep.subr.bf16.mxu1 %v3370_v23  ;;  %v676_v56 = vsel %vm646_vm2, %v673_v42, %v675_v3  ;;  %v5028_v23 = vmax.f32 %v3941_v39, 0.0  ;;  %v3966_v27 = vmax.f32 %v405_v5, 0.0  ;;  %v348_v31 = vmul.f32 %v3513_v19, %v287_v59  ;;  %v3382_v59 = vld [vmem:[%s5010_s3 + $0x170] sm:$0xff]  }
  0x4d   : > { %v3963_v4 = vpack.c.bf16 %v676_v56, %v674_v7  ;;  %v787_v56 = vrot.slane %v3681_v61, 2  ;;  %v3983_v42 = vadd.f32 %v3518_v20, %v346_v49  ;;  %v5069_v3 = vmax.f32 %v3863_v52, 0.0  ;;  %3020 = vmatprep.subr.bf16.mxu0 %v3382_v59 }
  0x4e   : > { %2654 = vmatmul.mubr.msk.bf16.gmra.mrb[16].mxu0 %vm3603_vm4, %v3918_v43  ;;  %1721 = vmatmul.mubr.bf16.vlgmr.msra.gmra.mrb[16].mxu1 %v3896_v62  ;;  %v3975_v54 = vsel %vm498_vm0, %v5028_v23, 0.0  ;;  %v678_v7 = vrot.slane %v3966_v27, 1  ;;  %v409_v30 = vadd.f32 %v3518_v20, %v348_v31  ;;  %v4010_v49 = vpack.c.bf16 %v785_v28, %v783_v17  ;;  %v3381_v17 = vld [vmem:[%s5010_s3 + $0x190] sm:$0xff]  }
  0x4f   : > { %5068 = vst [vmem:[#allocation19_spill] sm:$0xff] %v3963_v4  ;;  %3121 = vmatpush3.bf16.msra.mxu1 %v3371_v26  ;;  %2693 = vmatprep.mubr.msk.bf16.mxu1 %vm3603_vm4, %v3718_v33  ;;  %v3992_v26 = vsel %vm509_vm1, %v460_v47, 0.0  ;;  %v677_v61 = vrot.slane %v3975_v54, 1  ;;  %v4002_v34 = vpack.c.bf16 %v3902_v9, %v5069_v3  ;;  %v408_v47 = vadd.f32 %v3518_v20, %v347_v15  ;;  %v289_v33 = vld [vmem:[%s3497_s20 + $0xc8] sm:$0xff] }
  0x50   : > { %1599 = vmatprep.mubr.bf16.mxu0 %v3963_v4  ;;  %3122 = vmatprep.subr.bf16.mxu1 %v3375_v0  ;;  %v680_v5 = vrot.slane %v3992_v26, 1  ;;  %v3383_v0 = vld [vmem:[%s5010_s3 + $0x130] sm:$0xff]   ;;  %v789_v52 = vrot.slane %v3703_v18, 2  ;;  %v5032_v3 = vmax.f32 %v3983_v42, 0.0  ;;  %v463_v31 = vmax.f32 %v409_v30, 0.0 }
  0x51   : > { %v679_v23 = vsel %vm646_vm2, %v677_v61, %v678_v7  ;;  %v4016_v15 = vmax.f32 %v408_v47, 0.0  ;;  %3021 = vmatpush3.bf16.msra.mxu0 %v3383_v0  ;;  %v291_v61 = vld [vmem:[%s3497_s20 + $0xd8] sm:$0xff]  ;;  %v350_v30 = vmul.f32 %v3513_v19, %v289_v33  ;;  %v351_v0 = vmul.f32 %v3513_v19, %v290_v29 }
  0x52   : > { %v681_v62 = vsel %vm646_vm2, %v678_v7, %v680_v5  ;;  %v4029_v18 = vsel %vm498_vm0, %v5032_v3, 0.0  ;;  %v3384_v7 = vld [vmem:[%s5010_s3 + $0x1d8] sm:$0xff]   ;;  %v790_v47 = vsel %vm775_vm5, %v787_v56, %v789_v52  ;;  %v5071_v3 = vmax.f32 %v3941_v39, 0.0 }
  0x53   : > { %3123 = vmatpush3.bf16.msra.mxu1 %v3377_v37  ;;  %v4023_v28 = vpack.c.bf16 %v681_v62, %v679_v23  ;;  %v349_v37 = vmul.f32 %v3513_v19, %v288_v44  ;;  %v788_v62 = vsel %vm775_vm5, %v786_v63, %v787_v56  ;;  %v4042_v23 = vsel %vm509_vm1, %v463_v31, 0.0  ;;  %v3385_v5 = vld [vmem:[%s5010_s3 + $0x198] sm:$0xff]  }
  0x54   : > { %3124 = vmatprep.subr.bf16.mxu1 %v3380_v57  ;;  %v682_v59 = vrot.slane %v4029_v18, 1  ;;  %v683_v44 = vrot.slane %v4016_v15, 1  ;;  %v292_v57 = vld [vmem:[%s3497_s20 + $0xe0] sm:$0xff]  ;;  %v685_v63 = vrot.slane %v4042_v23, 1  ;;  %v3386_v31 = vld [vmem:[%s5010_s3 + $0x178] sm:$0xff]   ;;  %v791_v52 = vrot.slane %v3776_v24, 2 }
  0x55   : > { %5070 = vst [vmem:[#allocation20_spill] sm:$0xff] %v4023_v28  ;;  %v4070_v33 = vadd.f32 %v3518_v20, %v349_v37  ;;  %v3387_v29 = vld [vmem:[%s5010_s3 + $0x138] sm:$0xff]   ;;  %v411_v39 = vadd.f32 %v3518_v20, %v350_v30  ;;  %3022 = vmatprep.subr.bf16.mxu0 %v3386_v31  ;;  %v4080_v24 = vpack.c.bf16 %v790_v47, %v788_v62  ;;  %v794_v37 = vrot.slane %v3789_v2, 2  ;;  %v4096_v2 = vld [vmem:[%s5010_s3 + $0x200] sm:$0xff]  }
  0x56   : > { %2657 = vmatmul.mubr.msk.bf16.gmra.mrb[20].mxu0 %vm3603_vm4, %v4002_v34  ;;  %1729 = vmatmul.mubr.bf16.gmra.mrb[20].mxu1 %v4010_v49  ;;  %v684_v56 = vsel %vm646_vm2, %v682_v59, %v683_v44  ;;  %v686_v41 = vsel %vm646_vm2, %v683_v44, %v685_v63  ;;  %v352_v59 = vmul.f32 %v3513_v19, %v291_v61 }
  0x57   : > { %1607 = vmatprep.mubr.bf16.mxu0 %v4023_v28  ;;  %2696 = vmatprep.mubr.msk.bf16.mxu1 %vm3603_vm4, %v3826_v11  ;;  %v4065_v28 = vpack.c.bf16 %v3966_v27, %v5071_v3  ;;  %v792_v11 = vrot.slane %v3768_v16, 2  ;;  %v412_v3 = vadd.f32 %v3518_v20, %v351_v0  ;;  %v4085_v4 = vpack.c.bf16 %v686_v41, %v684_v56 }
  0x58   : > { %3125 = vmatpush3.bf16.msra.mxu1 %v3381_v17  ;;  %v5041_v17 = vmax.f32 %v4070_v33, 0.0  ;;  %3023 = vmatpush3.bf16.msra.mxu0 %v3387_v29  ;;  %v4087_v44 = vmax.f32 %v411_v39, 0.0  ;;  %v353_v63 = vmul.f32 %v3513_v19, %v292_v57  ;;  %v354_v61 = vmul.f32 %v3513_v19, %v293_v53  ;;  %v3390_v57 = vld [vmem:[%s5010_s3 + $0x1a0] sm:$0xff]   ;;  %v3391_v53 = vld [vmem:[%s5010_s3 + $0x1e8] sm:$0xff]   ;;  %v294_v29 = vld [vmem:[%s3497_s20 + $0xf0] sm:$0xff] }
  0x59   : > { %3126 = vmatprep.subr.bf16.mxu1 %v3384_v7  ;;  %5072 = vst [vmem:[#allocation21_spill] sm:$0xff] %v4085_v4  ;;  %v466_v16 = vmax.f32 %v412_v3, 0.0  ;;  %v3388_v7 = vld [vmem:[%s5010_s3 + $0x1e0] sm:$0xff]   ;;  %v4106_v62 = vadd.f32 %v3518_v20, %v352_v59  ;;  %v793_v47 = vsel %vm775_vm5, %v791_v52, %v792_v11  ;;  %3256 = vmatprep.subr.bf16.mxu0 %v4096_v2  ;;  %v295_v59 = vld [vmem:[%s3497_s20 + $0xf8] sm:$0xff] }
  0x5a   : > { %v4102_v41 = vsel %vm498_vm0, %v5041_v17, 0.0  ;;  %v688_v19 = vrot.slane %v4087_v44, 1  ;;  %v414_v56 = vadd.f32 %v3518_v20, %v353_v63  ;;  %v415_v52 = vadd.f32 %v3518_v20, %v354_v61 }
  0x5b   : > { %v4114_v30 = vsel %vm509_vm1, %v466_v16, 0.0  ;;  %v687_v0 = vrot.slane %v4102_v41, 1  ;;  %v5042_v3 = vmax.f32 %v4106_v62, 0.0  ;;  %v296_v16 = vld [vmem:[%s3497_s20 + $0x100] sm:$0x3]  ;;  %v5073_v61 = vmax.f32 %v3983_v42, 0.0 }
  0x5c   : > { %3127 = vmatpush3.bf16.msra.mxu1 %v3385_v5  ;;  %v795_v5 = vsel %vm775_vm5, %v792_v11, %v794_v37  ;;  %v690_v31 = vrot.slane %v4114_v30, 1  ;;  %v796_v37 = vrot.slane %v3874_v22, 2  ;;  %v4141_v20 = vmax.f32 %v414_v56, 0.0 }
  0x5d   : > { %3128 = vmatprep.subr.bf16.mxu1 %v3388_v7  ;;  %v689_v39 = vsel %vm646_vm2, %v687_v0, %v688_v19  ;;  %v469_v63 = vmax.f32 %v415_v52, 0.0  ;;  %v3393_v7 = vld [vmem:[%s5010_s3 + $0x1a8] sm:$0xff]   ;;  %v4149_v0 = vpack.c.bf16 %v4016_v15, %v5073_v61  ;;  %v4151_v17 = vpack.c.bf16 %v795_v5, %v793_v47  ;;  %v3394_v47 = vld [vmem:[%s5010_s3 + $0x1f0] sm:$0xff]  }
  0x5e   : > { %2660 = vmatmul.mubr.msk.bf16.gmra.mrb[24].mxu0 %vm3603_vm4, %v4065_v28  ;;  %1737 = vmatmul.mubr.bf16.gmra.mrb[24].mxu1 %v4080_v24  ;;  %v691_v11 = vsel %vm646_vm2, %v688_v19, %v690_v31  ;;  %v4157_v22 = vsel %vm498_vm0, %v5042_v3, 0.0  ;;  %v797_v5 = vrot.slane %v3854_v60, 2  ;;  %v799_v31 = vrot.slane %v3888_v38, 2  ;;  %v297_v52 = vld [vmem:[%s3497_s20 + $0x108] sm:$0xff]  ;;  %v4187_v60 = vld [vmem:[%s5009_s2] ss:$0 sm:$0xff] }
  0x5f   : > { %1615 = vmatprep.mubr.bf16.mxu0 %v4085_v4  ;;  %2699 = vmatprep.mubr.msk.bf16.mxu1 %vm3603_vm4, %v3918_v43  ;;  %v4168_v19 = vpack.c.bf16 %v691_v11, %v689_v39  ;;  %v4174_v56 = vsel %vm509_vm1, %v469_v63, 0.0  ;;  %v692_v61 = vrot.slane %v4157_v22, 1  ;;  %v298_v43 = vld [vmem:[%s3497_s20 + $0x110] sm:$0xff]  ;;  %v299_v39 = vld [vmem:[%s3497_s20 + $0x118] sm:$0x3] }
  0x60   : > { %3129 = vmatpush3.bf16.msra.mxu1 %v3390_v57  ;;  %v4162_v57 = vld [vmem:[%s5008_s1] ss:$0 sm:$0xff]  ;;  %v695_v11 = vrot.slane %v4174_v56, 1  ;;  %v3396_v63 = vld [vmem:[%s5010_s3 + $0x1b0] sm:$0xff]   ;;  %v3397_v4 = vld [vmem:[%s5010_s3 + $0x1f8] sm:$0xff]  }
  0x61   : > { %v355_v42 = vmul.f32 %v4162_v57, %v294_v29  ;;  %3130 = vmatprep.subr.bf16.mxu1 %v3391_v53  ;;  %v693_v29 = vrot.slane %v4141_v20, 1  ;;  %v356_v53 = vmul.f32 %v4162_v57, %v295_v59  ;;  %v357_v3 = vmul.f32 %v4162_v57, %v296_v16 }
  0x62   : > { %v360_v25 = vmul.f32 %v4162_v57, %v299_v39 }
  0x63   : > { %v4190_v38 = vadd.f32 %v4187_v60, %v355_v42  ;;  %v417_v59 = vadd.f32 %v4187_v60, %v356_v53  ;;  %v418_v16 = vadd.f32 %v4187_v60, %v357_v3  ;;  %v798_v53 = vsel %vm775_vm5, %v796_v37, %v797_v5  ;;  %v3399_v37 = vld [vmem:[%s5010_s3 + $0x1b8] sm:$0xff]  }
  0x64   : > { %3131 = vmatpush3.bf16.msra.mxu1 %v3393_v7  ;;  %v358_v7 = vmul.f32 %v4162_v57, %v297_v52  ;;  %v800_v3 = vsel %vm775_vm5, %v797_v5, %v799_v31  ;;  %v696_v12 = vsel %vm646_vm2, %v693_v29, %v695_v11  ;;  %v359_v52 = vmul.f32 %v4162_v57, %v298_v43 }
  0x65   : > { %3132 = vmatprep.subr.bf16.mxu1 %v3394_v47  ;;  %v470_v42 = vmax.f32 %v4190_v38, 0.0  ;;  %v694_v47 = vsel %vm646_vm2, %v692_v61, %v693_v29  ;;  %v472_v40 = vmax.f32 %v418_v16, 0.0  ;;  %v4214_v38 = vmax.f32 %v417_v59, 0.0 }
  0x66   : > { %2663 = vmatmul.mubr.msk.bf16.gmra.mrb[28].mxu0 %vm3603_vm4, %v4149_v0  ;;  %1745 = vmatmul.mubr.bf16.gmra.mrb[28].mxu1 %v4151_v17  ;;  %v4230_v61 = vadd.f32 %v4187_v60, %v358_v7  ;;  %v5074_v43 = vmax.f32 %v4070_v33, 0.0  ;;  %v4237_v39 = vpack.c.bf16 %v800_v3, %v798_v53  ;;  %v421_v11 = vadd.f32 %v4187_v60, %v360_v25 }
  0x67   : > { %1623 = vmatprep.mubr.bf16.mxu0 %v4168_v19  ;;  %2702 = vmatprep.mubr.msk.bf16.mxu1 %vm3603_vm4, %v4002_v34  ;;  %v4223_v5 = vsel %vm498_vm0, %v470_v42, 0.0  ;;  %v4227_v31 = vsel %vm509_vm1, %v472_v40, 0.0  ;;  %v801_v59 = vrot.slane %v3913_v6, 2  ;;  %v802_v40 = vrot.slane %v3902_v9, 2 }
  0x68   : > { %3133 = vmatpush3.bf16.msra.mxu1 %v3396_v63  ;;  %v4235_v29 = vpack.c.bf16 %v4087_v44, %v5074_v43  ;;  %v4240_v63 = vpack.c.bf16 %v696_v12, %v694_v47  ;;  %v804_v16 = vrot.slane %v3928_v48, 2  ;;  %v697_v7 = vrot.slane %v4223_v5, 1 }
  0x69   : > { %3134 = vmatprep.subr.bf16.mxu1 %v3397_v4  ;;  %v698_v4 = vrot.slane %v4214_v38, 1  ;;  %v700_v33 = vrot.slane %v4227_v31, 1  ;;  %v420_v43 = vadd.f32 %v4187_v60, %v359_v52  ;;  %v473_v53 = vmax.f32 %v4230_v61, 0.0 }
  0x6a   : > { %v475_v25 = vmax.f32 %v421_v11, 0.0  ;;  %v803_v6 = vsel %vm775_vm5, %v801_v59, %v802_v40  ;;  %v805_v12 = vsel %vm775_vm5, %v802_v40, %v804_v16  ;;  %v806_v40 = vrot.slane %v3975_v54, 2 }
  0x6b   : > { %v699_v48 = vsel %vm646_vm2, %v697_v7, %v698_v4  ;;  %v701_v9 = vsel %vm646_vm2, %v698_v4, %v700_v33  ;;  %v4262_v3 = vmax.f32 %v420_v43, 0.0  ;;  %v4266_v47 = vsel %vm498_vm0, %v473_v53, 0.0 }
  0x6c   : > { %3135 = vmatpush3.bf16.msra.mxu1 %v3399_v37  ;;  %v4270_v52 = vsel %vm509_vm1, %v475_v25, 0.0  ;;  %v5075_v37 = vmax.f32 %v4106_v62, 0.0  ;;  %v4277_v11 = vpack.c.bf16 %v805_v12, %v803_v6  ;;  %v4279_v59 = vpack.c.bf16 %v701_v9, %v699_v48 }
  0x6d   : > { %v807_v16 = vrot.slane %v3966_v27, 2  ;;  %v809_v7 = vrot.slane %v3992_v26, 2  ;;  %v702_v4 = vrot.slane %v4266_v47, 1  ;;  %v703_v33 = vrot.slane %v4262_v3, 1 }
  0x6e   : > { %2666 = vmatmul.mubr.msk.bf16.gmra.mrb[32].mxu0 %vm3603_vm4, %v4235_v29  ;;  %1753 = vmatmul.mubr.bf16.gmra.mrb[32].mxu1 %v4237_v39  ;;  %v4275_v61 = vpack.c.bf16 %v4141_v20, %v5075_v37  ;;  %v705_v43 = vrot.slane %v4270_v52, 1  ;;  %v4300_v25 = vpack.c.bf16 %v4214_v38, %v470_v42  ;;  %v851_v6 = vrot.slane %v3805_v50, 2 }
  0x6f   : > { %1631 = vmatprep.mubr.bf16.mxu0 %v4240_v63  ;;  %2705 = vmatprep.mubr.msk.bf16.mxu1 %vm3603_vm4, %v4065_v28  ;;  %v808_v27 = vsel %vm775_vm5, %v806_v40, %v807_v16  ;;  %v810_v54 = vsel %vm775_vm5, %v807_v16, %v809_v7  ;;  %v704_v26 = vsel %vm646_vm2, %v702_v4, %v703_v33  ;;  %v852_v12 = vrot.slane %v3800_v46, 2 }
  0x70   : > { %v706_v62 = vsel %vm646_vm2, %v703_v33, %v705_v43  ;;  %v4304_v48 = vpack.c.bf16 %v810_v54, %v808_v27  ;;  %v811_v37 = vrot.slane %v4029_v18, 2  ;;  %v812_v40 = vrot.slane %v4016_v15, 2 }
  0x71   : > { %v4306_v9 = vpack.c.bf16 %v706_v62, %v704_v26  ;;  %v814_v16 = vrot.slane %v4042_v23, 2  ;;  %v853_v7 = vsel %vm775_vm5, %v851_v6, %v852_v12  ;;  %v854_v4 = vrot.slane %v3815_v58, 2  ;;  %v3398_v6 = vld [vmem:[%s5010_s3 + $0x218] sm:$0xff]  }
  0x72   : > { %v813_v15 = vsel %vm775_vm5, %v811_v37, %v812_v40  ;;  %v4327_v18 = vpack.c.bf16 %v4262_v3, %v473_v53  ;;  %v816_v42 = vrot.slane %v4102_v41, 2  ;;  %v817_v33 = vrot.slane %v4087_v44, 2 }
  0x73   : > { %v855_v46 = vsel %vm775_vm5, %v852_v12, %v854_v4  ;;  %v815_v58 = vsel %vm775_vm5, %v812_v40, %v814_v16  ;;  %v819_v43 = vrot.slane %v4114_v30, 2  ;;  %v821_v44 = vrot.slane %v4157_v22, 2 }
  0x74   : > { %v4319_v50 = vpack.c.bf16 %v855_v46, %v853_v7  ;;  %v4329_v23 = vpack.c.bf16 %v815_v58, %v813_v15  ;;  %v818_v53 = vsel %vm775_vm5, %v816_v42, %v817_v33  ;;  %v822_v30 = vrot.slane %v4141_v20, 2  ;;  %v3401_v7 = vld [vmem:[%s5010_s3 + $0x228] sm:$0xff]   ;;  %v3403_v42 = vld [vmem:[%s5010_s3 + $0x238] sm:$0xff]  }
  0x75   : > { %v820_v41 = vsel %vm775_vm5, %v817_v33, %v819_v43  ;;  %v824_v54 = vrot.slane %v4174_v56, 2  ;;  %v3395_v56 = vld [vmem:[%s5010_s3 + $0x210] sm:$0xff]   ;;  %v827_v26 = vrot.slane %v4214_v38, 2  ;;  %v829_v62 = vrot.slane %v4227_v31, 2  ;;  %v3400_v31 = vld [vmem:[%s5010_s3 + $0x220] sm:$0xff]   ;;  %v5076_v33 = vld [vmem:[#allocation5_spill] sm:$0xff] }
  0x76   : > { %2669 = vmatmul.mubr.msk.bf16.gmra.mrb[36].mxu0 %vm3603_vm4, %v4275_v61  ;;  %1761 = vmatmul.mubr.bf16.gmra.mrb[36].mxu1 %v4277_v11  ;;  %v4344_v27 = vpack.c.bf16 %v820_v41, %v818_v53  ;;  %v823_v20 = vsel %vm775_vm5, %v821_v44, %v822_v30  ;;  %v831_v37 = vrot.slane %v4266_v47, 2  ;;  %v832_v40 = vrot.slane %v4262_v3, 2  ;;  %v5077_v53 = vld [vmem:[#allocation4_spill] sm:$0xff]  ;;  %v5078_v44 = vld [vmem:[#allocation6_spill] sm:$0xff] }
  0x77   : > { %1639 = vmatprep.mubr.bf16.mxu0 %v4279_v59  ;;  %2708 = vmatprep.mubr.msk.bf16.mxu1 %vm3603_vm4, %v4149_v0  ;;  %v825_v22 = vsel %vm775_vm5, %v822_v30, %v824_v54  ;;  %v830_v38 = vsel %vm775_vm5, %v827_v26, %v829_v62  ;;  %v834_v16 = vrot.slane %v4270_v52, 2  ;;  %v3402_v52 = vld [vmem:[%s5010_s3 + $0x230] sm:$0xff]   ;;  %v836_v46 = vrot.slane %v3547_v35, 2  ;;  %v312_v54 = vld [vmem:[%s3497_s20 + $0x180] sm:$0xff] }
  0x78   : > { %v833_v3 = vsel %vm775_vm5, %v831_v37, %v832_v40  ;;  %v837_v15 = vrot.slane %v3540_v32, 2  ;;  %v839_v58 = vrot.slane %v3551_v36, 2  ;;  %v841_v43 = vrot.slane %v5076_v33, 2  ;;  %v5086_v33 = vld [vmem:[#allocation21_spill] sm:$0xff] }
  0x79   : > { %v835_v47 = vsel %vm775_vm5, %v832_v40, %v834_v16  ;;  %v842_v41 = vrot.slane %v5077_v53, 2  ;;  %v844_v30 = vrot.slane %v5078_v44, 2  ;;  %v5083_v40 = vld [vmem:[#allocation11_spill] sm:$0xff]  ;;  %v5088_v53 = vld [vmem:[#allocation14_spill] sm:$0xff] }
  0x7a   : > { %v4402_v4 = vpack.c.bf16 %v835_v47, %v833_v3  ;;  %v838_v32 = vsel %vm775_vm5, %v836_v46, %v837_v15  ;;  %v840_v35 = vsel %vm775_vm5, %v837_v15, %v839_v58  ;;  %v849_v16 = vrot.slane %v5083_v40, 2  ;;  %v5084_v47 = vld [vmem:[#allocation20_spill] sm:$0xff]  ;;  %v5090_v44 = vld [vmem:[#allocation3_spill] sm:$0xff] }
  0x7b   : > { %v4418_v36 = vpack.c.bf16 %v840_v35, %v838_v32 }
  0x7e   : > { %2672 = vmatmul.mubr.msk.bf16.gmra.mrb[40].mxu0 %vm3603_vm4, %v4300_v25  ;;  %1769 = vmatmul.mubr.bf16.gmra.mrb[40].mxu1 %v4304_v48 }
  0x7f   : > { %1647 = vmatprep.mubr.bf16.mxu0 %v4306_v9  ;;  %2711 = vmatprep.mubr.msk.bf16.mxu1 %vm3603_vm4, %v4235_v29 }
  0x86   : > { %2675 = vmatmul.mubr.msk.bf16.gmra.mrb[44].mxu0 %vm3603_vm4, %v4327_v18  ;;  %1777 = vmatmul.mubr.bf16.gmra.mrb[44].mxu1 %v4329_v23 }
  0x87   : > { %1881 = vmatprep.mubr.bf16.mxu0 %v4010_v49  ;;  %2714 = vmatprep.mubr.msk.bf16.mxu1 %vm3603_vm4, %v4275_v61  ;;  %v3392_v49 = vld [vmem:[%s5010_s3 + $0x208] sm:$0xff]  }
  0x8e   : > { %1882 = vmatmul.mubr.bf16.vlgmr.msra.gmra.mrb[48].mxu0 %v3658_v45  ;;  %1785 = vmatmul.mubr.bf16.gmra.mrb[48].mxu1 %v4344_v27  ;;  %v4364_v45 = vpack.c.bf16 %v825_v22, %v823_v20  ;;  %v5079_v20 = vld [vmem:[#allocation19_spill] sm:$0xff]  ;;  %v5080_v22 = vld [vmem:[#allocation12_spill] sm:$0xff] }
  0x8f   : > { %3257 = vmatpush3.bf16.msra.mxu0 %v4096_v2  ;;  %2717 = vmatprep.mubr.msk.bf16.mxu1 %vm3603_vm4, %v4300_v25  ;;  %v826_v2 = vrot.slane %v4223_v5, 2 }
  0x90   : > { %1889 = vmatprep.mubr.bf16.mxu0 %v4080_v24  ;;  %3258 = vmatprep.subr.bf16.mxu0 %v3392_v49 }
  0x91   : > { %v828_v5 = vsel %vm775_vm5, %v826_v2, %v827_v26  ;;  %v845_v2 = vsel %vm775_vm5, %v842_v41, %v844_v30  ;;  %v373_v26 = vmul.f32 %v4162_v57, %v312_v54  ;;  %v5091_v54 = vld [vmem:[#allocation7_spill] sm:$0xff] }
  0x92   : > { %v4383_v12 = vpack.c.bf16 %v830_v38, %v828_v5  ;;  %v5081_v5 = vld [vmem:[#allocation10_spill] sm:$0xff] }
  0x93   : > { %3259 = vmatpush3.bf16.msra.mxu0 %v3392_v49  ;;  %v313_v49 = vld [vmem:[%s3497_s20 + $0x188] sm:$0xff]  ;;  %v846_v38 = vrot.slane %v5081_v5, 2  ;;  %v5093_v5 = vld [vmem:[#allocation16_spill] sm:$0xff] }
  0x94   : > { %3260 = vmatprep.subr.bf16.mxu0 %v3395_v56  ;;  %v374_v62 = vmul.f32 %v4162_v57, %v313_v49 }
  0x96   : > { %1890 = vmatmul.mubr.bf16.gmra.mrb[52].mxu0 %v3745_v51  ;;  %1793 = vmatmul.mubr.bf16.gmra.mrb[52].mxu1 %v4364_v45  ;;  %v435_v3 = vadd.f32 %v4187_v60, %v374_v62 }
  0x97   : > { %1897 = vmatprep.mubr.bf16.mxu0 %v4151_v17  ;;  %2720 = vmatprep.mubr.msk.bf16.mxu1 %vm3603_vm4, %v4327_v18 }
  0x98   : > { %3261 = vmatpush3.bf16.msra.mxu0 %v3395_v56  ;;  %v843_v56 = vsel %vm775_vm5, %v841_v43, %v842_v41  ;;  %v5087_v43 = vld [vmem:[#allocation9_spill] sm:$0xff] }
  0x99   : > { %3262 = vmatprep.subr.bf16.mxu0 %v3398_v6 }
  0x9c   : > { %3263 = vmatpush3.bf16.msra.mxu0 %v3398_v6  ;;  %v4435_v6 = vpack.c.bf16 %v845_v2, %v843_v56  ;;  %v5092_v56 = vld [vmem:[#allocation13_spill] sm:$0xff] }
  0x9d   : > { %3264 = vmatprep.subr.bf16.mxu0 %v3400_v31 }
  0x9e   : > { %1898 = vmatmul.mubr.bf16.gmra.mrb[56].mxu0 %v3822_v10  ;;  %1801 = vmatmul.mubr.bf16.gmra.mrb[56].mxu1 %v4383_v12 }
  0x9f   : > { %1905 = vmatprep.mubr.bf16.mxu0 %v4237_v39  ;;  %2723 = vmatprep.mubr.msk.bf16.mxu1 %vm3603_vm4, %v3591_v1 }
  0xa0   : > { %3265 = vmatpush3.bf16.msra.mxu0 %v3400_v31  ;;  %v5082_v31 = vld [vmem:[#allocation8_spill] sm:$0xff] }
  0xa1   : > { %3266 = vmatprep.subr.bf16.mxu0 %v3401_v7  ;;  %v847_v37 = vrot.slane %v5082_v31, 2 }
  0xa3   : > { %v848_v46 = vsel %vm775_vm5, %v846_v38, %v847_v37  ;;  %v850_v15 = vsel %vm775_vm5, %v847_v37, %v849_v16 }
  0xa4   : > { %3267 = vmatpush3.bf16.msra.mxu0 %v3401_v7  ;;  %v434_v7 = vadd.f32 %v4187_v60, %v373_v26  ;;  %v4450_v32 = vpack.c.bf16 %v850_v15, %v848_v46 }
  0xa5   : > { %3268 = vmatprep.subr.bf16.mxu0 %v3402_v52 }
  0xa6   : > { %1906 = vmatmul.mubr.bf16.gmra.mrb[60].mxu0 %v3924_v14  ;;  %1809 = vmatmul.mubr.bf16.gmra.mrb[60].mxu1 %v4402_v4  ;;  %v488_v58 = vmax.f32 %v434_v7, 0.0 }
  0xa7   : > { %1913 = vmatprep.mubr.bf16.mxu0 %v4277_v11  ;;  %2726 = vmatprep.mubr.msk.bf16.mxu1 %vm3603_vm4, %v3673_v55 }
  0xa8   : > { %3269 = vmatpush3.bf16.msra.mxu0 %v3402_v52  ;;  %v5085_v52 = vld [vmem:[#allocation15_spill] sm:$0xff] }
  0xa9   : > { %3270 = vmatprep.subr.bf16.mxu0 %v3403_v42 }
  0xac   : > { %3271 = vmatpush3.bf16.msra.mxu0 %v3403_v42  ;;  %v489_v42 = vmax.f32 %v435_v3, 0.0 }
  0xae   : > { %1914 = vmatmul.mubr.bf16.gmra.mrb[64].mxu0 %v5079_v20  ;;  %1817 = vmatmul.mubr.bf16.gmra.mrb[64].mxu1 %v4418_v36  ;;  %v4452_v35 = vpack.c.bf16 %v489_v42, %v488_v58  ;;  %v909_v26 = vrot.slane %v489_v42, 1 }
  0xaf   : > { %1921 = vmatprep.mubr.bf16.mxu0 %v4304_v48  ;;  %2729 = vmatprep.mubr.msk.bf16.mxu1 %vm3603_vm4, %v5080_v22 }
  0xb6   : > { %1922 = vmatmul.mubr.bf16.gmra.mrb[68].mxu0 %v5084_v47  ;;  %1825 = vmatmul.mubr.bf16.gmra.mrb[68].mxu1 %v4435_v6 }
  0xb7   : > { %1929 = vmatprep.mubr.bf16.mxu0 %v4329_v23  ;;  %2732 = vmatprep.mubr.msk.bf16.mxu1 %vm3603_vm4, %v5085_v52 }
  0xbe   : > { %1930 = vmatmul.mubr.bf16.gmra.mrb[72].mxu0 %v5086_v33  ;;  %1833 = vmatmul.mubr.bf16.gmra.mrb[72].mxu1 %v4450_v32 }
  0xbf   : > { %1937 = vmatprep.mubr.bf16.mxu0 %v4344_v27  ;;  %2735 = vmatprep.mubr.msk.bf16.mxu1 %vm3603_vm4, %v4452_v35 }
  0xc6   : > { %1938 = vmatmul.mubr.bf16.gmra.mrb[76].mxu0 %v4168_v19  ;;  %1841 = vmatmul.mubr.bf16.gmra.mrb[76].mxu1 %v4319_v50 }
  0xc7   : > { %1945 = vmatprep.mubr.bf16.mxu0 %v4364_v45  ;;  %2042 = vmatprep.mubr.bf16.mxu1 %v3745_v51  ;;  %v5089_v51 = vld [vmem:[#allocation18_spill] sm:$0xff] }
  0xce   : > { %1946 = vmatmul.mubr.bf16.gmra.mrb[80].mxu0 %v4240_v63  ;;  %2738 = vmatmul.mubr.msk.bf16.vlgmr.msra.gmra.mrb[80].mxu1 %vm3603_vm4, %v5087_v43 }
  0xcf   : > { %1953 = vmatprep.mubr.bf16.mxu0 %v4383_v12  ;;  %2050 = vmatprep.mubr.bf16.mxu1 %v3822_v10  ;;  %v314_v10 = vld [vmem:[%s3497_s20 + $0x190] sm:$0x3] }
  0xd0   : > { %v375_v41 = vmul.f32 %v4162_v57, %v314_v10 }
  0xd6   : > { %1954 = vmatmul.mubr.bf16.gmra.mrb[84].mxu0 %v4279_v59  ;;  %2741 = vmatmul.mubr.msk.bf16.gmra.mrb[84].mxu1 %vm3603_vm4, %v5088_v53 }
  0xd7   : > { %1961 = vmatprep.mubr.bf16.mxu0 %v4402_v4  ;;  %2058 = vmatprep.mubr.bf16.mxu1 %v3924_v14  ;;  %v436_v14 = vadd.f32 %v4187_v60, %v375_v41 }
  0xd9   : > { %v490_v30 = vmax.f32 %v436_v14, 0.0 }
  0xdb   : > { %v578_v57 = vsel %vm509_vm1, %v490_v30, 0.0 }
  0xdc   : > { %v919_v60 = vrot.slane %v578_v57, 2  ;;  %v911_v62 = vrot.slane %v578_v57, 1 }
  0xde   : > { %1962 = vmatmul.mubr.bf16.gmra.mrb[88].mxu0 %v4306_v9  ;;  %2744 = vmatmul.mubr.msk.bf16.gmra.mrb[88].mxu1 %vm3603_vm4, %v5089_v51 }
  0xdf   : > { %1969 = vmatprep.mubr.bf16.mxu0 %v4418_v36  ;;  %2066 = vmatprep.mubr.bf16.mxu1 %v5079_v20  ;;  %v917_v20 = vrot.slane %v489_v42, 2 }
  0xe1   : > { %v920_v13 = vsel %vm775_vm5, %v917_v20, %v919_v60 }
  0xe6   : > { %1970 = vmatmul.mubr.bf16.gmra.mrb[92].mxu0 %v5090_v44  ;;  %2747 = vmatmul.mubr.msk.bf16.gmra.mrb[92].mxu1 %vm3603_vm4, %v4002_v34  ;;  %v576_v34 = vsel %vm498_vm0, %v488_v58, 0.0 }
  0xe7   : > { %1977 = vmatprep.mubr.bf16.mxu0 %v4435_v6  ;;  %2074 = vmatprep.mubr.bf16.mxu1 %v5084_v47  ;;  %v916_v49 = vrot.slane %v576_v34, 2  ;;  %v908_v21 = vrot.slane %v576_v34, 1 }
  0xee   : > { %1978 = vmatmul.mubr.bf16.gmra.mrb[96].mxu0 %v5091_v54  ;;  %2750 = vmatmul.mubr.msk.bf16.gmra.mrb[96].mxu1 %vm3603_vm4, %v4065_v28  ;;  %v918_v28 = vsel %vm775_vm5, %v916_v49, %v917_v20 }
  0xef   : > { %1985 = vmatprep.mubr.bf16.mxu0 %v4450_v32  ;;  %2082 = vmatprep.mubr.bf16.mxu1 %v5086_v33  ;;  %v4509_v2 = vpack.c.bf16 %v920_v13, %v918_v28 }
  0xf6   : > { %1986 = vmatmul.mubr.bf16.gmra.mrb[100].mxu0 %v5092_v56  ;;  %2753 = vmatmul.mubr.msk.bf16.gmra.mrb[100].mxu1 %vm3603_vm4, %v4149_v0  ;;  %v910_v0 = vsel %vm646_vm2, %v908_v21, %v909_v26 }
  0xf7   : > { %1993 = vmatprep.mubr.bf16.mxu0 %v4319_v50  ;;  %2090 = vmatprep.mubr.bf16.mxu1 %v4168_v19  ;;  %v912_v19 = vsel %vm646_vm2, %v909_v26, %v911_v62 }
  0xf8   : > { %v4523_v46 = vpack.c.bf16 %v912_v19, %v910_v0 }
  0xfe   : > { %1994 = vmatmul.mubr.bf16.gmra.mrb[104].mxu0 %v5093_v5  ;;  %2756 = vmatmul.mubr.msk.bf16.gmra.mrb[104].mxu1 %vm3603_vm4, %v4235_v29 }
  0xff   : > { %2001 = vmatprep.mubr.bf16.mxu0 %v4509_v2  ;;  %2098 = vmatprep.mubr.bf16.mxu1 %v4240_v63 }
 0x101   : > { %v2800_v38 = vpop.f32.mrb[0].mxu0  ;;  %v2872_v31 = vpop.f32.mrb[0].mxu1 }
 0x102   : > { %v2801_v37 = vpop.f32.mrb[1].mxu0  ;;  %v2873_v40 = vpop.f32.mrb[1].mxu1 }
 0x103   : > { %v4519_v16 = vadd.f32 %v2801_v37, %v2800_v38  ;;  %v4521_v7 = vadd.f32 %v2873_v40, %v2872_v31  ;;  %v2803_v3 = vpop.f32.mrb[2].mxu0  ;;  %v2875_v47 = vpop.f32.mrb[2].mxu1 }
 0x104   : > { %v2804_v29 = vpop.f32.mrb[3].mxu0  ;;  %v2876_v15 = vpop.f32.mrb[3].mxu1 }
 0x105   : > { %v4525_v58 = vadd.f32 %v2804_v29, %v2803_v3  ;;  %v4527_v42 = vadd.f32 %v2876_v15, %v2875_v47 }
 0x106   : > { %2002 = vmatmul.mubr.bf16.gmra.mrb[108].mxu0 %v4523_v46  ;;  %2759 = vmatmul.mubr.msk.bf16.gmra.mrb[108].mxu1 %vm3603_vm4, %v4275_v61 }
 0x107   : > { %3272 = vmatprep.mubr.bf16.mxu0 %v4080_v24  ;;  %2106 = vmatprep.mubr.bf16.mxu1 %v4279_v59 }
 0x109   : > { %v2806_v63 = vpop.f32.mrb[4].mxu0  ;;  %v2878_v33 = vpop.f32.mrb[4].mxu1 }
 0x10a   : > { %v2807_v43 = vpop.f32.mrb[5].mxu0  ;;  %v2879_v53 = vpop.f32.mrb[5].mxu1 }
 0x10b   : > { %v4535_v51 = vadd.f32 %v2807_v43, %v2806_v63  ;;  %v4537_v10 = vadd.f32 %v2879_v53, %v2878_v33  ;;  %v2809_v41 = vpop.f32.mrb[6].mxu0  ;;  %v2881_v14 = vpop.f32.mrb[6].mxu1 }
 0x10c   : > { %v2810_v30 = vpop.f32.mrb[7].mxu0  ;;  %v2882_v34 = vpop.f32.mrb[7].mxu1 }
 0x10d   : > { %v4539_v57 = vadd.f32 %v2810_v30, %v2809_v41  ;;  %v4541_v49 = vadd.f32 %v2882_v34, %v2881_v14 }
 0x10e   : > { %3273 = vmatmul.mubr.bf16.vlgmr.msra.gmra.mrb[112].mxu0 %v4151_v17  ;;  %2762 = vmatmul.mubr.msk.bf16.gmra.mrb[112].mxu1 %vm3603_vm4, %v4300_v25 }
 0x10f   : > { %3276 = vmatprep.mubr.bf16.mxu0 %v4237_v39  ;;  %2114 = vmatprep.mubr.bf16.mxu1 %v4306_v9 }
 0x111   : > { %v2812_v24 = vpop.f32.mrb[8].mxu0  ;;  %v2884_v61 = vpop.f32.mrb[8].mxu1 }
 0x112   : > { %v2813_v59 = vpop.f32.mrb[9].mxu0  ;;  %v2885_v60 = vpop.f32.mrb[9].mxu1 }
 0x113   : > { %v4549_v20 = vadd.f32 %v2813_v59, %v2812_v24  ;;  %v2815_v28 = vpop.f32.mrb[10].mxu0  ;;  %v4551_v13 = vadd.f32 %v2885_v60, %v2884_v61  ;;  %v2887_v21 = vpop.f32.mrb[10].mxu1 }
 0x114   : > { %v2816_v26 = vpop.f32.mrb[11].mxu0  ;;  %v2888_v62 = vpop.f32.mrb[11].mxu1 }
 0x115   : > { %v4553_v17 = vadd.f32 %v2816_v26, %v2815_v28  ;;  %v4555_v0 = vadd.f32 %v2888_v62, %v2887_v21 }
 0x116   : > { %3277 = vmatmul.mubr.bf16.gmra.mrb[116].mxu0 %v4277_v11  ;;  %2765 = vmatmul.mubr.msk.bf16.gmra.mrb[116].mxu1 %vm3603_vm4, %v4327_v18 }
 0x117   : > { %3280 = vmatprep.mubr.bf16.mxu0 %v4304_v48  ;;  %2122 = vmatprep.mubr.bf16.mxu1 %v5090_v44  ;;  %v4573_v48 = vld [vmem:[%s5011_s4] ss:$0 sm:$0xff] }
 0x118   : > { %v1562_v53 = vadd.f32 %v4519_v16, %v4573_v48  ;;  %v1565_v34 = vadd.f32 %v4525_v58, %v4573_v48 }
 0x119   : > { %v2818_v39 = vpop.f32.mrb[12].mxu0  ;;  %v2890_v9 = vpop.f32.mrb[12].mxu1 }
 0x11a   : > { %v2819_v25 = vpop.f32.mrb[13].mxu0  ;;  %v2891_v31 = vpop.f32.mrb[13].mxu1 }
 0x11b   : > { %v4563_v19 = vadd.f32 %v2819_v25, %v2818_v39  ;;  %v2821_v38 = vpop.f32.mrb[14].mxu0  ;;  %v4565_v40 = vadd.f32 %v2891_v31, %v2890_v9  ;;  %v2893_v3 = vpop.f32.mrb[14].mxu1  ;;  %v1573_v25 = vadd.f32 %v4539_v57, %v4573_v48 }
 0x11c   : > { %v2822_v37 = vpop.f32.mrb[15].mxu0  ;;  %v2894_v47 = vpop.f32.mrb[15].mxu1 }
 0x11d   : > { %v4567_v11 = vadd.f32 %v2822_v37, %v2821_v38  ;;  %v2895_v29 = vadd.f32 %v2894_v47, %v2893_v3 }
 0x11e   : > { %3281 = vmatmul.mubr.bf16.gmra.mrb[120].mxu0 %v4329_v23  ;;  %2768 = vmatmul.mubr.msk.bf16.gmra.mrb[120].mxu1 %vm3603_vm4, %v3591_v1 }
 0x11f   : > { %3284 = vmatprep.mubr.bf16.mxu0 %v4344_v27  ;;  %v4580_v18 = vadd.f32 %v2895_v29, %v4573_v48  ;;  %2130 = vmatprep.mubr.bf16.mxu1 %v5091_v54 }
 0x121   : > { %v2824_v44 = vpop.f32.mrb[16].mxu0  ;;  %v2912_v15 = vpop.f32.mrb[16].mxu1 }
 0x122   : > { %v2825_v63 = vpop.f32.mrb[17].mxu0  ;;  %v2913_v33 = vpop.f32.mrb[17].mxu1 }
 0x123   : > { %v4583_v23 = vadd.f32 %v2825_v63, %v2824_v44  ;;  %v2827_v43 = vpop.f32.mrb[18].mxu0  ;;  %v2914_v41 = vadd.f32 %v2913_v33, %v2912_v15  ;;  %v2915_v14 = vpop.f32.mrb[18].mxu1  ;;  %v1581_v63 = vadd.f32 %v4553_v17, %v4573_v48 }
 0x124   : > { %v2828_v1 = vpop.f32.mrb[19].mxu0  ;;  %v2916_v27 = vpop.f32.mrb[19].mxu1 }
 0x125   : > { %v4587_v30 = vadd.f32 %v2828_v1, %v2827_v43  ;;  %v4591_v54 = vadd.f32 %v2914_v41, %v1562_v53  ;;  %v2917_v24 = vadd.f32 %v2916_v27, %v2915_v14 }
 0x126   : > { %3285 = vmatmul.mubr.bf16.gmra.mrb[124].mxu0 %v4364_v45  ;;  %2771 = vmatmul.mubr.msk.bf16.gmra.mrb[124].mxu1 %vm3603_vm4, %v3673_v55  ;;  %v1570_v45 = vadd.f32 %v4535_v51, %v4573_v48 }
 0x127   : > { %3288 = vmatprep.mubr.bf16.mxu0 %v4383_v12  ;;  %v4598_v16 = vadd.f32 %v2917_v24, %v1565_v34  ;;  %2138 = vmatprep.mubr.bf16.mxu1 %v5092_v56 }
 0x129   : > { %v2830_v61 = vpop.f32.mrb[20].mxu0  ;;  %v2918_v59 = vpop.f32.mrb[20].mxu1 }
 0x12a   : > { %v2831_v60 = vpop.f32.mrb[21].mxu0  ;;  %v2919_v58 = vpop.f32.mrb[21].mxu1 }
 0x12b   : > { %v4601_v28 = vadd.f32 %v2831_v60, %v2830_v61  ;;  %v2833_v21 = vpop.f32.mrb[22].mxu0  ;;  %v2920_v26 = vadd.f32 %v2919_v58, %v2918_v59  ;;  %v2921_v62 = vpop.f32.mrb[22].mxu1  ;;  %v1589_v61 = vadd.f32 %v4567_v11, %v4573_v48  ;;  %v5094_v60 = vld [vmem:[#allocation2_spill] sm:$0xff] }
 0x12c   : > { %v2834_v39 = vpop.f32.mrb[23].mxu0  ;;  %v2922_v12 = vpop.f32.mrb[23].mxu1 }
 0x12d   : > { %v4605_v55 = vadd.f32 %v2834_v39, %v2833_v21  ;;  %v4609_v56 = vadd.f32 %v2920_v26, %v1570_v45  ;;  %v2923_v9 = vadd.f32 %v2922_v12, %v2921_v62 }
 0x12e   : > { %3289 = vmatmul.mubr.bf16.gmra.mrb[128].mxu0 %v4402_v4  ;;  %2774 = vmatmul.mubr.msk.bf16.gmra.mrb[128].mxu1 %vm3603_vm4, %v5080_v22  ;;  %v1578_v4 = vadd.f32 %v4549_v20, %v4573_v48 }
 0x12f   : > { %3292 = vmatprep.mubr.bf16.mxu0 %v4418_v36  ;;  %v4616_v51 = vadd.f32 %v2923_v9, %v1573_v25  ;;  %2146 = vmatprep.mubr.bf16.mxu1 %v5093_v5  ;;  %v1597_v25 = vadd.f32 %v4587_v30, %v4573_v48 }
 0x131   : > { %v2836_v38 = vpop.f32.mrb[24].mxu0  ;;  %v2924_v31 = vpop.f32.mrb[24].mxu1 }
 0x132   : > { %v2837_v37 = vpop.f32.mrb[25].mxu0  ;;  %v2925_v57 = vpop.f32.mrb[25].mxu1 }
 0x133   : > { %v4619_v3 = vadd.f32 %v2837_v37, %v2836_v38  ;;  %v2839_v47 = vpop.f32.mrb[26].mxu0  ;;  %v2926_v29 = vadd.f32 %v2925_v57, %v2924_v31  ;;  %v2927_v44 = vpop.f32.mrb[26].mxu1  ;;  %v5095_v31 = vld [vmem:[#allocation17_spill] sm:$0xff]  ;;  %v5096_v37 = vmov 0.0|0.0  }
 0x134   : > { %v2840_v15 = vpop.f32.mrb[27].mxu0  ;;  %v2928_v36 = vpop.f32.mrb[27].mxu1 }
 0x135   : > { %v4623_v22 = vadd.f32 %v2840_v15, %v2839_v47  ;;  %v4627_v5 = vadd.f32 %v2926_v29, %v1578_v4  ;;  %v2929_v33 = vadd.f32 %v2928_v36, %v2927_v44  ;;  %v1602_v36 = vadd.f32 %v4601_v28, %v4573_v48 }
 0x136   : > { %3293 = vmatmul.mubr.bf16.gmra.mrb[132].mxu0 %v4435_v6  ;;  %2777 = vmatmul.mubr.msk.bf16.gmra.mrb[132].mxu1 %vm3603_vm4, %v5085_v52  ;;  %v1586_v6 = vadd.f32 %v4563_v19, %v4573_v48 }
 0x137   : > { %3296 = vmatprep.mubr.bf16.mxu0 %v4450_v32  ;;  %v4634_v20 = vadd.f32 %v2929_v33, %v1581_v63  ;;  %2154 = vmatprep.mubr.bf16.mxu1 %v4523_v46 }
 0x139   : > { %v2842_v43 = vpop.f32.mrb[28].mxu0  ;;  %v2930_v53 = vpop.f32.mrb[28].mxu1 }
 0x13a   : > { %v2843_v41 = vpop.f32.mrb[29].mxu0  ;;  %v2931_v17 = vpop.f32.mrb[29].mxu1 }
 0x13b   : > { %v4637_v14 = vadd.f32 %v2843_v41, %v2842_v43  ;;  %v2845_v1 = vpop.f32.mrb[30].mxu0  ;;  %v2932_v27 = vadd.f32 %v2931_v17, %v2930_v53  ;;  %v2933_v34 = vpop.f32.mrb[30].mxu1  ;;  %v1605_v41 = vadd.f32 %v4605_v55, %v4573_v48 }
 0x13c   : > { %v2846_v24 = vpop.f32.mrb[31].mxu0  ;;  %v2934_v32 = vpop.f32.mrb[31].mxu1 }
 0x13d   : > { %v4641_v52 = vadd.f32 %v2846_v24, %v2845_v1  ;;  %v4645_v46 = vadd.f32 %v2932_v27, %v1586_v6  ;;  %v2935_v59 = vadd.f32 %v2934_v32, %v2933_v34 }
 0x13e   : > { %3297 = vmatmul.mubr.bf16.gmra.mrb[136].mxu0 %v4319_v50  ;;  %2780 = vmatmul.mubr.msk.bf16.gmra.mrb[136].mxu1 %vm3603_vm4, %v4452_v35  ;;  %v1594_v50 = vadd.f32 %v4583_v23, %v4573_v48 }
 0x13f   : > { %3300 = vmatprep.mubr.bf16.mxu0 %v4509_v2  ;;  %v4652_v19 = vadd.f32 %v2935_v59, %v1589_v61  ;;  %2162 = vmatprep.mubr.bf16.mxu1 %v5094_v60  ;;  %v1610_v59 = vadd.f32 %v4619_v3, %v4573_v48 }
 0x141   : > { %v2848_v58 = vpop.f32.mrb[32].mxu0  ;;  %v2936_v21 = vpop.f32.mrb[32].mxu1 }
 0x142   : > { %v2849_v45 = vpop.f32.mrb[33].mxu0  ;;  %v2937_v11 = vpop.f32.mrb[33].mxu1 }
 0x143   : > { %v4655_v26 = vadd.f32 %v2849_v45, %v2848_v58  ;;  %v2851_v62 = vpop.f32.mrb[34].mxu0  ;;  %v2938_v39 = vadd.f32 %v2937_v11, %v2936_v21  ;;  %v2939_v12 = vpop.f32.mrb[34].mxu1  ;;  %v1613_v11 = vadd.f32 %v4623_v22, %v4573_v48 }
 0x144   : > { %v2852_v8 = vpop.f32.mrb[35].mxu0  ;;  %v2940_v2 = vpop.f32.mrb[35].mxu1 }
 0x145   : > { %v4659_v35 = vadd.f32 %v2852_v8, %v2851_v62  ;;  %v4663_v9 = vadd.f32 %v2938_v39, %v1594_v50  ;;  %v2941_v38 = vadd.f32 %v2940_v2, %v2939_v12 }
 0x146   : > { %3301 = vmatmul.mubr.bf16.gmra.mrb[140].mxu0 %v5095_v31  ;;  %2163 = vmatmul.mubr.bf16.gmra.mrb[140].mxu1 %v5096_v37  ;;  %v1618_v31 = vadd.f32 %v4637_v14, %v4573_v48 }
 0x147   : > { %v4667_v57 = vadd.f32 %v2941_v38, %v1597_v25 }
 0x149   : > { %v2854_v47 = vpop.f32.mrb[36].mxu0  ;;  %v2942_v23 = vpop.f32.mrb[36].mxu1 }
 0x14a   : > { %v2855_v4 = vpop.f32.mrb[37].mxu0  ;;  %v2943_v44 = vpop.f32.mrb[37].mxu1 }
 0x14b   : > { %v4669_v29 = vadd.f32 %v2855_v4, %v2854_v47  ;;  %v2857_v15 = vpop.f32.mrb[38].mxu0  ;;  %v2944_v30 = vadd.f32 %v2943_v44, %v2942_v23  ;;  %v2945_v63 = vpop.f32.mrb[38].mxu1  ;;  %v1621_v44 = vadd.f32 %v4641_v52, %v4573_v48 }
 0x14c   : > { %v2858_v33 = vpop.f32.mrb[39].mxu0  ;;  %v2946_v53 = vpop.f32.mrb[39].mxu1 }
 0x14d   : > { %v4673_v43 = vadd.f32 %v2858_v33, %v2857_v15  ;;  %v4677_v17 = vadd.f32 %v2944_v30, %v1602_v36  ;;  %v2947_v1 = vadd.f32 %v2946_v53, %v2945_v63 }
 0x14f   : > { %v4679_v6 = vadd.f32 %v2947_v1, %v1605_v41 }
 0x151   : > { %v2860_v27 = vpop.f32.mrb[40].mxu0  ;;  %v2948_v34 = vpop.f32.mrb[40].mxu1 }
 0x152   : > { %v2861_v24 = vpop.f32.mrb[41].mxu0  ;;  %v2949_v28 = vpop.f32.mrb[41].mxu1 }
 0x153   : > { %v4681_v32 = vadd.f32 %v2861_v24, %v2860_v27  ;;  %v2863_v61 = vpop.f32.mrb[42].mxu0  ;;  %v2950_v60 = vadd.f32 %v2949_v28, %v2948_v34  ;;  %v2951_v58 = vpop.f32.mrb[42].mxu1  ;;  %v1626_v27 = vadd.f32 %v4655_v26, %v4573_v48 }
 0x154   : > { %v2864_v21 = vpop.f32.mrb[43].mxu0  ;;  %v2952_v55 = vpop.f32.mrb[43].mxu1 }
 0x155   : > { %v4685_v45 = vadd.f32 %v2864_v21, %v2863_v61  ;;  %v4689_v62 = vadd.f32 %v2950_v60, %v1610_v59  ;;  %v2953_v50 = vadd.f32 %v2952_v55, %v2951_v58  ;;  %v1629_v60 = vadd.f32 %v4659_v35, %v4573_v48 }
 0x157   : > { %v4691_v39 = vadd.f32 %v2953_v50, %v1613_v11 }
 0x159   : > { %v2866_v12 = vpop.f32.mrb[44].mxu0  ;;  %v2954_v8 = vpop.f32.mrb[44].mxu1 }
 0x15a   : > { %v2867_v2 = vpop.f32.mrb[45].mxu0  ;;  %v2955_v3 = vpop.f32.mrb[45].mxu1 }
 0x15b   : > { %v4693_v25 = vadd.f32 %v2867_v2, %v2866_v12  ;;  %v2869_v38 = vpop.f32.mrb[46].mxu0  ;;  %v2956_v37 = vadd.f32 %v2955_v3, %v2954_v8  ;;  %v2957_v47 = vpop.f32.mrb[46].mxu1  ;;  %v1634_v3 = vadd.f32 %v4669_v29, %v4573_v48 }
 0x15c   : > { %v2870_v23 = vpop.f32.mrb[47].mxu0  ;;  %v2958_v22 = vpop.f32.mrb[47].mxu1 }
 0x15d   : > { %v4697_v4 = vadd.f32 %v2870_v23, %v2869_v38  ;;  %v4701_v15 = vadd.f32 %v2956_v37, %v1618_v31  ;;  %v2959_v36 = vadd.f32 %v2958_v22, %v2957_v47  ;;  %v1637_v23 = vadd.f32 %v4673_v43, %v4573_v48 }
 0x15f   : > { %v4703_v30 = vadd.f32 %v2959_v36, %v1621_v44 }
 0x161   : > { %v3024_v63 = vpop.f32.mrb[48].mxu0  ;;  %v2960_v33 = vpop.f32.mrb[48].mxu1 }
 0x162   : > { %v3025_v53 = vpop.f32.mrb[49].mxu0  ;;  %v2961_v41 = vpop.f32.mrb[49].mxu1 }
 0x163   : > { %v3026_v1 = vadd.f32 %v3025_v53, %v3024_v63  ;;  %v3027_v14 = vpop.f32.mrb[50].mxu0  ;;  %v2962_v34 = vadd.f32 %v2961_v41, %v2960_v33  ;;  %v2963_v24 = vpop.f32.mrb[50].mxu1 }
 0x164   : > { %v3028_v28 = vpop.f32.mrb[51].mxu0  ;;  %v2964_v52 = vpop.f32.mrb[51].mxu1 }
 0x165   : > { %v4708_v61 = vadd.f32 %v3026_v1, %v4591_v54  ;;  %v3029_v59 = vadd.f32 %v3028_v28, %v3027_v14  ;;  %v4712_v58 = vadd.f32 %v2962_v34, %v1626_v27  ;;  %v2965_v21 = vadd.f32 %v2964_v52, %v2963_v24 }
 0x166   : > { %v1642_v14 = vadd.f32 %v4681_v32, %v4573_v48  ;;  %v1645_v52 = vadd.f32 %v4685_v45, %v4573_v48 }
 0x167   : > { %v4715_v55 = vadd.f32 %v3029_v59, %v4598_v16  ;;  %v4717_v11 = vadd.f32 %v2965_v21, %v1629_v60 }
 0x169   : > { %v3030_v26 = vpop.f32.mrb[52].mxu0  ;;  %v2966_v50 = vpop.f32.mrb[52].mxu1 }
 0x16a   : > { %v3031_v12 = vpop.f32.mrb[53].mxu0  ;;  %v2967_v8 = vpop.f32.mrb[53].mxu1 }
 0x16b   : > { %v3032_v2 = vadd.f32 %v3031_v12, %v3030_v26  ;;  %v3033_v54 = vpop.f32.mrb[54].mxu0  ;;  %v2968_v38 = vadd.f32 %v2967_v8, %v2966_v50  ;;  %v2969_v31 = vpop.f32.mrb[54].mxu1 }
 0x16c   : > { %v3034_v35 = vpop.f32.mrb[55].mxu0  ;;  %v2970_v47 = vpop.f32.mrb[55].mxu1 }
 0x16d   : > { %v4722_v37 = vadd.f32 %v3032_v2, %v4609_v56  ;;  %v3035_v16 = vadd.f32 %v3034_v35, %v3033_v54  ;;  %v4726_v22 = vadd.f32 %v2968_v38, %v1634_v3  ;;  %v2971_v44 = vadd.f32 %v2970_v47, %v2969_v31 }
 0x16e   : > { %v1650_v54 = vadd.f32 %v4693_v25, %v4573_v48  ;;  %v1653_v47 = vadd.f32 %v4697_v4, %v4573_v48 }
 0x16f   : > { %v4729_v36 = vadd.f32 %v3035_v16, %v4616_v51  ;;  %v4731_v63 = vadd.f32 %v2971_v44, %v1637_v23 }
 0x171   : > { %v3036_v29 = vpop.f32.mrb[56].mxu0  ;;  %v2972_v33 = vpop.f32.mrb[56].mxu1 }
 0x172   : > { %v3037_v53 = vpop.f32.mrb[57].mxu0  ;;  %v2973_v41 = vpop.f32.mrb[57].mxu1 }
 0x173   : > { %v3038_v1 = vadd.f32 %v3037_v53, %v3036_v29  ;;  %v3039_v56 = vpop.f32.mrb[58].mxu0  ;;  %v2974_v27 = vadd.f32 %v2973_v41, %v2972_v33  ;;  %v2975_v34 = vpop.f32.mrb[58].mxu1 }
 0x174   : > { %v3040_v43 = vpop.f32.mrb[59].mxu0  ;;  %v2976_v28 = vpop.f32.mrb[59].mxu1 }
 0x175   : > { %v4736_v24 = vadd.f32 %v3038_v1, %v4627_v5  ;;  %v3041_v51 = vadd.f32 %v3040_v43, %v3039_v56  ;;  %v4740_v59 = vadd.f32 %v2974_v27, %v1642_v14  ;;  %v2977_v60 = vadd.f32 %v2976_v28, %v2975_v34 }
 0x176   : > { %v1658_v56 = vadd.f32 %v4521_v7, %v4573_v48  ;;  %v1661_v28 = vadd.f32 %v4527_v42, %v4573_v48 }
 0x177   : > { %v4743_v21 = vadd.f32 %v3041_v51, %v4634_v20  ;;  %v4745_v26 = vadd.f32 %v2977_v60, %v1645_v52 }
 0x179   : > { %v3042_v32 = vpop.f32.mrb[60].mxu0  ;;  %v2978_v50 = vpop.f32.mrb[60].mxu1 }
 0x17a   : > { %v3043_v12 = vpop.f32.mrb[61].mxu0  ;;  %v2979_v8 = vpop.f32.mrb[61].mxu1 }
 0x17b   : > { %v3044_v2 = vadd.f32 %v3043_v12, %v3042_v32  ;;  %v3045_v5 = vpop.f32.mrb[62].mxu0  ;;  %v2980_v3 = vadd.f32 %v2979_v8, %v2978_v50  ;;  %v2981_v38 = vpop.f32.mrb[62].mxu1 }
 0x17c   : > { %v3046_v45 = vpop.f32.mrb[63].mxu0  ;;  %v2982_v35 = vpop.f32.mrb[63].mxu1 }
 0x17d   : > { %v4750_v31 = vadd.f32 %v3044_v2, %v4645_v46  ;;  %v3047_v20 = vadd.f32 %v3046_v45, %v3045_v5  ;;  %v4754_v16 = vadd.f32 %v2980_v3, %v1650_v54  ;;  %v2983_v23 = vadd.f32 %v2982_v35, %v2981_v38 }
 0x17e   : > { %v1666_v5 = vadd.f32 %v4537_v10, %v4573_v48  ;;  %v1669_v35 = vadd.f32 %v4541_v49, %v4573_v48 }
 0x17f   : > { %v4757_v44 = vadd.f32 %v3047_v20, %v4652_v19  ;;  %v4759_v29 = vadd.f32 %v2983_v23, %v1653_v47 }
 0x181   : > { %v3048_v25 = vpop.f32.mrb[64].mxu0  ;;  %v2984_v33 = vpop.f32.mrb[64].mxu1 }
 0x182   : > { %v3049_v53 = vpop.f32.mrb[65].mxu0  ;;  %v2985_v41 = vpop.f32.mrb[65].mxu1 }
 0x183   : > { %v3050_v1 = vadd.f32 %v3049_v53, %v3048_v25  ;;  %v3051_v46 = vpop.f32.mrb[66].mxu0  ;;  %v2986_v14 = vadd.f32 %v2985_v41, %v2984_v33  ;;  %v2987_v27 = vpop.f32.mrb[66].mxu1 }
 0x184   : > { %v3052_v4 = vpop.f32.mrb[67].mxu0  ;;  %v2988_v43 = vpop.f32.mrb[67].mxu1 }
 0x185   : > { %v4764_v34 = vadd.f32 %v3050_v1, %v4663_v9  ;;  %v3053_v19 = vadd.f32 %v3052_v4, %v3051_v46  ;;  %v4768_v51 = vadd.f32 %v2986_v14, %v1658_v56  ;;  %v2989_v52 = vadd.f32 %v2988_v43, %v2987_v27 }
 0x186   : > { %v1674_v46 = vadd.f32 %v4551_v13, %v4573_v48  ;;  %v1677_v43 = vadd.f32 %v4555_v0, %v4573_v48 }
 0x187   : > { %v4771_v60 = vadd.f32 %v3053_v19, %v4667_v57  ;;  %v4773_v32 = vadd.f32 %v2989_v52, %v1661_v28 }
 0x189   : > { %v3054_v7 = vpop.f32.mrb[68].mxu0  ;;  %v2990_v50 = vpop.f32.mrb[68].mxu1 }
 0x18a   : > { %v3055_v12 = vpop.f32.mrb[69].mxu0  ;;  %v2991_v8 = vpop.f32.mrb[69].mxu1 }
 0x18b   : > { %v3056_v2 = vadd.f32 %v3055_v12, %v3054_v7  ;;  %v3057_v9 = vpop.f32.mrb[70].mxu0  ;;  %v2992_v54 = vadd.f32 %v2991_v8, %v2990_v50  ;;  %v2993_v3 = vpop.f32.mrb[70].mxu1 }
 0x18c   : > { %v3058_v42 = vpop.f32.mrb[71].mxu0  ;;  %v2994_v45 = vpop.f32.mrb[71].mxu1 }
 0x18d   : > { %v4778_v38 = vadd.f32 %v3056_v2, %v4677_v17  ;;  %v3059_v57 = vadd.f32 %v3058_v42, %v3057_v9  ;;  %v4782_v20 = vadd.f32 %v2992_v54, %v1666_v5  ;;  %v2995_v47 = vadd.f32 %v2994_v45, %v2993_v3 }
 0x18e   : > { %v1682_v9 = vadd.f32 %v4565_v40, %v4573_v48 }
 0x18f   : > { %v4785_v23 = vadd.f32 %v3059_v57, %v4679_v6  ;;  %v4787_v25 = vadd.f32 %v2995_v47, %v1669_v35 }
 0x191   : > { %v3060_v10 = vpop.f32.mrb[72].mxu0  ;;  %v2996_v33 = vpop.f32.mrb[72].mxu1 }
 0x192   : > { %v3061_v53 = vpop.f32.mrb[73].mxu0  ;;  %v2997_v41 = vpop.f32.mrb[73].mxu1 }
 0x193   : > { %v3062_v1 = vadd.f32 %v3061_v53, %v3060_v10  ;;  %v3063_v17 = vpop.f32.mrb[74].mxu0  ;;  %v2998_v56 = vadd.f32 %v2997_v41, %v2996_v33  ;;  %v2999_v14 = vpop.f32.mrb[74].mxu1 }
 0x194   : > { %v3064_v49 = vpop.f32.mrb[75].mxu0  ;;  %v3000_v4 = vpop.f32.mrb[75].mxu1 }
 0x195   : > { %v4792_v27 = vadd.f32 %v3062_v1, %v4689_v62  ;;  %v3065_v6 = vadd.f32 %v3064_v49, %v3063_v17  ;;  %v4796_v19 = vadd.f32 %v2998_v56, %v1674_v46  ;;  %v3001_v28 = vadd.f32 %v3000_v4, %v2999_v14 }
 0x197   : > { %v4799_v52 = vadd.f32 %v3065_v6, %v4691_v39  ;;  %v4801_v7 = vadd.f32 %v3001_v28, %v1677_v43 }
 0x199   : > { %v3066_v13 = vpop.f32.mrb[76].mxu0  ;;  %v3002_v50 = vpop.f32.mrb[76].mxu1 }
 0x19a   : > { %v3067_v12 = vpop.f32.mrb[77].mxu0  ;;  %v3003_v8 = vpop.f32.mrb[77].mxu1 }
 0x19b   : > { %v3068_v2 = vadd.f32 %v3067_v12, %v3066_v13  ;;  %v3069_v62 = vpop.f32.mrb[78].mxu0  ;;  %v3004_v5 = vadd.f32 %v3003_v8, %v3002_v50  ;;  %v3005_v54 = vpop.f32.mrb[78].mxu1 }
 0x19c   : > { %v3070_v0 = vpop.f32.mrb[79].mxu0  ;;  %v3006_v42 = vpop.f32.mrb[79].mxu1 }
 0x19d   : > { %v4806_v3 = vadd.f32 %v3068_v2, %v4701_v15  ;;  %v3071_v39 = vadd.f32 %v3070_v0, %v3069_v62  ;;  %v4808_v45 = vadd.f32 %v3004_v5, %v1682_v9  ;;  %v3007_v57 = vadd.f32 %v3006_v42, %v3005_v54 }
 0x19f   : > { %v4811_v35 = vadd.f32 %v3071_v39, %v4703_v30  ;;  %v4814_v47 = vadd.f32 %v3007_v57, %v4580_v18 }
 0x1a1   : > { %v3072_v10 = vpop.f32.mrb[80].mxu0  ;;  %v3136_v33 = vpop.f32.mrb[80].mxu1 }
 0x1a2   : > { %v3073_v40 = vpop.f32.mrb[81].mxu0  ;;  %v3137_v53 = vpop.f32.mrb[81].mxu1 }
 0x1a3   : > { %v3074_v48 = vadd.f32 %v3073_v40, %v3072_v10  ;;  %v3075_v41 = vpop.f32.mrb[82].mxu0  ;;  %v3138_v1 = vadd.f32 %v3137_v53, %v3136_v33  ;;  %v3139_v15 = vpop.f32.mrb[82].mxu1 }
 0x1a4   : > { %v3076_v17 = vpop.f32.mrb[83].mxu0  ;;  %v3140_v14 = vpop.f32.mrb[83].mxu1 }
 0x1a5   : > { %v4817_v46 = vadd.f32 %v3074_v48, %v4712_v58  ;;  %v3077_v56 = vadd.f32 %v3076_v17, %v3075_v41  ;;  %v3141_v49 = vadd.f32 %v3140_v14, %v3139_v15  ;;  %v4820_v30 = vadd.f32 %v3138_v1, %v4708_v61 }
 0x1a7   : > { %v4823_v18 = vadd.f32 %v3077_v56, %v4717_v11  ;;  %v4826_v4 = vadd.f32 %v3141_v49, %v4715_v55 }
 0x1a9   : > { %v3078_v6 = vpop.f32.mrb[84].mxu0  ;;  %v3142_v43 = vpop.f32.mrb[84].mxu1 }
 0x1aa   : > { %v3079_v28 = vpop.f32.mrb[85].mxu0  ;;  %v3143_v50 = vpop.f32.mrb[85].mxu1 }
 0x1ab   : > { %v3080_v13 = vadd.f32 %v3079_v28, %v3078_v6  ;;  %v3081_v12 = vpop.f32.mrb[86].mxu0  ;;  %v3144_v58 = vadd.f32 %v3143_v50, %v3142_v43  ;;  %v3145_v8 = vpop.f32.mrb[86].mxu1 }
 0x1ac   : > { %v3082_v2 = vpop.f32.mrb[87].mxu0  ;;  %v3146_v9 = vpop.f32.mrb[87].mxu1 }
 0x1ad   : > { %v4829_v62 = vadd.f32 %v3080_v13, %v4726_v22  ;;  %v3083_v61 = vadd.f32 %v3082_v2, %v3081_v12  ;;  %v3147_v5 = vadd.f32 %v3146_v9, %v3145_v8  ;;  %v4832_v11 = vadd.f32 %v3144_v58, %v4722_v37 }
 0x1af   : > { %v4835_v55 = vadd.f32 %v3083_v61, %v4731_v63  ;;  %v4838_v54 = vadd.f32 %v3147_v5, %v4729_v36 }
 0x1b1   : > { %v3084_v0 = vpop.f32.mrb[88].mxu0  ;;  %v3148_v42 = vpop.f32.mrb[88].mxu1 }
 0x1b2   : > { %v3085_v39 = vpop.f32.mrb[89].mxu0  ;;  %v3149_v10 = vpop.f32.mrb[89].mxu1 }
 0x1b3   : > { %v3086_v57 = vadd.f32 %v3085_v39, %v3084_v0  ;;  %v3087_v33 = vpop.f32.mrb[90].mxu0  ;;  %v3150_v22 = vadd.f32 %v3149_v10, %v3148_v42  ;;  %v3151_v40 = vpop.f32.mrb[90].mxu1 }
 0x1b4   : > { %v3088_v48 = vpop.f32.mrb[91].mxu0  ;;  %v3152_v41 = vpop.f32.mrb[91].mxu1 }
 0x1b5   : > { %v4841_v53 = vadd.f32 %v3086_v57, %v4740_v59  ;;  %v3089_v37 = vadd.f32 %v3088_v48, %v3087_v33  ;;  %v3153_v1 = vadd.f32 %v3152_v41, %v3151_v40  ;;  %v4844_v63 = vadd.f32 %v3150_v22, %v4736_v24 }
 0x1b7   : > { %v4847_v36 = vadd.f32 %v3089_v37, %v4745_v26  ;;  %v4850_v15 = vadd.f32 %v3153_v1, %v4743_v21 }
 0x1b9   : > { %v3090_v17 = vpop.f32.mrb[92].mxu0  ;;  %v3154_v56 = vpop.f32.mrb[92].mxu1 }
 0x1ba   : > { %v3091_v14 = vpop.f32.mrb[93].mxu0  ;;  %v3155_v6 = vpop.f32.mrb[93].mxu1 }
 0x1bb   : > { %v3092_v49 = vadd.f32 %v3091_v14, %v3090_v17  ;;  %v3093_v43 = vpop.f32.mrb[94].mxu0  ;;  %v3156_v59 = vadd.f32 %v3155_v6, %v3154_v56  ;;  %v3157_v28 = vpop.f32.mrb[94].mxu1 }
 0x1bc   : > { %v3094_v13 = vpop.f32.mrb[95].mxu0  ;;  %v3158_v12 = vpop.f32.mrb[95].mxu1 }
 0x1bd   : > { %v4853_v50 = vadd.f32 %v3092_v49, %v4754_v16  ;;  %v3095_v24 = vadd.f32 %v3094_v13, %v3093_v43  ;;  %v3159_v58 = vadd.f32 %v3158_v12, %v3157_v28  ;;  %v4856_v26 = vadd.f32 %v3156_v59, %v4750_v31 }
 0x1bf   : > { %v4859_v21 = vadd.f32 %v3095_v24, %v4759_v29  ;;  %v4862_v8 = vadd.f32 %v3159_v58, %v4757_v44 }
 0x1c1   : > { %v3096_v2 = vpop.f32.mrb[96].mxu0  ;;  %v3160_v61 = vpop.f32.mrb[96].mxu1 }
 0x1c2   : > { %v3097_v9 = vpop.f32.mrb[97].mxu0  ;;  %v3161_v0 = vpop.f32.mrb[97].mxu1 }
 0x1c3   : > { %v3098_v5 = vadd.f32 %v3097_v9, %v3096_v2  ;;  %v3099_v42 = vpop.f32.mrb[98].mxu0  ;;  %v3162_v16 = vadd.f32 %v3161_v0, %v3160_v61  ;;  %v3163_v39 = vpop.f32.mrb[98].mxu1 }
 0x1c4   : > { %v3100_v57 = vpop.f32.mrb[99].mxu0  ;;  %v3164_v33 = vpop.f32.mrb[99].mxu1 }
 0x1c5   : > { %v4865_v10 = vadd.f32 %v3098_v5, %v4768_v51  ;;  %v3101_v31 = vadd.f32 %v3100_v57, %v3099_v42  ;;  %v3165_v22 = vadd.f32 %v3164_v33, %v3163_v39  ;;  %v4868_v29 = vadd.f32 %v3162_v16, %v4764_v34 }
 0x1c7   : > { %v4871_v44 = vadd.f32 %v3101_v31, %v4773_v32  ;;  %v4874_v40 = vadd.f32 %v3165_v22, %v4771_v60 }
 0x1c9   : > { %v3102_v48 = vpop.f32.mrb[100].mxu0  ;;  %v3166_v37 = vpop.f32.mrb[100].mxu1 }
 0x1ca   : > { %v3103_v41 = vpop.f32.mrb[101].mxu0  ;;  %v3167_v17 = vpop.f32.mrb[101].mxu1 }
 0x1cb   : > { %v3104_v1 = vadd.f32 %v3103_v41, %v3102_v48  ;;  %v3105_v56 = vpop.f32.mrb[102].mxu0  ;;  %v3168_v51 = vadd.f32 %v3167_v17, %v3166_v37  ;;  %v3169_v14 = vpop.f32.mrb[102].mxu1 }
 0x1cc   : > { %v3106_v49 = vpop.f32.mrb[103].mxu0  ;;  %v3170_v43 = vpop.f32.mrb[103].mxu1 }
 0x1cd   : > { %v4877_v6 = vadd.f32 %v3104_v1, %v4782_v20  ;;  %v3107_v34 = vadd.f32 %v3106_v49, %v3105_v56  ;;  %v3171_v59 = vadd.f32 %v3170_v43, %v3169_v14  ;;  %v4880_v32 = vadd.f32 %v3168_v51, %v4778_v38 }
 0x1cf   : > { %v4883_v60 = vadd.f32 %v3107_v34, %v4787_v25  ;;  %v4886_v28 = vadd.f32 %v3171_v59, %v4785_v23 }
 0x1d1   : > { %v3108_v13 = vpop.f32.mrb[104].mxu0  ;;  %v3172_v24 = vpop.f32.mrb[104].mxu1 }
 0x1d2   : > { %v3109_v12 = vpop.f32.mrb[105].mxu0  ;;  %v3173_v2 = vpop.f32.mrb[105].mxu1 }
 0x1d3   : > { %v3110_v58 = vadd.f32 %v3109_v12, %v3108_v13  ;;  %v3111_v61 = vpop.f32.mrb[106].mxu0  ;;  %v3174_v20 = vadd.f32 %v3173_v2, %v3172_v24  ;;  %v3175_v9 = vpop.f32.mrb[106].mxu1 }
 0x1d4   : > { %v3112_v5 = vpop.f32.mrb[107].mxu0  ;;  %v3176_v42 = vpop.f32.mrb[107].mxu1 }
 0x1d5   : > { %v4889_v0 = vadd.f32 %v3110_v58, %v4796_v19  ;;  %v3113_v38 = vadd.f32 %v3112_v5, %v3111_v61  ;;  %v3177_v16 = vadd.f32 %v3176_v42, %v3175_v9  ;;  %v4892_v25 = vadd.f32 %v3174_v20, %v4792_v27 }
 0x1d7   : > { %v4895_v23 = vadd.f32 %v3113_v38, %v4801_v7  ;;  %v4898_v39 = vadd.f32 %v3177_v16, %v4799_v52 }
 0x1d9   : > { %v3114_v57 = vpop.f32.mrb[108].mxu0  ;;  %v3178_v31 = vpop.f32.mrb[108].mxu1 }
 0x1da   : > { %v3115_v33 = vpop.f32.mrb[109].mxu0  ;;  %v3179_v48 = vpop.f32.mrb[109].mxu1 }
 0x1db   : > { %v3116_v22 = vadd.f32 %v3115_v33, %v3114_v57  ;;  %v3117_v19 = vpop.f32.mrb[110].mxu0  ;;  %v3180_v37 = vadd.f32 %v3179_v48, %v3178_v31  ;;  %v3181_v41 = vpop.f32.mrb[110].mxu1 }
 0x1dc   : > { %v3118_v1 = vpop.f32.mrb[111].mxu0  ;;  %v3182_v56 = vpop.f32.mrb[111].mxu1 }
 0x1dd   : > { %v4901_v17 = vadd.f32 %v3116_v22, %v4808_v45  ;;  %v3119_v27 = vadd.f32 %v3118_v1, %v3117_v19  ;;  %v3183_v51 = vadd.f32 %v3182_v56, %v3181_v41  ;;  %v4905_v7 = vadd.f32 %v3180_v37, %v4806_v3 }
 0x1df   : > { %v4908_v52 = vadd.f32 %v3119_v27, %v4814_v47  ;;  %v4911_v14 = vadd.f32 %v3183_v51, %v4811_v35 }
 0x1e1   : > { %v3274_v45 = vpop.f32.mrb[112].mxu0  ;;  %v3184_v49 = vpop.f32.mrb[112].mxu1 }
 0x1e2   : > { %v2214_v34 = vadd.f32 %v3274_v45, %v4832_v11  ;;  %v2205_v3 = vpop.f32.mrb[113].mxu0  ;;  %v3185_v43 = vpop.f32.mrb[113].mxu1 }
 0x1e3   : > { %v2206_v47 = vadd.f32 %v2205_v3, %v4820_v30  ;;  %v3275_v59 = vpop.f32.mrb[114].mxu0  ;;  %v3186_v35 = vadd.f32 %v3185_v43, %v3184_v49  ;;  %v3187_v13 = vpop.f32.mrb[114].mxu1 }
 0x1e4   : > { %2334 = vst [vmem:[%s4916_s11 + $0x10] sm:$0xff] %v2214_v34  ;;  %v2217_v24 = vadd.f32 %v3275_v59, %v4838_v54  ;;  %v2208_v12 = vpop.f32.mrb[115].mxu0  ;;  %v3188_v58 = vpop.f32.mrb[115].mxu1  ;;  %v2403_v38 = vmul.f32 %v2214_v34, %v2214_v34 }
 0x1e5   : > { %2332 = vst [vmem:[%s4916_s11] sm:$0xff] %v2206_v47  ;;  %v2209_v2 = vadd.f32 %v2208_v12, %v4826_v4  ;;  %v3189_v61 = vadd.f32 %v3188_v58, %v3187_v13  ;;  %v4926_v11 = vadd.f32 %v3186_v35, %v4817_v46  ;;  %v2401_v20 = vmul.f32 %v2206_v47, %v2206_v47 }
 0x1e6   : > { %2335 = vst [vmem:[%s4916_s11 + $0x18] sm:$0xff] %v2217_v24  ;;  %v2404_v33 = vmul.f32 %v2217_v24, %v2217_v24 }
 0x1e7   : > { %2333 = vst [vmem:[%s4916_s11 + $0x8] sm:$0xff] %v2209_v2  ;;  %v2364_v9 = vadd.f32 %v2209_v2, %v2206_v47  ;;  %v2402_v30 = vmul.f32 %v2209_v2, %v2209_v2  ;;  %v4930_v5 = vadd.f32 %v3189_v61, %v4823_v18 }
 0x1e9   : > { %v2365_v54 = vadd.f32 %v2364_v9, %v2214_v34  ;;  %v2433_v42 = vadd.f32 %v2402_v30, %v2401_v20  ;;  %v3278_v16 = vpop.f32.mrb[116].mxu0  ;;  %v3190_v57 = vpop.f32.mrb[116].mxu1 }
 0x1ea   : > { %v2230_v4 = vadd.f32 %v3278_v16, %v4856_v26  ;;  %v2221_v31 = vpop.f32.mrb[117].mxu0  ;;  %v3191_v22 = vpop.f32.mrb[117].mxu1 }
 0x1eb   : > { %v2434_v46 = vadd.f32 %v2433_v42, %v2403_v38  ;;  %v2222_v48 = vadd.f32 %v2221_v31, %v4844_v63  ;;  %v2366_v19 = vadd.f32 %v2365_v54, %v2217_v24  ;;  %v3279_v37 = vpop.f32.mrb[118].mxu0  ;;  %v3192_v18 = vadd.f32 %v3191_v22, %v3190_v57  ;;  %v3193_v41 = vpop.f32.mrb[118].mxu1 }
 0x1ec   : > { %2338 = vst [vmem:[%s4916_s11 + $0x30] sm:$0xff] %v2230_v4  ;;  %v2233_v1 = vadd.f32 %v3279_v37, %v4862_v8  ;;  %v2224_v27 = vpop.f32.mrb[119].mxu0  ;;  %v3194_v45 = vpop.f32.mrb[119].mxu1  ;;  %v2407_v59 = vmul.f32 %v2230_v4, %v2230_v4 }
 0x1ed   : > { %2336 = vst [vmem:[%s4916_s11 + $0x20] sm:$0xff] %v2222_v48  ;;  %v2367_v56 = vadd.f32 %v2366_v19, %v2222_v48  ;;  %v2405_v51 = vmul.f32 %v2222_v48, %v2222_v48  ;;  %v2435_v26 = vadd.f32 %v2434_v46, %v2404_v33  ;;  %v2225_v49 = vadd.f32 %v2224_v27, %v4850_v15 }
 0x1ee   : > { %2339 = vst [vmem:[%s4916_s11 + $0x38] sm:$0xff] %v2233_v1  ;;  %v3195_v34 = vadd.f32 %v3194_v45, %v3193_v41  ;;  %v4940_v63 = vadd.f32 %v3192_v18, %v4829_v62  ;;  %v2408_v2 = vmul.f32 %v2233_v1, %v2233_v1 }
 0x1ef   : > { %v2436_v3 = vadd.f32 %v2435_v26, %v2405_v51  ;;  %2337 = vst [vmem:[%s4916_s11 + $0x28] sm:$0xff] %v2225_v49  ;;  %v2368_v43 = vadd.f32 %v2367_v56, %v2225_v49  ;;  %v2406_v47 = vmul.f32 %v2225_v49, %v2225_v49 }
 0x1f0   : > { %v4944_v8 = vadd.f32 %v3195_v34, %v4835_v55 }
 0x1f1   : > { %v2369_v35 = vadd.f32 %v2368_v43, %v2230_v4  ;;  %v2437_v13 = vadd.f32 %v2436_v3, %v2406_v47  ;;  %v3282_v24 = vpop.f32.mrb[120].mxu0  ;;  %v3196_v12 = vpop.f32.mrb[120].mxu1 }
 0x1f2   : > { %v2246_v15 = vadd.f32 %v3282_v24, %v4880_v32  ;;  %v2237_v58 = vpop.f32.mrb[121].mxu0  ;;  %v3197_v61 = vpop.f32.mrb[121].mxu1 }
 0x1f3   : > { %v2438_v62 = vadd.f32 %v2437_v13, %v2407_v59  ;;  %v2238_v20 = vadd.f32 %v2237_v58, %v4868_v29  ;;  %v2370_v9 = vadd.f32 %v2369_v35, %v2233_v1  ;;  %v3283_v30 = vpop.f32.mrb[122].mxu0  ;;  %v3198_v55 = vadd.f32 %v3197_v61, %v3196_v12  ;;  %v3199_v38 = vpop.f32.mrb[122].mxu1 }
 0x1f4   : > { %2342 = vst [vmem:[%s4916_s11 + $0x50] sm:$0xff] %v2246_v15  ;;  %v2249_v54 = vadd.f32 %v3283_v30, %v4886_v28  ;;  %v2240_v42 = vpop.f32.mrb[123].mxu0  ;;  %v3200_v4 = vpop.f32.mrb[123].mxu1  ;;  %v2411_v19 = vmul.f32 %v2246_v15, %v2246_v15 }
 0x1f5   : > { %2340 = vst [vmem:[%s4916_s11 + $0x40] sm:$0xff] %v2238_v20  ;;  %v2371_v16 = vadd.f32 %v2370_v9, %v2238_v20  ;;  %v2409_v57 = vmul.f32 %v2238_v20, %v2238_v20  ;;  %v2439_v32 = vadd.f32 %v2438_v62, %v2408_v2  ;;  %v2241_v31 = vadd.f32 %v2240_v42, %v4874_v40 }
 0x1f6   : > { %2343 = vst [vmem:[%s4916_s11 + $0x58] sm:$0xff] %v2249_v54  ;;  %v3201_v33 = vadd.f32 %v3200_v4, %v3199_v38  ;;  %v4954_v29 = vadd.f32 %v3198_v55, %v4841_v53  ;;  %v2412_v56 = vmul.f32 %v2249_v54, %v2249_v54 }
 0x1f7   : > { %v2440_v46 = vadd.f32 %v2439_v32, %v2409_v57  ;;  %2341 = vst [vmem:[%s4916_s11 + $0x48] sm:$0xff] %v2241_v31  ;;  %v2372_v22 = vadd.f32 %v2371_v16, %v2241_v31  ;;  %v2410_v48 = vmul.f32 %v2241_v31, %v2241_v31 }
 0x1f8   : > { %v4958_v28 = vadd.f32 %v3201_v33, %v4847_v36 }
 0x1f9   : > { %v2373_v37 = vadd.f32 %v2372_v22, %v2246_v15  ;;  %v2441_v18 = vadd.f32 %v2440_v46, %v2410_v48  ;;  %v3286_v41 = vpop.f32.mrb[124].mxu0  ;;  %v3202_v1 = vpop.f32.mrb[124].mxu1 }
 0x1fa   : > { %v2262_v40 = vadd.f32 %v3286_v41, %v4905_v7  ;;  %v2253_v27 = vpop.f32.mrb[125].mxu0  ;;  %v3203_v51 = vpop.f32.mrb[125].mxu1 }
 0x1fb   : > { %v2442_v53 = vadd.f32 %v2441_v18, %v2411_v19  ;;  %v2254_v26 = vadd.f32 %v2253_v27, %v4892_v25  ;;  %v2374_v45 = vadd.f32 %v2373_v37, %v2249_v54  ;;  %v3287_v49 = vpop.f32.mrb[126].mxu0  ;;  %v3204_v36 = vadd.f32 %v3203_v51, %v3202_v1  ;;  %v3205_v34 = vpop.f32.mrb[126].mxu1 }
 0x1fc   : > { %2346 = vst [vmem:[%s4916_s11 + $0x70] sm:$0xff] %v2262_v40  ;;  %v2265_v3 = vadd.f32 %v3287_v49, %v4911_v14  ;;  %v2256_v43 = vpop.f32.mrb[127].mxu0  ;;  %v3206_v35 = vpop.f32.mrb[127].mxu1  ;;  %v2415_v14 = vmul.f32 %v2262_v40, %v2262_v40 }
 0x1fd   : > { %2344 = vst [vmem:[%s4916_s11 + $0x60] sm:$0xff] %v2254_v26  ;;  %v2375_v47 = vadd.f32 %v2374_v45, %v2254_v26  ;;  %v2413_v59 = vmul.f32 %v2254_v26, %v2254_v26  ;;  %v2443_v7 = vadd.f32 %v2442_v53, %v2412_v56  ;;  %v2257_v13 = vadd.f32 %v2256_v43, %v4898_v39 }
 0x1fe   : > { %2347 = vst [vmem:[%s4916_s11 + $0x78] sm:$0xff] %v2265_v3  ;;  %v3207_v24 = vadd.f32 %v3206_v35, %v3205_v34  ;;  %v2133_v25 = vadd.f32 %v3204_v36, %v4853_v50  ;;  %v2416_v55 = vmul.f32 %v2265_v3, %v2265_v3 }
 0x1ff   : > { %v2444_v12 = vadd.f32 %v2443_v7, %v2413_v59  ;;  %2345 = vst [vmem:[%s4916_s11 + $0x68] sm:$0xff] %v2257_v13  ;;  %v2376_v15 = vadd.f32 %v2375_v47, %v2257_v13  ;;  %v2414_v58 = vmul.f32 %v2257_v13, %v2257_v13 }
 0x200   : > { %v2136_v2 = vadd.f32 %v3207_v24, %v4859_v21 }
 0x201   : > { %v2377_v62 = vadd.f32 %v2376_v15, %v2262_v40  ;;  %v2445_v61 = vadd.f32 %v2444_v12, %v2414_v58  ;;  %v3290_v20 = vpop.f32.mrb[128].mxu0  ;;  %v3208_v9 = vpop.f32.mrb[128].mxu1 }
 0x202   : > { %v2278_v30 = vadd.f32 %v3290_v20, %v4940_v63  ;;  %v2269_v39 = vpop.f32.mrb[129].mxu0  ;;  %v3209_v50 = vpop.f32.mrb[129].mxu1 }
 0x203   : > { %v2446_v38 = vadd.f32 %v2445_v61, %v2415_v14  ;;  %v2270_v54 = vadd.f32 %v2269_v39, %v4926_v11  ;;  %v2378_v42 = vadd.f32 %v2377_v62, %v2265_v3  ;;  %v3291_v16 = vpop.f32.mrb[130].mxu0  ;;  %v3210_v21 = vadd.f32 %v3209_v50, %v3208_v9  ;;  %v3211_v57 = vpop.f32.mrb[130].mxu1 }
 0x204   : > { %2350 = vst [vmem:[%s4916_s11 + $0x90] sm:$0xff] %v2278_v30  ;;  %v2281_v32 = vadd.f32 %v3291_v16, %v4944_v8  ;;  %v2272_v4 = vpop.f32.mrb[131].mxu0  ;;  %v3212_v46 = vpop.f32.mrb[131].mxu1  ;;  %v2419_v8 = vmul.f32 %v2278_v30, %v2278_v30 }
 0x205   : > { %2348 = vst [vmem:[%s4916_s11 + $0x80] sm:$0xff] %v2270_v54  ;;  %v2379_v31 = vadd.f32 %v2378_v42, %v2270_v54  ;;  %v2417_v33 = vmul.f32 %v2270_v54, %v2270_v54  ;;  %v2447_v63 = vadd.f32 %v2446_v38, %v2416_v55  ;;  %v2273_v22 = vadd.f32 %v2272_v4, %v4930_v5 }
 0x206   : > { %2351 = vst [vmem:[%s4916_s11 + $0x98] sm:$0xff] %v2281_v32  ;;  %v3213_v48 = vadd.f32 %v3212_v46, %v3211_v57  ;;  %v2141_v11 = vadd.f32 %v3210_v21, %v4865_v10  ;;  %v2420_v5 = vmul.f32 %v2281_v32, %v2281_v32 }
 0x207   : > { %v2448_v19 = vadd.f32 %v2447_v63, %v2417_v33  ;;  %2349 = vst [vmem:[%s4916_s11 + $0x88] sm:$0xff] %v2273_v22  ;;  %v2380_v37 = vadd.f32 %v2379_v31, %v2273_v22  ;;  %v2418_v18 = vmul.f32 %v2273_v22, %v2273_v22 }
 0x208   : > { %v2144_v41 = vadd.f32 %v3213_v48, %v4871_v44 }
 0x209   : > { %v2381_v1 = vadd.f32 %v2380_v37, %v2278_v30  ;;  %v2449_v40 = vadd.f32 %v2448_v19, %v2418_v18  ;;  %v3294_v27 = vpop.f32.mrb[132].mxu0  ;;  %v3214_v56 = vpop.f32.mrb[132].mxu1 }
 0x20a   : > { %v2294_v53 = vadd.f32 %v3294_v27, %v2133_v25  ;;  %v2285_v51 = vpop.f32.mrb[133].mxu0  ;;  %v3215_v45 = vpop.f32.mrb[133].mxu1 }
 0x20b   : > { %v2450_v26 = vadd.f32 %v2449_v40, %v2419_v8  ;;  %v2286_v10 = vadd.f32 %v2285_v51, %v4954_v29  ;;  %v2382_v49 = vadd.f32 %v2381_v1, %v2281_v32  ;;  %v3295_v36 = vpop.f32.mrb[134].mxu0  ;;  %v3216_v34 = vadd.f32 %v3215_v45, %v3214_v56  ;;  %v3217_v44 = vpop.f32.mrb[134].mxu1 }
 0x20c   : > { %2354 = vst [vmem:[%s4916_s11 + $0xb0] sm:$0xff] %v2294_v53  ;;  %v2297_v3 = vadd.f32 %v3295_v36, %v2136_v2  ;;  %v2288_v43 = vpop.f32.mrb[135].mxu0  ;;  %v3218_v35 = vpop.f32.mrb[135].mxu1  ;;  %v2423_v2 = vmul.f32 %v2294_v53, %v2294_v53 }
 0x20d   : > { %2352 = vst [vmem:[%s4916_s11 + $0xa0] sm:$0xff] %v2286_v10  ;;  %v2383_v47 = vadd.f32 %v2382_v49, %v2286_v10  ;;  %v2421_v59 = vmul.f32 %v2286_v10, %v2286_v10  ;;  %v2451_v7 = vadd.f32 %v2450_v26, %v2420_v5  ;;  %v2289_v13 = vadd.f32 %v2288_v43, %v4958_v28 }
 0x20e   : > { %2355 = vst [vmem:[%s4916_s11 + $0xb8] sm:$0xff] %v2297_v3  ;;  %v3219_v24 = vadd.f32 %v3218_v35, %v3217_v44  ;;  %v2149_v25 = vadd.f32 %v3216_v34, %v4877_v6  ;;  %v2424_v28 = vmul.f32 %v2297_v3, %v2297_v3 }
 0x20f   : > { %v2452_v29 = vadd.f32 %v2451_v7, %v2421_v59  ;;  %2353 = vst [vmem:[%s4916_s11 + $0xa8] sm:$0xff] %v2289_v13  ;;  %v2384_v12 = vadd.f32 %v2383_v47, %v2289_v13  ;;  %v2422_v15 = vmul.f32 %v2289_v13, %v2289_v13 }
 0x210   : > { %v2152_v58 = vadd.f32 %v3219_v24, %v4883_v60 }
 0x211   : > { %v2385_v14 = vadd.f32 %v2384_v12, %v2294_v53  ;;  %v2453_v62 = vadd.f32 %v2452_v29, %v2422_v15  ;;  %v3298_v61 = vpop.f32.mrb[136].mxu0  ;;  %v3220_v20 = vpop.f32.mrb[136].mxu1 }
 0x212   : > { %v2310_v9 = vadd.f32 %v3298_v61, %v2149_v25  ;;  %v2301_v30 = vpop.f32.mrb[137].mxu0  ;;  %v3221_v55 = vpop.f32.mrb[137].mxu1 }
 0x213   : > { %v2454_v39 = vadd.f32 %v2453_v62, %v2423_v2  ;;  %v2302_v6 = vadd.f32 %v2301_v30, %v2141_v11  ;;  %v2386_v38 = vadd.f32 %v2385_v14, %v2297_v3  ;;  %v3299_v50 = vpop.f32.mrb[138].mxu0  ;;  %v3222_v54 = vadd.f32 %v3221_v55, %v3220_v20  ;;  %v3223_v42 = vpop.f32.mrb[138].mxu1 }
 0x214   : > { %2358 = vst [vmem:[%s4916_s11 + $0xd0] sm:$0xff] %v2310_v9  ;;  %v2313_v60 = vadd.f32 %v3299_v50, %v2152_v58  ;;  %v2304_v16 = vpop.f32.mrb[139].mxu0  ;;  %v3224_v4 = vpop.f32.mrb[139].mxu1  ;;  %v2427_v19 = vmul.f32 %v2310_v9, %v2310_v9 }
 0x215   : > { %2356 = vst [vmem:[%s4916_s11 + $0xc0] sm:$0xff] %v2302_v6  ;;  %v2387_v21 = vadd.f32 %v2386_v38, %v2302_v6  ;;  %v2425_v57 = vmul.f32 %v2302_v6, %v2302_v6  ;;  %v2455_v32 = vadd.f32 %v2454_v39, %v2424_v28  ;;  %v2305_v31 = vadd.f32 %v2304_v16, %v2144_v41 }
 0x216   : > { %2359 = vst [vmem:[%s4916_s11 + $0xd8] sm:$0xff] %v2313_v60  ;;  %v3225_v33 = vadd.f32 %v3224_v4, %v3223_v42  ;;  %v2157_v63 = vadd.f32 %v3222_v54, %v4889_v0  ;;  %v2428_v27 = vmul.f32 %v2313_v60, %v2313_v60 }
 0x217   : > { %v2456_v46 = vadd.f32 %v2455_v32, %v2425_v57  ;;  %2357 = vst [vmem:[%s4916_s11 + $0xc8] sm:$0xff] %v2305_v31  ;;  %v2388_v22 = vadd.f32 %v2387_v21, %v2305_v31  ;;  %v2426_v48 = vmul.f32 %v2305_v31, %v2305_v31 }
 0x218   : > { %v2160_v11 = vadd.f32 %v3225_v33, %v4895_v23 }
 0x219   : > { %v2389_v37 = vadd.f32 %v2388_v22, %v2310_v9  ;;  %v2457_v18 = vadd.f32 %v2456_v46, %v2426_v48  ;;  %v3302_v8 = vpop.f32.mrb[140].mxu0  ;;  %v3226_v1 = vpop.f32.mrb[140].mxu1 }
 0x21a   : > { %v2317_v40 = vpop.f32.mrb[141].mxu0  ;;  %v3227_v41 = vpop.f32.mrb[141].mxu1 }
 0x21b   : > { %v2458_v56 = vadd.f32 %v2457_v18, %v2427_v19  ;;  %v2318_v53 = vadd.f32 %v2317_v40, %v2157_v63  ;;  %v2390_v51 = vadd.f32 %v2389_v37, %v2313_v60  ;;  %v3303_v0 = vpop.f32.mrb[142].mxu0  ;;  %v3228_v5 = vadd.f32 %v3227_v41, %v3226_v1  ;;  %v3229_v26 = vpop.f32.mrb[142].mxu1 }
 0x21c   : > { %v2320_v45 = vpop.f32.mrb[143].mxu0  ;;  %v3230_v36 = vpop.f32.mrb[143].mxu1 }
 0x21d   : > { %2360 = vst [vmem:[%s4916_s11 + $0xe0] sm:$0xff] %v2318_v53  ;;  %v2391_v23 = vadd.f32 %v2390_v51, %v2318_v53  ;;  %v2429_v10 = vmul.f32 %v2318_v53, %v2318_v53  ;;  %v2459_v49 = vadd.f32 %v2458_v56, %v2428_v27  ;;  %v2321_v34 = vadd.f32 %v2320_v45, %v2160_v11 }
 0x21e   : > { %v2165_v44 = vadd.f32 %v3228_v5, %v4901_v17  ;;  %v3231_v3 = vadd.f32 %v3230_v36, %v3229_v26 }
 0x21f   : > { %v2460_v43 = vadd.f32 %v2459_v49, %v2429_v10  ;;  %2361 = vst [vmem:[%s4916_s11 + $0xe8] sm:$0xff] %v2321_v34  ;;  %v2392_v47 = vadd.f32 %v2391_v23, %v2321_v34  ;;  %v2430_v59 = vmul.f32 %v2321_v34, %v2321_v34 }
 0x220   : > { %v2326_v7 = vadd.f32 %v3302_v8, %v2165_v44  ;;  %v2168_v35 = vadd.f32 %v3231_v3, %v4908_v52 }
 0x221   : > { %v2461_v13 = vadd.f32 %v2460_v43, %v2430_v59 }
 0x222   : > { %2362 = vst [vmem:[%s4916_s11 + $0xf0] sm:$0xff] %v2326_v7  ;;  %v2431_v24 = vmul.f32 %v2326_v7, %v2326_v7  ;;  %v2329_v25 = vadd.f32 %v3303_v0, %v2168_v35  ;;  %v2393_v29 = vadd.f32 %v2392_v47, %v2326_v7 }
 0x224   : > { %2363 = vst [vmem:[%s4916_s11 + $0xf8] sm:$0xff] %v2329_v25  ;;  %v2432_v12 = vmul.f32 %v2329_v25, %v2329_v25  ;;  %v2394_v15 = vadd.f32 %v2393_v29, %v2329_v25  ;;  %v2462_v58 = vadd.f32 %v2461_v13, %v2431_v24 }
 0x226   : > { %v2395_v2 = vrot.slane %v2394_v15, 4  ;;  %v2463_v17 = vadd.f32 %v2462_v58, %v2432_v12 }
 0x228   : > { %v2396_v14 = vadd.f32 %v2395_v2, %v2394_v15  ;;  %v2464_v62 = vrot.slane %v2463_v17, 4 }
 0x22a   : > { %v2397_v61 = vrot.slane %v2396_v14, 2  ;;  %v2465_v20 = vadd.f32 %v2464_v62, %v2463_v17 }
 0x22c   : > { %v2398_v9 = vadd.f32 %v2397_v61, %v2396_v14  ;;  %v2466_v30 = vrot.slane %v2465_v20, 2 }
 0x22e   : > { %v2399_v28 = vrot.slane %v2398_v9, 1  ;;  %v2467_v52 = vadd.f32 %v2466_v30, %v2465_v20 }
 0x230   : > { %v2468_v39 = vrot.slane %v2467_v52, 1  ;;  %v2400_v55 = vadd.f32 %v2399_v28, %v2398_v9 }
 0x232   : > { %v2469_v6 = vadd.f32 %v2468_v39, %v2467_v52 }
 0x234   : > { %v2471_v38 = vsel %vm2470_vm6, %v2400_v55, %v2469_v6 }
 0x235   : > { %2472 = vst [vmem:[%s262_s15] sm:$0x3] %v2471_v38 }
 0x236 PF: > { %s17_s21 = sadd.s32 1, %s3412_s21  }
 0x237   : > { %p14_p4 = scmp.ge.s32.totalorder %s17_s21, 4  }
 0x239   :  { %16 = sbr.rel (!%p14_p4) target bundleno = 1 (0x1), region = 82 }

</bundles_post_ra>
